<compile_context>
chip_gen: v7x
topology: tpu7x:2x2x1
jax: 0.10.0
libtpu: 0.0.40
codegen_flags: <defaults>
</compile_context>

<pallas_src>
import functools

import jax
import jax.numpy as jnp
from jax.experimental import pallas as pl
from jax.experimental.pallas import tpu as pltpu

IN_FEATURES = 25600
HIDDEN = 512
LANE = 128
SUBLANE = 8


def _round_up(x, m):
    return (x + m - 1) // m * m


def fc_kernel(x_ref, w1_ref, b1_ref, w2_ref, o_ref, acc_ref, *, tk):
    """One (hidden-chunk, K-tile) grid step of the fused FC forward.

    Grid axis 0 ("parallel") splits the hidden dimension into chunks; grid
    axis 1 ("arbitrary") reduces over K for the first matmul. The (B, Hc)
    accumulator lives in VMEM scratch; on the last K step we add bias, apply
    ELU, and compute this chunk's partial contribution to the second matmul.
    """
    k = pl.program_id(1)

    @pl.when(k == 0)
    def _():
        acc_ref[...] = jnp.zeros_like(acc_ref)

    # x is fully resident in VMEM; slice its K tile in-kernel so W1 is the
    # only operand streamed from HBM on the per-step critical path.
    k_off = pl.multiple_of(k * tk, LANE)
    x_tile = x_ref[:, pl.ds(k_off, tk)]
    w1_tile = w1_ref[...]
    if w1_tile.dtype != x_tile.dtype:
        # bf16-weight path: feed bf16 x bf16 to the MXU, accumulate in f32.
        x_tile = x_tile.astype(w1_tile.dtype)
    acc_ref[...] += jnp.dot(x_tile, w1_tile, preferred_element_type=jnp.float32)

    @pl.when(k == pl.num_programs(1) - 1)
    def _():
        h = acc_ref[...] + b1_ref[...]                     # (B, Hc) + (1, Hc)
        # ELU(alpha=1); clamp the exp argument so the discarded branch of the
        # select never produces inf.
        h = jnp.where(h > 0, h, jnp.exp(jnp.minimum(h, 0.0)) - 1.0)
        part = jnp.dot(h, w2_ref[...], preferred_element_type=jnp.float32)
        o_ref[0] = part.astype(o_ref.dtype)                # (B, Cp) partial


@functools.partial(jax.jit, static_argnames=("tk", "n_hidden_chunks"))
def fc_forward(x, w1, b1, w2, b2, *, tk=6400, n_hidden_chunks=2):
    B, K = x.shape
    H = w1.shape[1]
    C = w2.shape[1]
    assert K == w1.shape[0] == IN_FEATURES
    assert K % tk == 0, "reduction dim must be divisible by tk"
    assert H % n_hidden_chunks == 0
    Hc = H // n_hidden_chunks

    # Pad batch to the f32 sublane multiple and classes to a full lane width
    # (lane-dense output; avoids masked vst and odd-shaped W2 tiles).
    Bp = max(_round_up(B, SUBLANE), SUBLANE)
    Cp = max(_round_up(C, LANE), LANE)

    if Bp != B:
        x = jnp.pad(x, ((0, Bp - B), (0, 0)))
    w2p = w2.astype(jnp.float32)
    if Cp != C:
        w2p = jnp.pad(w2p, ((0, 0), (0, Cp - C)))
    b1_2d = b1.astype(jnp.float32).reshape(1, H)
    b2p = b2.astype(jnp.float32)
    if Cp != C:
        b2p = jnp.pad(b2p, (0, Cp - C))

    nk = K // tk
    grid = (n_hidden_chunks, nk)

    flops = 2 * Bp * K * H + 2 * Bp * H * Cp
    bytes_accessed = (
        w1.size * w1.dtype.itemsize          # dominant: W1 stream
        + x.size * x.dtype.itemsize
        + w2p.size * 4 + b1_2d.size * 4
        + n_hidden_chunks * Bp * Cp * 4
    )
    cost = pl.CostEstimate(
        flops=int(flops),
        transcendentals=int(Bp * H),
        bytes_accessed=int(bytes_accessed),
    )

    partials = pl.pallas_call(
        functools.partial(fc_kernel, tk=tk),
        out_shape=jax.ShapeDtypeStruct((n_hidden_chunks, Bp, Cp), jnp.float32),
        grid_spec=pltpu.PrefetchScalarGridSpec(
            num_scalar_prefetch=0,
            grid=grid,
            in_specs=[
                pl.BlockSpec((Bp, K), lambda h, k: (0, 0)),    # x (resident)
                pl.BlockSpec((tk, Hc), lambda h, k: (k, h)),   # W1 (streamed)
                pl.BlockSpec((1, Hc), lambda h, k: (0, h)),    # b1 chunk
                pl.BlockSpec((Hc, Cp), lambda h, k: (h, 0)),   # W2 chunk
            ],
            out_specs=pl.BlockSpec((1, Bp, Cp), lambda h, k: (h, 0, 0)),
            scratch_shapes=[pltpu.VMEM((Bp, Hc), jnp.float32)],
        ),
        compiler_params=pltpu.CompilerParams(
            dimension_semantics=("parallel", "arbitrary"),
            # ~15 MiB working set (f32 W1) / ~9 MiB (bf16); 32 MiB leaves
            # headroom on v7x (64 MiB physical) and fits v5e/v6e comfortably.
            vmem_limit_bytes=32 * 1024 * 1024,
        ),
        cost_estimate=cost,
    )(x, w1, b1_2d, w2p)

    out = partials.sum(axis=0) + b2p.reshape(1, Cp)
    return out[:B, :C]


def init_params(key, num_classes):
    """Deterministic init mimicking PyTorch Linear's U(-1/sqrt(fan_in), +)."""
    k1, k2, k3, k4 = jax.random.split(key, 4)
    lim1 = 1.0 / jnp.sqrt(jnp.float32(IN_FEATURES))
    lim2 = 1.0 / jnp.sqrt(jnp.float32(HIDDEN))
    w1 = jax.random.uniform(k1, (IN_FEATURES, HIDDEN), jnp.float32, -lim1, lim1)
    b1 = jax.random.uniform(k2, (HIDDEN,), jnp.float32, -lim1, lim1)
    w2 = jax.random.uniform(k3, (HIDDEN, num_classes), jnp.float32, -lim2, lim2)
    b2 = jax.random.uniform(k4, (num_classes,), jnp.float32, -lim2, lim2)
    return w1, b1, w2, b2


def reference(x, w1, b1, w2, b2):
    h = x @ w1 + b1
    h = jnp.where(h > 0, h, jnp.exp(jnp.minimum(h, 0.0)) - 1.0)
    return h @ w2 + b2


if __name__ == "__main__":
    num_classes = 10
    batch = 8

    key = jax.random.PRNGKey(0)
    kx, kp = jax.random.split(key)
    x = jax.random.normal(kx, (batch, IN_FEATURES), jnp.float32)
    w1, b1, w2, b2 = init_params(kp, num_classes)

    ref = reference(x, w1, b1, w2, b2)

    # f32-weight path (exact PyTorch semantics).
    out = jax.block_until_ready(fc_forward(x, w1, b1, w2, b2))
    assert out.shape == (batch, num_classes)
    assert jnp.allclose(out, ref, atol=1e-3, rtol=1e-3), float(
        jnp.max(jnp.abs(out - ref))
    )

    # bf16-weight path: halves HBM traffic for the bandwidth-dominant W1
    # stream (~2x end-to-end on all generations); accumulation stays f32.
    out_bf16 = jax.block_until_ready(
        fc_forward(x, w1.astype(jnp.bfloat16), b1, w2, b2)
    )
    assert out_bf16.shape == (batch, num_classes)
    assert jnp.allclose(out_bf16, ref, atol=5e-2, rtol=5e-2), float(
        jnp.max(jnp.abs(out_bf16 - ref))
    )

    print("KERNEL_OK")
</pallas_src>

<mosaic_0001>
module attributes {stable_mosaic.version = 11 : i64} {
  func.func @fc_kernel(%arg0: i32, %arg1: i32, %arg2: memref<8x25600xf32, #tpu.memory_space<vmem>>, %arg3: memref<6400x256xf32, #tpu.memory_space<vmem>>, %arg4: memref<1x256xf32, #tpu.memory_space<vmem>>, %arg5: memref<256x128xf32, #tpu.memory_space<vmem>>, %arg6: memref<1x8x128xf32, #tpu.memory_space<vmem>>, %arg7: memref<8x256xf32, #tpu.memory_space<vmem>>) attributes {dimension_semantics = [#tpu.dimension_semantics<parallel>, #tpu.dimension_semantics<arbitrary>], iteration_bounds = array<i64: 2, 4>, scalar_prefetch = 0 : i64, scratch_operands = 1 : i64, tpu.core_type = #tpu.core_type<tc>, window_params = [{pipeline_mode = #tpu.pipeline_mode<synchronous>, transform_indices = @transform_0, window_bounds = array<i64: 8, 25600>}, {transform_indices = @transform_1, window_bounds = array<i64: 6400, 256>}, {transform_indices = @transform_2, window_bounds = array<i64: 1, 256>}, {transform_indices = @transform_3, window_bounds = array<i64: 256, 128>}, {transform_indices = @transform_4, window_bounds = array<i64: 1, 8, 128>}]} {
    %c0_i32 = arith.constant 0 : i32
    %0 = arith.cmpi eq, %arg1, %c0_i32 : i32
    %1 = arith.extui %0 : i1 to i32
    %c0_i32_0 = arith.constant 0 : i32
    %2 = arith.cmpi ne, %1, %c0_i32_0 : i32
    scf.if %2 {
      %cst_8 = arith.constant 0.000000e+00 : f32
      %15 = vector.broadcast %cst_8 : f32 to vector<8x256xf32>
      %c0_9 = arith.constant 0 : index
      %c0_10 = arith.constant 0 : index
      %16 = vector.load %arg7[%c0_9, %c0_10] : memref<8x256xf32, #tpu.memory_space<vmem>>, vector<8x256xf32>
      tpu.vector_store %arg7[%c0_9, %c0_10], %15 {strides = array<i32>} : memref<8x256xf32, #tpu.memory_space<vmem>>, vector<8x256xf32>,
    } else {
    }
    %c6400_i32 = arith.constant 6400 : i32
    %3 = arith.muli %arg1, %c6400_i32 : i32
    %4 = tpu.assume_multiple %3, 128 : i32
    %c0 = arith.constant 0 : index
    %5 = arith.index_cast %4 : i32 to index
    %6 = vector.load %arg2[%c0, %5] : memref<8x25600xf32, #tpu.memory_space<vmem>>, vector<8x6400xf32>
    %c0_1 = arith.constant 0 : index
    %c0_2 = arith.constant 0 : index
    %7 = vector.load %arg3[%c0_1, %c0_2] : memref<6400x256xf32, #tpu.memory_space<vmem>>, vector<6400x256xf32>
    %c0_3 = arith.constant 0 : index
    %c0_4 = arith.constant 0 : index
    %8 = vector.load %arg7[%c0_3, %c0_4] : memref<8x256xf32, #tpu.memory_space<vmem>>, vector<8x256xf32>
    %cst = arith.constant dense<0.000000e+00> : vector<8x256xf32>
    %9 = tpu.matmul %6, %7, %cst {dimension_numbers = #tpu.dot_dimension_numbers<[1], [0], [0], [1], [0, 0, 1, 1], [], []>} : vector<8x6400xf32>, vector<6400x256xf32>, vector<8x256xf32> -> vector<8x256xf32>
    %10 = arith.addf %8, %9 : vector<8x256xf32>
    %c0_5 = arith.constant 0 : index
    %c0_6 = arith.constant 0 : index
    %11 = vector.load %arg7[%c0_5, %c0_6] : memref<8x256xf32, #tpu.memory_space<vmem>>, vector<8x256xf32>
    tpu.vector_store %arg7[%c0_5, %c0_6], %10 {strides = array<i32>} : memref<8x256xf32, #tpu.memory_space<vmem>>, vector<8x256xf32>,
    %c3_i32 = arith.constant 3 : i32
    %12 = arith.cmpi eq, %arg1, %c3_i32 : i32
    %13 = arith.extui %12 : i1 to i32
    %c0_i32_7 = arith.constant 0 : i32
    %14 = arith.cmpi ne, %13, %c0_i32_7 : i32
    scf.if %14 {
      %c0_8 = arith.constant 0 : index
      %c0_9 = arith.constant 0 : index
      %15 = vector.load %arg7[%c0_8, %c0_9] : memref<8x256xf32, #tpu.memory_space<vmem>>, vector<8x256xf32>
      %c0_10 = arith.constant 0 : index
      %c0_11 = arith.constant 0 : index
      %16 = vector.load %arg4[%c0_10, %c0_11] : memref<1x256xf32, #tpu.memory_space<vmem>>, vector<1x256xf32>
      %17 = vector.broadcast %16 : vector<1x256xf32> to vector<8x256xf32>
      %18 = arith.addf %15, %17 : vector<8x256xf32>
      %cst_12 = arith.constant 0.000000e+00 : f32
      %19 = vector.broadcast %cst_12 : f32 to vector<8x256xf32>
      %20 = arith.cmpf ogt, %18, %19 : vector<8x256xf32>
      %cst_13 = arith.constant 0.000000e+00 : f32
      %21 = vector.broadcast %cst_13 : f32 to vector<8x256xf32>
      %22 = arith.minimumf %18, %21 : vector<8x256xf32>
      %23 = math.exp %22 : vector<8x256xf32>
      %cst_14 = arith.constant 1.000000e+00 : f32
      %24 = vector.broadcast %cst_14 : f32 to vector<8x256xf32>
      %25 = arith.subf %23, %24 : vector<8x256xf32>
      %26 = arith.select %20, %18, %25 : vector<8x256xi1>, vector<8x256xf32>
      %c0_15 = arith.constant 0 : index
      %c0_16 = arith.constant 0 : index
      %27 = vector.load %arg5[%c0_15, %c0_16] : memref<256x128xf32, #tpu.memory_space<vmem>>, vector<256x128xf32>
      %cst_17 = arith.constant dense<0.000000e+00> : vector<8x128xf32>
      %28 = tpu.matmul %26, %27, %cst_17 {dimension_numbers = #tpu.dot_dimension_numbers<[1], [0], [0], [1], [0, 0, 1, 1], [], []>} : vector<8x256xf32>, vector<256x128xf32>, vector<8x128xf32> -> vector<8x128xf32>
      %c0_18 = arith.constant 0 : index
      %c0_19 = arith.constant 0 : index
      %c0_20 = arith.constant 0 : index
      %29 = vector.load %arg6[%c0_18, %c0_19, %c0_20] : memref<1x8x128xf32, #tpu.memory_space<vmem>>, vector<1x8x128xf32>
      %30 = vector.shape_cast %29 : vector<1x8x128xf32> to vector<8x128xf32>
      %31 = vector.shape_cast %28 : vector<8x128xf32> to vector<1x8x128xf32>
      tpu.vector_store %arg6[%c0_18, %c0_19, %c0_20], %31 {strides = array<i32>} : memref<1x8x128xf32, #tpu.memory_space<vmem>>, vector<1x8x128xf32>,
    } else {
    }
    return
  }
  func.func @transform_0(%arg0: i32, %arg1: i32) -> (i32, i32) {
    %c0_i32 = arith.constant 0 : i32
    %c0_i32_0 = arith.constant 0 : i32
    %c0_i32_1 = arith.constant 0 : i32
    return %c0_i32, %c0_i32_0 : i32, i32
  }
  func.func @transform_1(%arg0: i32, %arg1: i32) -> (i32, i32) {
    %c0_i32 = arith.constant 0 : i32
    return %arg1, %arg0 : i32, i32
  }
  func.func @transform_2(%arg0: i32, %arg1: i32) -> (i32, i32) {
    %c0_i32 = arith.constant 0 : i32
    %c0_i32_0 = arith.constant 0 : i32
    return %c0_i32, %arg0 : i32, i32
  }
  func.func @transform_3(%arg0: i32, %arg1: i32) -> (i32, i32) {
    %c0_i32 = arith.constant 0 : i32
    %c0_i32_0 = arith.constant 0 : i32
    return %arg0, %c0_i32 : i32, i32
  }
  func.func @transform_4(%arg0: i32, %arg1: i32) -> (i32, i32, i32) {
    %c0_i32 = arith.constant 0 : i32
    %c0_i32_0 = arith.constant 0 : i32
    %c0_i32_1 = arith.constant 0 : i32
    return %arg0, %c0_i32, %c0_i32_0 : i32, i32, i32
  }
}

</mosaic_0001>

<bundles_post_ra>
// kernel: fc_forward.1
= control target key start
LH: loop header
LB: loop body
LE: loop exit
PB: predicated region body
PF: predicated region fallthrough
CT: control target
= control target key end

     0   :  { %s8082_s0 = inlined_call_operand.hbm [shape: f32[8,25600], index: 0, kind: input, shape index: {}]   ;;  %s8083_s1 = inlined_call_operand.hbm [shape: f32[25600,512], index: 1, kind: input, shape index: {}]   ;;  %s8084_s2 = inlined_call_operand.hbm [shape: f32[1,512], index: 2, kind: input, shape index: {}]   ;;  %s8085_s3 = inlined_call_operand.vmem [shape: f32[512,128], index: 3, kind: input, shape index: {}]   ;;  %s8086_s4 = inlined_call_operand.vmem [shape: f32[2,8,128], index: 4, kind: output, shape index: {}]  }
   0x1   :  { %8097 = sst [smem:[#allocation14_spill]] %s8085_s3 }
   0x2   :  { %9 = vsyncpa [#allocation4], 0 }
   0x3   :  { %10 = vsyncpa [#allocation6], 0 }
   0x4   :  { %12 = vsyncpa [#allocation6 + $0x1], 0  ;;  %s6090_s15 = smov 0   ;;  %s6092_s16 = smov 0  }
   0x5   :  { %s6094_s17 = smov 0   ;;  %s6096_s18 = smov 0  }
   0x6   :  { %s6098_s19 = smov 0   ;;  %s6100_s20 = smov 0  }
   0x7   :  { %s6102_s21 = smov 0   ;;  %s6104_s22 = smov 0  }
   0x8   :  { %s6106_s23 = smov 0   ;;  %s6108_s24 = smov 0  }
   0x9   :  { %s6110_s25 = smov 0  }
   0xa LB: > { %8098 = sst [smem:[#allocation11_spill]] %s6040_s21  ;;  %s27_s26 = sadd.s32 1, %s6048_s23  ;;  %s6056_s25 = sphi %s6110_s25, %s18_s25   ;;  %s6052_s24 = sphi %s6108_s24, %s8130_s24   ;;  %s6048_s23 = sphi %s6106_s23, %s8129_s23   ;;  %s6044_s22 = sphi %s6104_s22, %s8128_s22   ;;  %s6040_s21 = sphi %s6102_s21, %s8127_s21   ;;  %s6036_s20 = sphi %s6100_s20, %s8126_s20   ;;  %s6032_s19 = sphi %s6098_s19, %s8125_s19   ;;  %s6028_s18 = sphi %s6096_s18, %s8124_s18   ;;  %s6024_s17 = sphi %s6094_s17, %s8123_s17   ;;  %s6020_s16 = sphi %s6092_s16, %s8122_s16   ;;  %s6016_s15 = sphi %s6090_s15, %s8121_s15  }
   0xb   : > { %s30_s27 = sadd.s32 1, %s6052_s24  ;;  %p28_p0 = scmp.ge.s32.totalorder %s27_s26, 4 }
   0xc   : > { %s60_s28 = sadd.s32 1, %s6036_s20  ;;  %p67_p1 = scmp.ne.s32.totalorder %s6036_s20, %s6032_s19 }
   0xd   : > { %p8091_p2 = scmp.eq.s32.totalorder %s6056_s25, 0  ;;  %s8132_s26 = smov (%p28_p0, %s27_s26), 0 }
   0xe   : > { %8099 = sst [smem:[#allocation12_spill]] %s8132_s26  ;;  %s8134_s27 = smov (!%p28_p0, %s30_s27), %s6052_s24 }
   0xf   : > { %s55_s29 = ssub.s32 %s6048_s23, %s8132_s26  ;;  %p6158_p3 = por %p8091_p2, %p67_p1 }
  0x10   : > { %p32_p4 = scmp.ge.s32.totalorder %s8134_s27, 2  ;;  %p8090_p5 = scmp.lt.s32.totalorder %s6056_s25, 8 }
  0x11   : > { %s186_s5 = sand.u32 1, %s6056_s25   ;;  %s188_s6 = sand.u32 1, %s6036_s20  }
  0x12   : > { %s8136_s27 = smov (%p32_p4, %s8134_s27), 0  ;;  %s5749_s8 = smul.u32 12800, %s188_s6 }
  0x13   : > { %8101 = sst [smem:[#allocation13_spill]] %s8136_s27  ;;  %s6169_s7 = ssub.s32 %s6052_s24, %s8136_s27 }
  0x14   : > { %s57_s9 = sor.u32 %s6169_s7, %s55_s29  ;;  %s4013_s10 = sshll.u32 %s6052_s24, 1 }
  0x15   : > { %p58_p6 = scmp.eq.s32.totalorder %s57_s9, 0  ;;  %s4032_s11 = smul.u32 3200, %s6048_s23 }
  0x16   : > { %s190_s12 = scalar_lea.vmem [#allocation5], %s5749_s8  ;;  %p6183_p7 = pnand %p8090_p5, %p6158_p3 }
  0x17   : > { %s200_s13 = sshll.u32 %s190_s12, 4  ;;  %s197_s26 = sadd.s32 %s4032_s11, %s4013_s10  ;;  %s6177_s13 = int_to_ptr.vmem [resolvable:$true] %s200_s13 }
  0x18   : > { %s6175_s14 = scalar_select %p58_p6, %s6036_s20, %s60_s28  }
  0x19   : > { %s4015_s21 = sshll.u32 %s197_s26, 7  ;;  %s6192_s28 = scalar_lea.sflag [#allocation6], %s186_s5 }
  0x1a   : > { %s6190_s29 = scalar_lea.hbm %s8083_s1, %s4015_s21  ;;  %p5872_p9 = pneg %p6183_p7 }
  0x1b   : > { %s5870_s26 = scalar_lea.hbm %s6190_s29, 204800  ;;  %s5875_s8 = scalar_lea.hbm %s8083_s1, 1638400 }
  0x1c   : > { %p5871_p8 = scmp.ne.s32.totalorder %s6190_s29, %s5870_s26  ;;  %p5876_p12 = scmp.lt.u32.totalorder %s6190_s29, %s8083_s1 }
  0x1d   : > { %p5877_p13 = scmp.lt.u32.totalorder %s5875_s8, %s5870_s26  ;;  %p5879_p1 = scmp.lt.u32.totalorder %s5870_s26, %s6190_s29 }
  0x1e   : > { %p5873_p10 = pnand %p5872_p9, %p5871_p8 }
  0x1f   : > { %p5878_p0 = por %p5877_p13, %p5876_p12 }
  0x20   : > { %p5874_p11 = pneg %p5873_p10 }
  0x21   : > { %p5880_p3 = por %p5879_p1, %p5878_p0 }
  0x23   : > { %p5881_p4 = pnand %p5880_p3, %p5874_p11 }
  0x25   : > { %5884 = shalt.err (!%p5881_p4)
}
  0x26   : > { %s5885_s5 = scalar_lea.vmem %s6177_s13, 204800  ;;  %s6058_s10 = smov [#allocation5]  }
  0x27   : > { %p5886_p6 = scmp.ne.s32.totalorder %s6177_s13, %s5885_s5  ;;  %s5890_s11 = sshll.u32 %s6058_s10, 4  ;;  %s5891_s11 = int_to_ptr.vmem [resolvable:$false] %s5890_s11 }
  0x28   : > { %s5892_s12 = scalar_lea.vmem %s5891_s11, 409600  ;;  %p5893_p5 = scmp.lt.s32.totalorder %s6177_s13, %s5891_s11 }
  0x29   : > { %p5888_p8 = pnand %p5886_p6, %p5872_p9  ;;  %p5894_p12 = scmp.lt.s32.totalorder %s5892_s12, %s5885_s5 }
  0x2b   : > { %p5889_p10 = pneg %p5888_p8  ;;  %p5895_p13 = por %p5894_p12, %p5893_p5 }
  0x2d   : > { %p5896_p0 = pnand %p5895_p13, %p5889_p10 }
  0x2f   : > { %5899 = shalt.err (!%p5896_p0)
}
  0x30   : > { %s6059_s6 = smov 512   ;;  %s6060_s26 = smov 256  }
  0x31   : > { %s6061_s30 = smov 16   ;;  %s4008_s27 = sadd.s32 4294967295, %s6056_s25  }
  0x32   : > { %5766 = dma.hbm_to_vmem [thread:$0]  (!%p6183_p7), %s6190_s29, 204800, %s6177_s13, %s6192_s28, %s6059_s6, %s6060_s26, %s6061_s30  }
  0x33   : > { %p73_p5 = scmp.ne.s32.totalorder %s6032_s19, %s6028_s18  ;;  %p6225_p9 = scmp.eq.s32.totalorder %s4008_s27, 0 }
  0x34   : > { %p99_p11 = scmp.ne.s32.totalorder %s6020_s16, %s6016_s15  ;;  %p4010_p1 = scmp.ge.s32.totalorder %s6056_s25, 1 }
  0x35   : > { %s8103_s8 = scalar_select %p6225_p9, 1, 0 }
  0x36   : > { %p6234_p3 = por %p6225_p9, %p73_p5  ;;  %p162_p7 = scmp.lt.s32.totalorder %s6056_s25, 9 }
  0x37   : > { %p6241_p4 = por %p99_p11, %p6225_p9  ;;  %s6062_s29 = smov [#allocation3]  }
  0x38   : > { %s8104_s3 = scalar_select %p6234_p3, 1, 0 }
  0x39   : > { %s8105_s18 = scalar_select %p6241_p4, 1, 0 }
  0x3a   : > { %p6245_p6 = pnand %p4010_p1, %p162_p7  ;;  %s175_s21 = sshll.u32 %s6062_s29, 4  ;;  %s176_s21 = int_to_ptr.vmem [resolvable:$true] %s175_s21 }
  0x3b   : > { %p84_p10 = scmp.eq.s32.totalorder %s6169_s7, 0  ;;  %s86_s9 = sadd.s32 1, %s6024_s17 }
  0x3c   : > { %s8106_s13 = scalar_select %p6245_p6, 1, 0 }
  0x3d   : > { %p5759_p8 = pneg %p6245_p6  ;;  %s5900_s12 = scalar_lea.hbm %s8082_s0, 25600 }
  0x3e   : > { %s6260_s5 = scalar_select %p84_p10, %s6024_s17, %s86_s9  }
  0x3f   : > { %p6254_p12 = pnand %p5759_p8, %p6225_p9  ;;  %p5901_p0 = scmp.ne.s32.totalorder %s8082_s0, %s5900_s12 }
  0x40   : > { %p5907_p7 = scmp.lt.u32.totalorder %s5900_s12, %s8082_s0 }
  0x41   : > { %p5902_p5 = pneg %p6254_p12 }
  0x43   : > { %p5903_p11 = pnand %p5902_p5, %p5901_p0 }
  0x45   : > { %p5904_p1 = pneg %p5903_p11 }
  0x47   : > { %p5909_p8 = pnand %p5907_p7, %p5904_p1 }
  0x49   : > { %5912 = shalt.err (!%p5909_p8)
}
  0x4a   : > { %s5913_s29 = scalar_lea.vmem %s176_s21, 25600  ;;  %p5921_p4 = scmp.lt.s32.totalorder %s176_s21, %s176_s21 }
  0x4b   : > { %p5914_p10 = scmp.ne.s32.totalorder %s176_s21, %s5913_s29  ;;  %p5922_p3 = scmp.lt.s32.totalorder %s5913_s29, %s5913_s29 }
  0x4d   : > { %p5916_p13 = pnand %p5914_p10, %p5902_p5  ;;  %p5923_p9 = por %p5922_p3, %p5921_p4 }
  0x4f   : > { %p5917_p2 = pneg %p5916_p13 }
  0x51   : > { %p5924_p6 = pnand %p5923_p9, %p5917_p2 }
  0x53   : > { %5927 = shalt.err (!%p5924_p6)
}
  0x54   : > { %5762 = dma.hbm_to_vmem [thread:$0]  (!%p6254_p12), %s8082_s0, 25600, %s176_s21, [#allocation4]  }
  0x55   : > { %p8108_p0 = scmp.eq.s32.totalorder %s6056_s25, 0  ;;  %p8109_p5 = scmp.ne.s32.totalorder %s6024_s17, %s6020_s16 }
  0x56   : > { %s212_s11 = sand.u32 1, %s6024_s17   ;;  %s4033_s6 = sshll.u32 %s6052_s24, 5 }
  0x57   : > { %p95_p13 = por %p8109_p5, %p8108_p0  ;;  %s4016_s12 = sshll.u32 %s212_s11, 1 }
  0x58   : > { %s6290_s15 = scalar_lea.hbm %s8084_s2, %s4033_s6  ;;  %s214_s30 = scalar_lea.vmem [#allocation7], %s4016_s12 }
  0x59   : > { %s222_s29 = sshll.u32 %s214_s30, 4  ;;  %p8110_p2 = scmp.lt.s32.totalorder %s6056_s25, 8  ;;  %s223_s29 = int_to_ptr.vmem [resolvable:$true] %s222_s29 }
  0x5a   : > { %s5928_s9 = scalar_lea.hbm %s6290_s15, 32  ;;  %s5933_s12 = scalar_lea.hbm %s8084_s2, 64 }
  0x5b   : > { %p6294_p9 = pnand %p8110_p2, %p95_p13  ;;  %p5929_p3 = scmp.ne.s32.totalorder %s6290_s15, %s5928_s9 }
  0x5c   : > { %p5934_p11 = scmp.lt.u32.totalorder %s6290_s15, %s8084_s2  ;;  %p5935_p1 = scmp.lt.u32.totalorder %s5933_s12, %s5928_s9 }
  0x5d   : > { %p5930_p4 = pneg %p6294_p9  ;;  %p5937_p8 = scmp.lt.u32.totalorder %s5928_s9, %s6290_s15 }
  0x5e   : > { %p5936_p7 = por %p5935_p1, %p5934_p11 }
  0x5f   : > { %p5931_p6 = pnand %p5930_p4, %p5929_p3 }
  0x60   : > { %p5938_p10 = por %p5937_p8, %p5936_p7 }
  0x61   : > { %p5932_p12 = pneg %p5931_p6 }
  0x63   : > { %p5939_p0 = pnand %p5938_p10, %p5932_p12 }
  0x65   : > { %5942 = shalt.err (!%p5939_p0)
}
  0x66   : > { %s5943_s7 = scalar_lea.vmem %s223_s29, 32  ;;  %s6063_s30 = smov [#allocation7]  }
  0x67   : > { %p5944_p5 = scmp.ne.s32.totalorder %s223_s29, %s5943_s7  ;;  %s5948_s10 = sshll.u32 %s6063_s30, 4  ;;  %s5949_s10 = int_to_ptr.vmem [resolvable:$false] %s5948_s10 }
  0x68   : > { %s5950_s11 = scalar_lea.vmem %s5949_s10, 64  ;;  %p5951_p3 = scmp.lt.s32.totalorder %s223_s29, %s5949_s10 }
  0x69   : > { %p5946_p13 = pnand %p5944_p5, %p5930_p4  ;;  %p5952_p6 = scmp.lt.s32.totalorder %s5950_s11, %s5943_s7 }
  0x6b   : > { %p5947_p2 = pneg %p5946_p13  ;;  %p5953_p1 = por %p5952_p6, %p5951_p3 }
  0x6d   : > { %p5954_p11 = pnand %p5953_p1, %p5947_p2 }
  0x6f   : > { %5957 = shalt.err (!%p5954_p11)
}
  0x70   : > { %5769 = dma.hbm_to_vmem [thread:$0]  (!%p6294_p9), %s6290_s15, 32, %s223_s29, %s6192_s28  }
  0x71   : > { %p8112_p12 = scmp.ne.s32.totalorder %s8106_s13, 0 }
  0x72   : > { %p8113_p4 = scmp.ne.s32.totalorder (!%p8112_p12), %s8103_s8, 0 }
  0x73   : > { %240 = sbr.rel (%p8112_p12) target bundleno = 1447 (0x5a7), region = 36 }
  0x7a   : > { %6003 = dma.done.wait (%p8113_p4), [#allocation4], 25600  }
  0x7b   : > { %6005 = vsyncadd (%p8113_p4), [#allocation4], 4294941696  ;;  %s246_s9 = sand.u32 1, %s4008_s27   ;;  %s248_s12 = sand.u32 1, %s6032_s19  }
  0x7c   : > { %s5750_s6 = smul.u32 12800, %s248_s12  ;;  %s247_s21 = scalar_lea.sflag [#allocation6], %s246_s9 }
  0x7d   : > { %p8114_p9 = scmp.ne.s32.totalorder %s8104_s3, 0 }
  0x7e   : > { %s6329_s26 = scalar_lea.vmem [#allocation5], %s5750_s6 }
  0x7f   : > { %6007 = dma.done.wait (%p8114_p9), %s247_s21, 204800  }
  0x80   : > { %6009 = vsyncadd (%p8114_p9), %s247_s21, 4294762496  ;;  %s257_s28 = sand.u32 1, %s6020_s16   ;;  %p8115_p7 = scmp.ne.s32.totalorder %s8105_s18, 0 }
  0x81   : > { %s6336_s8 = sshll.u32 %s257_s28, 1 }
  0x82   : > { %s259_s13 = scalar_lea.vmem [#allocation7], %s6336_s8 }
  0x83   : > { %6011 = dma.done.wait (%p8115_p7), %s247_s21, 32  }
  0x84   : > { %6013 = vsyncadd (%p8115_p7), %s247_s21, 4294967264  ;;  %s4022_s27 = sshll.u32 %s6044_s22, 5  ;;  %p302_p8 = scmp.lt.s32.totalorder %s6044_s22, 1 }
  0x85   : > { %p297_p10 = scmp.lt.s32.totalorder %s4022_s27, 63  ;;  %s8116_s9 = sld [smem:[#allocation14_spill]] }
  0x86   : > { %s8138_s22 = smov (!%p302_p8, %s6044_s22), 1  ;;  %s8117_s12 = sld [smem:[#allocation11_spill]] }
  0x87   : > { %s8140_s27 = smov (!%p297_p10, %s4022_s27), 63  ;;  %s4024_s3 = sshll.u32 %s8138_s22, 3 }
  0x88   : > { %s4023_s15 = sshll.u32 %s8140_s27, 3  ;;  %s6349_s30 = scalar_lea.vmem %s8086_s4, %s4024_s3 }
  0x8b   : > { %s6354_s18 = scalar_lea.vmem %s8116_s9, %s4023_s15 }
  0x8c   : > { %p4025_p0 = scmp.ne.s32.totalorder %s8117_s12, 0 }
  0x8d   : > { %v6064_v0 = vmov (!%p4025_p0), 0.0  }
  0x8e   : > { %309 = sbr.rel (%p4025_p0) target bundleno = 149 (0x95), region = 52  ;;  %310 = vst [vmem:[#allocation2] sm:$0xff] (!%p4025_p0), %v6064_v0  ;;  %311 = vst [vmem:[#allocation2 + $0x8] sm:$0xff] (!%p4025_p0), %v6064_v0 }
  0x95 PF: > { %v368_v1 = vld [vmem:[%s6329_s26 + $0x8] sm:$0xff]  ;;  %v370_v2 = vld [vmem:[%s6329_s26 + $0x18] sm:$0xff]  ;;  %v367_v6 = vld [vmem:[%s6329_s26] sm:$0xff]  ;;  %s8118_s22 = sld [smem:[#allocation11_spill]] }
  0x96   : > { %v1136_v3 = vld [vmem:[%s6329_s26 + $0x1808] sm:$0xff]  ;;  %v4069_v4 = vpack.c.bf16 %v370_v2, %v368_v1  ;;  %v1138_v5 = vld [vmem:[%s6329_s26 + $0x1818] sm:$0xff]  ;;  %v369_v7 = vld [vmem:[%s6329_s26 + $0x10] sm:$0xff] }
  0x97   : > { %v4837_v8 = vpack.c.bf16 %v1138_v5, %v1136_v3  ;;  %v4071_v9 = vpack.c.bf16 %v369_v7, %v367_v6  ;;  %v1135_v10 = vld [vmem:[%s6329_s26 + $0x1800] sm:$0xff]  ;;  %v1137_v11 = vld [vmem:[%s6329_s26 + $0x1810] sm:$0xff]  ;;  %v372_v12 = vld [vmem:[%s6329_s26 + $0x28] sm:$0xff] }
  0x98   : > { %4070 = vmatprep.subr.bf16.mxu1 %v4069_v4  ;;  %v4839_v13 = vpack.c.bf16 %v1137_v11, %v1135_v10  ;;  %v374_v14 = vld [vmem:[%s6329_s26 + $0x38] sm:$0xff]  ;;  %v1140_v15 = vld [vmem:[%s6329_s26 + $0x1828] sm:$0xff]  ;;  %v371_v19 = vld [vmem:[%s6329_s26 + $0x20] sm:$0xff] }
  0x99   : > { %v1142_v16 = vld [vmem:[%s6329_s26 + $0x1838] sm:$0xff]  ;;  %4838 = vmatprep.subr.bf16.mxu0 %v4837_v8  ;;  %4072 = vmatpush1.bf16.msra.mxu1 %v4071_v9  ;;  %v4073_v17 = vpack.c.bf16 %v374_v14, %v372_v12  ;;  %v373_v20 = vld [vmem:[%s6329_s26 + $0x30] sm:$0xff]  ;;  %v1139_v21 = vld [vmem:[%s6329_s26 + $0x1820] sm:$0xff] }
  0x9a   : > { %v4841_v18 = vpack.c.bf16 %v1142_v16, %v1140_v15  ;;  %4840 = vmatpush1.bf16.msra.mxu0 %v4839_v13  ;;  %v4075_v22 = vpack.c.bf16 %v373_v20, %v371_v19  ;;  %v1141_v23 = vld [vmem:[%s6329_s26 + $0x1830] sm:$0xff]  ;;  %v376_v24 = vld [vmem:[%s6329_s26 + $0x48] sm:$0xff]  ;;  %v378_v25 = vld [vmem:[%s6329_s26 + $0x58] sm:$0xff] }
  0x9b   : > { %4074 = vmatprep.subr.bf16.mxu1 %v4073_v17  ;;  %v4843_v26 = vpack.c.bf16 %v1141_v23, %v1139_v21  ;;  %v4077_v27 = vpack.c.bf16 %v378_v25, %v376_v24  ;;  %v1144_v28 = vld [vmem:[%s6329_s26 + $0x1848] sm:$0xff]  ;;  %v1146_v29 = vld [vmem:[%s6329_s26 + $0x1858] sm:$0xff]  ;;  %v375_v30 = vld [vmem:[%s6329_s26 + $0x40] sm:$0xff]  ;;  %s312_s6 = smul.u32 6400, %s8118_s22  ;;  %p4027_p5 = scmp.ne.s32.totalorder %s8118_s22, 3 }
  0x9c   : > { %4842 = vmatprep.subr.bf16.mxu0 %v4841_v18  ;;  %v4845_v31 = vpack.c.bf16 %v1146_v29, %v1144_v28  ;;  %v377_v32 = vld [vmem:[%s6329_s26 + $0x50] sm:$0xff]  ;;  %v1143_v33 = vld [vmem:[%s6329_s26 + $0x1840] sm:$0xff]  ;;  %v380_v36 = vld [vmem:[%s6329_s26 + $0x68] sm:$0xff] }
  0x9d   : > { %v1145_v34 = vld [vmem:[%s6329_s26 + $0x1850] sm:$0xff]  ;;  %4076 = vmatpush1.bf16.msra.mxu1 %v4075_v22  ;;  %v4079_v35 = vpack.c.bf16 %v377_v32, %v375_v30  ;;  %v382_v37 = vld [vmem:[%s6329_s26 + $0x78] sm:$0xff]  ;;  %v1148_v38 = vld [vmem:[%s6329_s26 + $0x1868] sm:$0xff]  ;;  %s6437_s21 = sshra.s32 %s312_s6, 7 }
  0x9e   : > { %4844 = vmatpush1.bf16.msra.mxu0 %v4843_v26  ;;  %4078 = vmatprep.subr.bf16.mxu1 %v4077_v27  ;;  %v4847_v39 = vpack.c.bf16 %v1145_v34, %v1143_v33  ;;  %v4081_v40 = vpack.c.bf16 %v382_v37, %v380_v36  ;;  %v1150_v41 = vld [vmem:[%s6329_s26 + $0x1878] sm:$0xff]  ;;  %v379_v42 = vld [vmem:[%s6329_s26 + $0x60] sm:$0xff]  ;;  %v381_v43 = vld [vmem:[%s6329_s26 + $0x70] sm:$0xff]  ;;  %s4026_s28 = sshll.u32 %s6437_s21, 3 }
  0x9f   : > { %4846 = vmatprep.subr.bf16.mxu0 %v4845_v31  ;;  %v4849_v44 = vpack.c.bf16 %v1150_v41, %v1148_v38  ;;  %v1147_v45 = vld [vmem:[%s6329_s26 + $0x1860] sm:$0xff]  ;;  %v1149_v46 = vld [vmem:[%s6329_s26 + $0x1870] sm:$0xff]  ;;  %v384_v47 = vld [vmem:[%s6329_s26 + $0x88] sm:$0xff]  ;;  %v4083_v51 = vpack.c.bf16 %v381_v43, %v379_v42  ;;  %s6459_s27 = scalar_lea.vmem [#allocation3], %s4026_s28 }
  0xa0   : > { %v386_v48 = vld [vmem:[%s6329_s26 + $0x98] sm:$0xff]  ;;  %v1152_v49 = vld [vmem:[%s6329_s26 + $0x1888] sm:$0xff]  ;;  %v4851_v52 = vpack.c.bf16 %v1149_v46, %v1147_v45  ;;  %v383_v54 = vld [vmem:[%s6329_s26 + $0x80] sm:$0xff] }
  0xa1   : > { %v1154_v50 = vld [vmem:[%s6329_s26 + $0x1898] sm:$0xff]  ;;  %4080 = vmatpush1.bf16.msra.mxu1 %v4079_v35  ;;  %v4085_v53 = vpack.c.bf16 %v386_v48, %v384_v47  ;;  %v385_v55 = vld [vmem:[%s6329_s26 + $0x90] sm:$0xff]  ;;  %v1151_v56 = vld [vmem:[%s6329_s26 + $0x1880] sm:$0xff] }
  0xa2   : > { %4848 = vmatpush1.bf16.msra.mxu0 %v4847_v39  ;;  %4082 = vmatprep.subr.bf16.mxu1 %v4081_v40  ;;  %v4853_v57 = vpack.c.bf16 %v1154_v50, %v1152_v49  ;;  %v1153_v58 = vld [vmem:[%s6329_s26 + $0x1890] sm:$0xff]  ;;  %v388_v59 = vld [vmem:[%s6329_s26 + $0xa8] sm:$0xff]  ;;  %v390_v60 = vld [vmem:[%s6329_s26 + $0xb8] sm:$0xff]  ;;  %v4087_v63 = vpack.c.bf16 %v385_v55, %v383_v54 }
  0xa3   : > { %4850 = vmatprep.subr.bf16.mxu0 %v4849_v44  ;;  %v1156_v61 = vld [vmem:[%s6329_s26 + $0x18a8] sm:$0xff]  ;;  %v1158_v62 = vld [vmem:[%s6329_s26 + $0x18b8] sm:$0xff]  ;;  %v4855_v0 = vpack.c.bf16 %v1153_v58, %v1151_v56  ;;  %v4089_v1 = vpack.c.bf16 %v390_v60, %v388_v59  ;;  %v387_v2 = vld [vmem:[%s6329_s26 + $0xa0] sm:$0xff] }
  0xa4   : > { %v389_v3 = vld [vmem:[%s6329_s26 + $0xb0] sm:$0xff]  ;;  %v1155_v4 = vld [vmem:[%s6329_s26 + $0x18a0] sm:$0xff]  ;;  %v4857_v5 = vpack.c.bf16 %v1158_v62, %v1156_v61  ;;  %v392_v7 = vld [vmem:[%s6329_s26 + $0xc8] sm:$0xff] }
  0xa5   : > { %4084 = vmatpush1.bf16.msra.mxu1 %v4083_v51  ;;  %v1157_v6 = vld [vmem:[%s6329_s26 + $0x18b0] sm:$0xff]  ;;  %v394_v8 = vld [vmem:[%s6329_s26 + $0xd8] sm:$0xff]  ;;  %v1160_v9 = vld [vmem:[%s6329_s26 + $0x18c8] sm:$0xff]  ;;  %v4091_v11 = vpack.c.bf16 %v389_v3, %v387_v2 }
  0xa6   : > { %4852 = vmatpush1.bf16.msra.mxu0 %v4851_v52  ;;  %4086 = vmatprep.subr.bf16.mxu1 %v4085_v53  ;;  %v1162_v10 = vld [vmem:[%s6329_s26 + $0x18d8] sm:$0xff]  ;;  %v4859_v12 = vpack.c.bf16 %v1157_v6, %v1155_v4  ;;  %v4093_v13 = vpack.c.bf16 %v394_v8, %v392_v7  ;;  %v391_v14 = vld [vmem:[%s6329_s26 + $0xc0] sm:$0xff]  ;;  %v393_v15 = vld [vmem:[%s6329_s26 + $0xd0] sm:$0xff] }
  0xa7   : > { %4854 = vmatprep.subr.bf16.mxu0 %v4853_v57  ;;  %v1159_v16 = vld [vmem:[%s6329_s26 + $0x18c0] sm:$0xff]  ;;  %v4861_v17 = vpack.c.bf16 %v1162_v10, %v1160_v9  ;;  %v1161_v18 = vld [vmem:[%s6329_s26 + $0x18d0] sm:$0xff]  ;;  %v396_v19 = vld [vmem:[%s6329_s26 + $0xe8] sm:$0xff]  ;;  %v4095_v23 = vpack.c.bf16 %v393_v15, %v391_v14 }
  0xa8   : > { %v398_v20 = vld [vmem:[%s6329_s26 + $0xf8] sm:$0xff]  ;;  %v1164_v21 = vld [vmem:[%s6329_s26 + $0x18e8] sm:$0xff]  ;;  %v4863_v24 = vpack.c.bf16 %v1161_v18, %v1159_v16  ;;  %v395_v26 = vld [vmem:[%s6329_s26 + $0xe0] sm:$0xff] }
  0xa9   : > { %4088 = vmatpush1.bf16.msra.mxu1 %v4087_v63  ;;  %v1166_v22 = vld [vmem:[%s6329_s26 + $0x18f8] sm:$0xff]  ;;  %v4097_v25 = vpack.c.bf16 %v398_v20, %v396_v19  ;;  %v397_v27 = vld [vmem:[%s6329_s26 + $0xf0] sm:$0xff]  ;;  %v1163_v28 = vld [vmem:[%s6329_s26 + $0x18e0] sm:$0xff] }
  0xaa   : > { %4856 = vmatpush1.bf16.msra.mxu0 %v4855_v0  ;;  %4090 = vmatprep.subr.bf16.mxu1 %v4089_v1  ;;  %v4865_v29 = vpack.c.bf16 %v1166_v22, %v1164_v21  ;;  %v1165_v30 = vld [vmem:[%s6329_s26 + $0x18f0] sm:$0xff]  ;;  %v400_v31 = vld [vmem:[%s6329_s26 + $0x108] sm:$0xff]  ;;  %v402_v32 = vld [vmem:[%s6329_s26 + $0x118] sm:$0xff]  ;;  %v4099_v35 = vpack.c.bf16 %v397_v27, %v395_v26 }
  0xab   : > { %4858 = vmatprep.subr.bf16.mxu0 %v4857_v5  ;;  %v1168_v33 = vld [vmem:[%s6329_s26 + $0x1908] sm:$0xff]  ;;  %v1170_v34 = vld [vmem:[%s6329_s26 + $0x1918] sm:$0xff]  ;;  %v4867_v36 = vpack.c.bf16 %v1165_v30, %v1163_v28  ;;  %v4101_v37 = vpack.c.bf16 %v402_v32, %v400_v31  ;;  %v399_v38 = vld [vmem:[%s6329_s26 + $0x100] sm:$0xff] }
  0xac   : > { %v401_v39 = vld [vmem:[%s6329_s26 + $0x110] sm:$0xff]  ;;  %v1167_v40 = vld [vmem:[%s6329_s26 + $0x1900] sm:$0xff]  ;;  %v4869_v41 = vpack.c.bf16 %v1170_v34, %v1168_v33  ;;  %v404_v43 = vld [vmem:[%s6329_s26 + $0x128] sm:$0xff] }
  0xad   : > { %4092 = vmatpush1.bf16.msra.mxu1 %v4091_v11  ;;  %v1169_v42 = vld [vmem:[%s6329_s26 + $0x1910] sm:$0xff]  ;;  %v406_v44 = vld [vmem:[%s6329_s26 + $0x138] sm:$0xff]  ;;  %v1172_v45 = vld [vmem:[%s6329_s26 + $0x1928] sm:$0xff]  ;;  %v4103_v47 = vpack.c.bf16 %v401_v39, %v399_v38 }
  0xae   : > { %4860 = vmatpush1.bf16.msra.mxu0 %v4859_v12  ;;  %4094 = vmatprep.subr.bf16.mxu1 %v4093_v13  ;;  %v1174_v46 = vld [vmem:[%s6329_s26 + $0x1938] sm:$0xff]  ;;  %v4871_v48 = vpack.c.bf16 %v1169_v42, %v1167_v40  ;;  %v4105_v49 = vpack.c.bf16 %v406_v44, %v404_v43  ;;  %v403_v50 = vld [vmem:[%s6329_s26 + $0x120] sm:$0xff]  ;;  %v405_v51 = vld [vmem:[%s6329_s26 + $0x130] sm:$0xff] }
  0xaf   : > { %4862 = vmatprep.subr.bf16.mxu0 %v4861_v17  ;;  %v1171_v52 = vld [vmem:[%s6329_s26 + $0x1920] sm:$0xff]  ;;  %v4873_v53 = vpack.c.bf16 %v1174_v46, %v1172_v45  ;;  %v1173_v54 = vld [vmem:[%s6329_s26 + $0x1930] sm:$0xff]  ;;  %v408_v55 = vld [vmem:[%s6329_s26 + $0x148] sm:$0xff]  ;;  %v4107_v59 = vpack.c.bf16 %v405_v51, %v403_v50 }
  0xb0   : > { %v410_v56 = vld [vmem:[%s6329_s26 + $0x158] sm:$0xff]  ;;  %v1176_v57 = vld [vmem:[%s6329_s26 + $0x1948] sm:$0xff]  ;;  %v4875_v60 = vpack.c.bf16 %v1173_v54, %v1171_v52  ;;  %v407_v62 = vld [vmem:[%s6329_s26 + $0x140] sm:$0xff] }
  0xb1   : > { %4096 = vmatpush1.bf16.msra.mxu1 %v4095_v23  ;;  %v1178_v58 = vld [vmem:[%s6329_s26 + $0x1958] sm:$0xff]  ;;  %v4109_v61 = vpack.c.bf16 %v410_v56, %v408_v55  ;;  %v409_v63 = vld [vmem:[%s6329_s26 + $0x150] sm:$0xff]  ;;  %v1175_v0 = vld [vmem:[%s6329_s26 + $0x1940] sm:$0xff] }
  0xb2   : > { %4864 = vmatpush1.bf16.msra.mxu0 %v4863_v24  ;;  %4098 = vmatprep.subr.bf16.mxu1 %v4097_v25  ;;  %v4877_v1 = vpack.c.bf16 %v1178_v58, %v1176_v57  ;;  %v1177_v2 = vld [vmem:[%s6329_s26 + $0x1950] sm:$0xff]  ;;  %v412_v3 = vld [vmem:[%s6329_s26 + $0x168] sm:$0xff]  ;;  %v414_v4 = vld [vmem:[%s6329_s26 + $0x178] sm:$0xff]  ;;  %v4111_v7 = vpack.c.bf16 %v409_v63, %v407_v62 }
  0xb3   : > { %4866 = vmatprep.subr.bf16.mxu0 %v4865_v29  ;;  %v1180_v5 = vld [vmem:[%s6329_s26 + $0x1968] sm:$0xff]  ;;  %v1182_v6 = vld [vmem:[%s6329_s26 + $0x1978] sm:$0xff]  ;;  %v411_v8 = vld [vmem:[%s6329_s26 + $0x160] sm:$0xff]  ;;  %v4879_v9 = vpack.c.bf16 %v1177_v2, %v1175_v0  ;;  %v4113_v10 = vpack.c.bf16 %v414_v4, %v412_v3 }
  0xb4   : > { %v413_v11 = vld [vmem:[%s6329_s26 + $0x170] sm:$0xff]  ;;  %v1179_v12 = vld [vmem:[%s6329_s26 + $0x1960] sm:$0xff]  ;;  %v4881_v14 = vpack.c.bf16 %v1182_v6, %v1180_v5  ;;  %v416_v15 = vld [vmem:[%s6329_s26 + $0x188] sm:$0xff] }
  0xb5   : > { %4100 = vmatpush1.bf16.msra.mxu1 %v4099_v35  ;;  %v1181_v13 = vld [vmem:[%s6329_s26 + $0x1970] sm:$0xff]  ;;  %v418_v16 = vld [vmem:[%s6329_s26 + $0x198] sm:$0xff]  ;;  %v1184_v18 = vld [vmem:[%s6329_s26 + $0x1988] sm:$0xff]  ;;  %v4115_v21 = vpack.c.bf16 %v413_v11, %v411_v8 }
  0xb6   : > { %4868 = vmatpush1.bf16.msra.mxu0 %v4867_v36  ;;  %4102 = vmatprep.subr.bf16.mxu1 %v4101_v37  ;;  %v318_v17 = vld [vmem:[%s6459_s27 + $0x8] sm:$0xff]  ;;  %v4883_v22 = vpack.c.bf16 %v1181_v13, %v1179_v12  ;;  %v4117_v23 = vpack.c.bf16 %v418_v16, %v416_v15  ;;  %v415_v24 = vld [vmem:[%s6329_s26 + $0x180] sm:$0xff]  ;;  %v417_v25 = vld [vmem:[%s6329_s26 + $0x190] sm:$0xff] }
  0xb7   : > { %4870 = vmatprep.subr.bf16.mxu0 %v4869_v41  ;;  %v1186_v19 = vld [vmem:[%s6329_s26 + $0x1998] sm:$0xff]  ;;  %2033 = vmatprep.mubr.f32.mxu1 %v318_v17  ;;  %v1183_v26 = vld [vmem:[%s6329_s26 + $0x1980] sm:$0xff]  ;;  %v1185_v28 = vld [vmem:[%s6329_s26 + $0x1990] sm:$0xff]  ;;  %v4119_v33 = vpack.c.bf16 %v417_v25, %v415_v24 }
  0xb8   : > { %v342_v20 = vld [vmem:[%s6459_s27 + $0xc8] sm:$0xff]  ;;  %v4885_v27 = vpack.c.bf16 %v1186_v19, %v1184_v18  ;;  %v420_v29 = vld [vmem:[%s6329_s26 + $0x1a8] sm:$0xff]  ;;  %v4887_v34 = vpack.c.bf16 %v1185_v28, %v1183_v26  ;;  %v419_v36 = vld [vmem:[%s6329_s26 + $0x1a0] sm:$0xff] }
  0xb9   : > { %4104 = vmatpush1.bf16.msra.mxu1 %v4103_v47  ;;  %2885 = vmatprep.mubr.f32.mxu0 %v342_v20  ;;  %v422_v30 = vld [vmem:[%s6329_s26 + $0x1b8] sm:$0xff]  ;;  %v1188_v31 = vld [vmem:[%s6329_s26 + $0x19a8] sm:$0xff]  ;;  %v421_v37 = vld [vmem:[%s6329_s26 + $0x1b0] sm:$0xff] }
  0xba   : > { %4872 = vmatpush1.bf16.msra.mxu0 %v4871_v48  ;;  %4106 = vmatprep.subr.bf16.mxu1 %v4105_v49  ;;  %v1190_v32 = vld [vmem:[%s6329_s26 + $0x19b8] sm:$0xff]  ;;  %v4121_v35 = vpack.c.bf16 %v422_v30, %v420_v29  ;;  %v1187_v38 = vld [vmem:[%s6329_s26 + $0x19a0] sm:$0xff]  ;;  %v1189_v40 = vld [vmem:[%s6329_s26 + $0x19b0] sm:$0xff]  ;;  %v4123_v45 = vpack.c.bf16 %v421_v37, %v419_v36 }
  0xbb   : > { %4874 = vmatprep.subr.bf16.mxu0 %v4873_v53  ;;  %v4889_v39 = vpack.c.bf16 %v1190_v32, %v1188_v31  ;;  %v424_v41 = vld [vmem:[%s6329_s26 + $0x1c8] sm:$0xff]  ;;  %v426_v42 = vld [vmem:[%s6329_s26 + $0x1d8] sm:$0xff]  ;;  %v4891_v46 = vpack.c.bf16 %v1189_v40, %v1187_v38  ;;  %v423_v48 = vld [vmem:[%s6329_s26 + $0x1c0] sm:$0xff] }
  0xbc   : > { %v1192_v43 = vld [vmem:[%s6329_s26 + $0x19c8] sm:$0xff]  ;;  %v1194_v44 = vld [vmem:[%s6329_s26 + $0x19d8] sm:$0xff]  ;;  %v4125_v47 = vpack.c.bf16 %v426_v42, %v424_v41  ;;  %v425_v49 = vld [vmem:[%s6329_s26 + $0x1d0] sm:$0xff] }
  0xbd   : > { %4108 = vmatpush1.bf16.msra.mxu1 %v4107_v59  ;;  %v1191_v50 = vld [vmem:[%s6329_s26 + $0x19c0] sm:$0xff]  ;;  %v4893_v51 = vpack.c.bf16 %v1194_v44, %v1192_v43  ;;  %v1193_v52 = vld [vmem:[%s6329_s26 + $0x19d0] sm:$0xff]  ;;  %v428_v53 = vld [vmem:[%s6329_s26 + $0x1e8] sm:$0xff]  ;;  %v4127_v57 = vpack.c.bf16 %v425_v49, %v423_v48 }
  0xbe   : > { %4876 = vmatpush1.bf16.msra.mxu0 %v4875_v60  ;;  %4110 = vmatprep.subr.bf16.mxu1 %v4109_v61  ;;  %v430_v54 = vld [vmem:[%s6329_s26 + $0x1f8] sm:$0xff]  ;;  %v1196_v55 = vld [vmem:[%s6329_s26 + $0x19e8] sm:$0xff]  ;;  %v4895_v58 = vpack.c.bf16 %v1193_v52, %v1191_v50  ;;  %v427_v60 = vld [vmem:[%s6329_s26 + $0x1e0] sm:$0xff] }
  0xbf   : > { %4878 = vmatprep.subr.bf16.mxu0 %v4877_v1  ;;  %v1198_v56 = vld [vmem:[%s6329_s26 + $0x19f8] sm:$0xff]  ;;  %v4129_v59 = vpack.c.bf16 %v430_v54, %v428_v53  ;;  %v429_v61 = vld [vmem:[%s6329_s26 + $0x1f0] sm:$0xff]  ;;  %v1195_v62 = vld [vmem:[%s6329_s26 + $0x19e0] sm:$0xff] }
  0xc0   : > { %v4897_v63 = vpack.c.bf16 %v1198_v56, %v1196_v55  ;;  %v1197_v0 = vld [vmem:[%s6329_s26 + $0x19f0] sm:$0xff]  ;;  %v432_v1 = vld [vmem:[%s6329_s26 + $0x208] sm:$0xff]  ;;  %v434_v2 = vld [vmem:[%s6329_s26 + $0x218] sm:$0xff]  ;;  %v4131_v5 = vpack.c.bf16 %v429_v61, %v427_v60 }
  0xc1   : > { %4112 = vmatpush1.bf16.msra.mxu1 %v4111_v7  ;;  %v1200_v3 = vld [vmem:[%s6329_s26 + $0x1a08] sm:$0xff]  ;;  %v1202_v4 = vld [vmem:[%s6329_s26 + $0x1a18] sm:$0xff]  ;;  %v4899_v6 = vpack.c.bf16 %v1197_v0, %v1195_v62  ;;  %v4133_v7 = vpack.c.bf16 %v434_v2, %v432_v1  ;;  %v431_v8 = vld [vmem:[%s6329_s26 + $0x200] sm:$0xff] }
  0xc2   : > { %4880 = vmatpush1.bf16.msra.mxu0 %v4879_v9  ;;  %4114 = vmatprep.subr.bf16.mxu1 %v4113_v10  ;;  %v433_v9 = vld [vmem:[%s6329_s26 + $0x210] sm:$0xff]  ;;  %v1199_v10 = vld [vmem:[%s6329_s26 + $0x1a00] sm:$0xff]  ;;  %v4901_v11 = vpack.c.bf16 %v1202_v4, %v1200_v3  ;;  %v436_v13 = vld [vmem:[%s6329_s26 + $0x228] sm:$0xff] }
  0xc3   : > { %4882 = vmatprep.subr.bf16.mxu0 %v4881_v14  ;;  %v1201_v12 = vld [vmem:[%s6329_s26 + $0x1a10] sm:$0xff]  ;;  %v438_v14 = vld [vmem:[%s6329_s26 + $0x238] sm:$0xff]  ;;  %v1204_v15 = vld [vmem:[%s6329_s26 + $0x1a28] sm:$0xff]  ;;  %v4135_v18 = vpack.c.bf16 %v433_v9, %v431_v8 }
  0xc4   : > { %v1206_v16 = vld [vmem:[%s6329_s26 + $0x1a38] sm:$0xff]  ;;  %v317_v17 = vld [vmem:[%s6459_s27] sm:$0xff]  ;;  %v4903_v20 = vpack.c.bf16 %v1201_v12, %v1199_v10  ;;  %v1203_v24 = vld [vmem:[%s6329_s26 + $0x1a20] sm:$0xff] }
  0xc5   : > { %4116 = vmatpush1.bf16.msra.mxu1 %v4115_v21  ;;  %v341_v19 = vld [vmem:[%s6459_s27 + $0xc0] sm:$0xff]  ;;  %v4137_v21 = vpack.c.bf16 %v438_v14, %v436_v13  ;;  %v4905_v25 = vpack.c.bf16 %v1206_v16, %v1204_v15  ;;  %v442_v28 = vld [vmem:[%s6329_s26 + $0x258] sm:$0xff]  ;;  %v1208_v29 = vld [vmem:[%s6329_s26 + $0x1a48] sm:$0xff] }
  0xc6   : > { %4884 = vmatpush1.bf16.msra.mxu0 %v4883_v22  ;;  %4118 = vmatprep.subr.bf16.mxu1 %v4117_v23  ;;  %v435_v22 = vld [vmem:[%s6329_s26 + $0x220] sm:$0xff]  ;;  %v437_v23 = vld [vmem:[%s6329_s26 + $0x230] sm:$0xff]  ;;  %v1210_v30 = vld [vmem:[%s6329_s26 + $0x1a58] sm:$0xff] }
  0xc7   : > { %4886 = vmatprep.subr.bf16.mxu0 %v4885_v27  ;;  %v1205_v26 = vld [vmem:[%s6329_s26 + $0x1a30] sm:$0xff]  ;;  %v440_v27 = vld [vmem:[%s6329_s26 + $0x248] sm:$0xff]  ;;  %v4139_v31 = vpack.c.bf16 %v437_v23, %v435_v22  ;;  %v1207_v36 = vld [vmem:[%s6329_s26 + $0x1a40] sm:$0xff]  ;;  %v4909_v37 = vpack.c.bf16 %v1210_v30, %v1208_v29 }
  0xc8   : > { %v4907_v32 = vpack.c.bf16 %v1205_v26, %v1203_v24  ;;  %v1209_v38 = vld [vmem:[%s6329_s26 + $0x1a50] sm:$0xff]  ;;  %v446_v40 = vld [vmem:[%s6329_s26 + $0x278] sm:$0xff]  ;;  %v1212_v41 = vld [vmem:[%s6329_s26 + $0x1a68] sm:$0xff] }
  0xc9   : > { %4120 = vmatpush1.bf16.msra.mxu1 %v4119_v33  ;;  %v4141_v33 = vpack.c.bf16 %v442_v28, %v440_v27  ;;  %v1214_v42 = vld [vmem:[%s6329_s26 + $0x1a78] sm:$0xff]  ;;  %v4911_v44 = vpack.c.bf16 %v1209_v38, %v1207_v36  ;;  %v1211_v48 = vld [vmem:[%s6329_s26 + $0x1a60] sm:$0xff]  ;;  %v1213_v50 = vld [vmem:[%s6329_s26 + $0x1a70] sm:$0xff] }
  0xca   : > { %4888 = vmatpush1.bf16.msra.mxu0 %v4887_v34  ;;  %4122 = vmatprep.subr.bf16.mxu1 %v4121_v35  ;;  %v439_v34 = vld [vmem:[%s6329_s26 + $0x240] sm:$0xff]  ;;  %v441_v35 = vld [vmem:[%s6329_s26 + $0x250] sm:$0xff]  ;;  %v4913_v49 = vpack.c.bf16 %v1214_v42, %v1212_v41  ;;  %v450_v52 = vld [vmem:[%s6329_s26 + $0x298] sm:$0xff]  ;;  %v4915_v56 = vpack.c.bf16 %v1213_v50, %v1211_v48 }
  0xcb   : > { %4890 = vmatprep.subr.bf16.mxu0 %v4889_v39  ;;  %v444_v39 = vld [vmem:[%s6329_s26 + $0x268] sm:$0xff]  ;;  %v4143_v43 = vpack.c.bf16 %v441_v35, %v439_v34  ;;  %v1218_v54 = vld [vmem:[%s6329_s26 + $0x1a98] sm:$0xff]  ;;  %v1215_v60 = vld [vmem:[%s6329_s26 + $0x1a80] sm:$0xff] }
  0xcc   : > { %v1216_v53 = vld [vmem:[%s6329_s26 + $0x1a88] sm:$0xff]  ;;  %v1217_v62 = vld [vmem:[%s6329_s26 + $0x1a90] sm:$0xff]  ;;  %v454_v0 = vld [vmem:[%s6329_s26 + $0x2b8] sm:$0xff] }
  0xcd   : > { %4124 = vmatpush1.bf16.msra.mxu1 %v4123_v45  ;;  %v4145_v45 = vpack.c.bf16 %v446_v40, %v444_v39  ;;  %v4917_v61 = vpack.c.bf16 %v1218_v54, %v1216_v53  ;;  %v1220_v1 = vld [vmem:[%s6329_s26 + $0x1aa8] sm:$0xff]  ;;  %v1222_v2 = vld [vmem:[%s6329_s26 + $0x1ab8] sm:$0xff]  ;;  %v4919_v4 = vpack.c.bf16 %v1217_v62, %v1215_v60  ;;  %v1219_v8 = vld [vmem:[%s6329_s26 + $0x1aa0] sm:$0xff] }
  0xce   : > { %4892 = vmatpush1.bf16.msra.mxu0 %v4891_v46  ;;  %4126 = vmatprep.subr.bf16.mxu1 %v4125_v47  ;;  %v443_v46 = vld [vmem:[%s6329_s26 + $0x260] sm:$0xff]  ;;  %v445_v47 = vld [vmem:[%s6329_s26 + $0x270] sm:$0xff]  ;;  %v4921_v9 = vpack.c.bf16 %v1222_v2, %v1220_v1  ;;  %v458_v12 = vld [vmem:[%s6329_s26 + $0x2d8] sm:$0xff] }
  0xcf   : > { %4894 = vmatprep.subr.bf16.mxu0 %v4893_v51  ;;  %v448_v51 = vld [vmem:[%s6329_s26 + $0x288] sm:$0xff]  ;;  %v4147_v55 = vpack.c.bf16 %v445_v47, %v443_v46  ;;  %v1221_v10 = vld [vmem:[%s6329_s26 + $0x1ab0] sm:$0xff]  ;;  %v1226_v14 = vld [vmem:[%s6329_s26 + $0x1ad8] sm:$0xff] }
  0xd0   : > { %v1224_v13 = vld [vmem:[%s6329_s26 + $0x1ac8] sm:$0xff]  ;;  %v455_v16 = vld [vmem:[%s6329_s26 + $0x2c0] sm:$0xff]  ;;  %v462_v24 = vld [vmem:[%s6329_s26 + $0x2f8] sm:$0xff] }
  0xd1   : > { %4128 = vmatpush1.bf16.msra.mxu1 %v4127_v57  ;;  %v4149_v57 = vpack.c.bf16 %v450_v52, %v448_v51  ;;  %v4925_v22 = vpack.c.bf16 %v1226_v14, %v1224_v13  ;;  %v460_v23 = vld [vmem:[%s6329_s26 + $0x2e8] sm:$0xff]  ;;  %v1230_v27 = vld [vmem:[%s6329_s26 + $0x1af8] sm:$0xff]  ;;  %v1227_v34 = vld [vmem:[%s6329_s26 + $0x1ae0] sm:$0xff] }
  0xd2   : > { %4896 = vmatpush1.bf16.msra.mxu0 %v4895_v58  ;;  %4130 = vmatprep.subr.bf16.mxu1 %v4129_v59  ;;  %v447_v58 = vld [vmem:[%s6329_s26 + $0x280] sm:$0xff]  ;;  %v449_v59 = vld [vmem:[%s6329_s26 + $0x290] sm:$0xff]  ;;  %v1228_v26 = vld [vmem:[%s6329_s26 + $0x1ae8] sm:$0xff] }
  0xd3   : > { %4898 = vmatprep.subr.bf16.mxu0 %v4897_v63  ;;  %v452_v63 = vld [vmem:[%s6329_s26 + $0x2a8] sm:$0xff]  ;;  %v4151_v3 = vpack.c.bf16 %v449_v59, %v447_v58  ;;  %v4929_v35 = vpack.c.bf16 %v1230_v27, %v1228_v26  ;;  %v1229_v36 = vld [vmem:[%s6329_s26 + $0x1af0] sm:$0xff]  ;;  %v466_v38 = vld [vmem:[%s6329_s26 + $0x318] sm:$0xff] }
  0xd4   : > { %v344_v28 = vld [vmem:[%s6459_s27 + $0xd8] sm:$0xff]  ;;  %v1234_v40 = vld [vmem:[%s6329_s26 + $0x1b18] sm:$0xff]  ;;  %v4931_v42 = vpack.c.bf16 %v1229_v36, %v1227_v34  ;;  %v1231_v46 = vld [vmem:[%s6329_s26 + $0x1b00] sm:$0xff] }
  0xd5   : > { %4132 = vmatpush1.bf16.msra.mxu1 %v4131_v5  ;;  %v4153_v5 = vpack.c.bf16 %v454_v0, %v452_v63  ;;  %v1232_v39 = vld [vmem:[%s6329_s26 + $0x1b08] sm:$0xff]  ;;  %v1233_v48 = vld [vmem:[%s6329_s26 + $0x1b10] sm:$0xff]  ;;  %v470_v50 = vld [vmem:[%s6329_s26 + $0x338] sm:$0xff] }
  0xd6   : > { %4900 = vmatpush1.bf16.msra.mxu0 %v4899_v6  ;;  %4134 = vmatprep.subr.bf16.mxu1 %v4133_v7  ;;  %v451_v6 = vld [vmem:[%s6329_s26 + $0x2a0] sm:$0xff]  ;;  %v453_v7 = vld [vmem:[%s6329_s26 + $0x2b0] sm:$0xff]  ;;  %v4933_v47 = vpack.c.bf16 %v1234_v40, %v1232_v39  ;;  %v1236_v51 = vld [vmem:[%s6329_s26 + $0x1b28] sm:$0xff]  ;;  %v4935_v54 = vpack.c.bf16 %v1233_v48, %v1231_v46 }
  0xd7   : > { %4902 = vmatprep.subr.bf16.mxu0 %v4901_v11  ;;  %v456_v11 = vld [vmem:[%s6329_s26 + $0x2c8] sm:$0xff]  ;;  %v4155_v15 = vpack.c.bf16 %v453_v7, %v451_v6  ;;  %v1238_v52 = vld [vmem:[%s6329_s26 + $0x1b38] sm:$0xff]  ;;  %v1235_v58 = vld [vmem:[%s6329_s26 + $0x1b20] sm:$0xff] }
  0xd8   : > { %2034 = vmatmul.mubr.f32.vlgmr.msra.gmra.mrb[0].mxu1 %v317_v17  ;;  %v4923_v17 = vpack.c.bf16 %v1221_v10, %v1219_v8  ;;  %v4937_v59 = vpack.c.bf16 %v1238_v52, %v1236_v51  ;;  %v1237_v60 = vld [vmem:[%s6329_s26 + $0x1b30] sm:$0xff]  ;;  %v474_v62 = vld [vmem:[%s6329_s26 + $0x358] sm:$0xff]  ;;  %v1240_v63 = vld [vmem:[%s6329_s26 + $0x1b48] sm:$0xff] }
  0xd9   : > { %4136 = vmatpush1.bf16.msra.mxu1 %v4135_v18  ;;  %2886 = vmatmul.mubr.f32.vlgmr.msra.gmra.mrb[0].mxu0 %v341_v19  ;;  %v4157_v18 = vpack.c.bf16 %v458_v12, %v456_v11  ;;  %v457_v19 = vld [vmem:[%s6329_s26 + $0x2d0] sm:$0xff]  ;;  %v1242_v0 = vld [vmem:[%s6329_s26 + $0x1b58] sm:$0xff]  ;;  %v4939_v2 = vpack.c.bf16 %v1237_v60, %v1235_v58  ;;  %v1239_v6 = vld [vmem:[%s6329_s26 + $0x1b40] sm:$0xff] }
  0xda   : > { %4904 = vmatpush1.bf16.msra.mxu0 %v4903_v20  ;;  %4138 = vmatprep.subr.bf16.mxu1 %v4137_v21  ;;  %v1223_v20 = vld [vmem:[%s6329_s26 + $0x1ac0] sm:$0xff]  ;;  %v1225_v21 = vld [vmem:[%s6329_s26 + $0x1ad0] sm:$0xff]  ;;  %v4159_v29 = vpack.c.bf16 %v457_v19, %v455_v16  ;;  %v4941_v7 = vpack.c.bf16 %v1242_v0, %v1240_v63  ;;  %v478_v10 = vld [vmem:[%s6329_s26 + $0x378] sm:$0xff] }
  0xdb   : > { %4906 = vmatprep.subr.bf16.mxu0 %v4905_v25  ;;  %v320_v25 = vld [vmem:[%s6459_s27 + $0x18] sm:$0xff]  ;;  %2956 = vmatprep.mubr.f32.mxu0 %v344_v28  ;;  %v4927_v30 = vpack.c.bf16 %v1225_v21, %v1223_v20  ;;  %v1241_v8 = vld [vmem:[%s6329_s26 + $0x1b50] sm:$0xff]  ;;  %v1246_v12 = vld [vmem:[%s6329_s26 + $0x1b78] sm:$0xff] }
  0xdc   : > { %2104 = vmatprep.mubr.f32.mxu1 %v320_v25  ;;  %v1244_v11 = vld [vmem:[%s6329_s26 + $0x1b68] sm:$0xff]  ;;  %v4943_v14 = vpack.c.bf16 %v1241_v8, %v1239_v6  ;;  %v475_v16 = vld [vmem:[%s6329_s26 + $0x360] sm:$0xff]  ;;  %v1245_v20 = vld [vmem:[%s6329_s26 + $0x1b70] sm:$0xff] }
  0xdd   : > { %4140 = vmatpush1.bf16.msra.mxu1 %v4139_v31  ;;  %v4161_v31 = vpack.c.bf16 %v462_v24, %v460_v23  ;;  %v4945_v19 = vpack.c.bf16 %v1246_v12, %v1244_v11  ;;  %v480_v21 = vld [vmem:[%s6329_s26 + $0x388] sm:$0xff]  ;;  %v1250_v24 = vld [vmem:[%s6329_s26 + $0x1b98] sm:$0xff]  ;;  %v479_v28 = vld [vmem:[%s6329_s26 + $0x380] sm:$0xff] }
  0xde   : > { %4908 = vmatpush1.bf16.msra.mxu0 %v4907_v32  ;;  %4142 = vmatprep.subr.bf16.mxu1 %v4141_v33  ;;  %v459_v32 = vld [vmem:[%s6329_s26 + $0x2e0] sm:$0xff]  ;;  %v461_v33 = vld [vmem:[%s6329_s26 + $0x2f0] sm:$0xff]  ;;  %v1248_v23 = vld [vmem:[%s6329_s26 + $0x1b88] sm:$0xff] }
  0xdf   : > { %4910 = vmatprep.subr.bf16.mxu0 %v4909_v37  ;;  %v464_v37 = vld [vmem:[%s6329_s26 + $0x308] sm:$0xff]  ;;  %v4163_v41 = vpack.c.bf16 %v461_v33, %v459_v32  ;;  %v1249_v32 = vld [vmem:[%s6329_s26 + $0x1b90] sm:$0xff]  ;;  %v486_v34 = vld [vmem:[%s6329_s26 + $0x3b8] sm:$0xff] }
  0xe0   : > { %v484_v33 = vld [vmem:[%s6329_s26 + $0x3a8] sm:$0xff]  ;;  %v1254_v36 = vld [vmem:[%s6329_s26 + $0x1bb8] sm:$0xff]  ;;  %v483_v40 = vld [vmem:[%s6329_s26 + $0x3a0] sm:$0xff] }
  0xe1   : > { %4144 = vmatpush1.bf16.msra.mxu1 %v4143_v43  ;;  %v4165_v43 = vpack.c.bf16 %v466_v38, %v464_v37  ;;  %v4185_v39 = vpack.c.bf16 %v486_v34, %v484_v33  ;;  %v490_v46 = vld [vmem:[%s6329_s26 + $0x3d8] sm:$0xff]  ;;  %v487_v52 = vld [vmem:[%s6329_s26 + $0x3c0] sm:$0xff]  ;;  %v1272_v33 = vld [vmem:[%s6329_s26 + $0x1c48] sm:$0xff] }
  0xe2   : > { %4912 = vmatpush1.bf16.msra.mxu0 %v4911_v44  ;;  %4146 = vmatprep.subr.bf16.mxu1 %v4145_v45  ;;  %v463_v44 = vld [vmem:[%s6329_s26 + $0x300] sm:$0xff]  ;;  %v465_v45 = vld [vmem:[%s6329_s26 + $0x310] sm:$0xff]  ;;  %v1258_v48 = vld [vmem:[%s6329_s26 + $0x1bd8] sm:$0xff] }
  0xe3   : > { %4914 = vmatprep.subr.bf16.mxu0 %v4913_v49  ;;  %v468_v49 = vld [vmem:[%s6329_s26 + $0x328] sm:$0xff]  ;;  %v4167_v53 = vpack.c.bf16 %v465_v45, %v463_v44  ;;  %v1253_v44 = vld [vmem:[%s6329_s26 + $0x1bb0] sm:$0xff]  ;;  %v494_v58 = vld [vmem:[%s6329_s26 + $0x3f8] sm:$0xff] }
  0xe4   : > { %v488_v45 = vld [vmem:[%s6329_s26 + $0x3c8] sm:$0xff]  ;;  %v1262_v60 = vld [vmem:[%s6329_s26 + $0x1bf8] sm:$0xff]  ;;  %v491_v0 = vld [vmem:[%s6329_s26 + $0x3e0] sm:$0xff] }
  0xe5   : > { %4148 = vmatpush1.bf16.msra.mxu1 %v4147_v55  ;;  %v4169_v55 = vpack.c.bf16 %v470_v50, %v468_v49  ;;  %v4189_v51 = vpack.c.bf16 %v490_v46, %v488_v45  ;;  %v498_v6 = vld [vmem:[%s6329_s26 + $0x418] sm:$0xff]  ;;  %v495_v12 = vld [vmem:[%s6329_s26 + $0x400] sm:$0xff]  ;;  %v508_v45 = vld [vmem:[%s6329_s26 + $0x468] sm:$0xff] }
  0xe6   : > { %4916 = vmatpush1.bf16.msra.mxu0 %v4915_v56  ;;  %4150 = vmatprep.subr.bf16.mxu1 %v4149_v57  ;;  %v467_v56 = vld [vmem:[%s6329_s26 + $0x320] sm:$0xff]  ;;  %v469_v57 = vld [vmem:[%s6329_s26 + $0x330] sm:$0xff]  ;;  %v1266_v8 = vld [vmem:[%s6329_s26 + $0x1c18] sm:$0xff] }
  0xe7   : > { %4918 = vmatprep.subr.bf16.mxu0 %v4917_v61  ;;  %v472_v61 = vld [vmem:[%s6329_s26 + $0x348] sm:$0xff]  ;;  %v4171_v1 = vpack.c.bf16 %v469_v57, %v467_v56  ;;  %v1257_v56 = vld [vmem:[%s6329_s26 + $0x1bd0] sm:$0xff]  ;;  %v1274_v34 = vld [vmem:[%s6329_s26 + $0x1c58] sm:$0xff] }
  0xe8   : > { %v492_v57 = vld [vmem:[%s6329_s26 + $0x3e8] sm:$0xff]  ;;  %v510_v46 = vld [vmem:[%s6329_s26 + $0x478] sm:$0xff] }
  0xe9   : > { %4152 = vmatpush1.bf16.msra.mxu1 %v4151_v3  ;;  %v4173_v3 = vpack.c.bf16 %v474_v62, %v472_v61  ;;  %v4193_v63 = vpack.c.bf16 %v494_v58, %v492_v57  ;;  %v512_v57 = vld [vmem:[%s6329_s26 + $0x488] sm:$0xff]  ;;  %v514_v58 = vld [vmem:[%s6329_s26 + $0x498] sm:$0xff] }
  0xea   : > { %4920 = vmatpush1.bf16.msra.mxu0 %v4919_v4  ;;  %4154 = vmatprep.subr.bf16.mxu1 %v4153_v5  ;;  %v471_v4 = vld [vmem:[%s6329_s26 + $0x340] sm:$0xff]  ;;  %v473_v5 = vld [vmem:[%s6329_s26 + $0x350] sm:$0xff] }
  0xeb   : > { %4922 = vmatprep.subr.bf16.mxu0 %v4921_v9  ;;  %v476_v9 = vld [vmem:[%s6329_s26 + $0x368] sm:$0xff]  ;;  %v4175_v13 = vpack.c.bf16 %v473_v5, %v471_v4  ;;  %v1261_v4 = vld [vmem:[%s6329_s26 + $0x1bf0] sm:$0xff] }
  0xec   : > { %v496_v5 = vld [vmem:[%s6329_s26 + $0x408] sm:$0xff] }
  0xed   : > { %4156 = vmatpush1.bf16.msra.mxu1 %v4155_v15  ;;  %v4177_v15 = vpack.c.bf16 %v478_v10, %v476_v9  ;;  %v4197_v11 = vpack.c.bf16 %v498_v6, %v496_v5  ;;  %v516_v5 = vld [vmem:[%s6329_s26 + $0x4a8] sm:$0xff]  ;;  %v518_v6 = vld [vmem:[%s6329_s26 + $0x4b8] sm:$0xff] }
  0xee   : > { %4924 = vmatpush1.bf16.msra.mxu0 %v4923_v17  ;;  %4158 = vmatprep.subr.bf16.mxu1 %v4157_v18  ;;  %v477_v17 = vld [vmem:[%s6329_s26 + $0x370] sm:$0xff]  ;;  %v1243_v18 = vld [vmem:[%s6329_s26 + $0x1b60] sm:$0xff] }
  0xef   : > { %4926 = vmatprep.subr.bf16.mxu0 %v4925_v22  ;;  %v482_v22 = vld [vmem:[%s6329_s26 + $0x398] sm:$0xff]  ;;  %v4179_v25 = vpack.c.bf16 %v477_v17, %v475_v16  ;;  %v4947_v26 = vpack.c.bf16 %v1245_v20, %v1243_v18  ;;  %v1265_v16 = vld [vmem:[%s6329_s26 + $0x1c10] sm:$0xff]  ;;  %v500_v17 = vld [vmem:[%s6329_s26 + $0x428] sm:$0xff] }
  0xf0   : > { %v4181_v27 = vpack.c.bf16 %v482_v22, %v480_v21  ;;  %v502_v18 = vld [vmem:[%s6329_s26 + $0x438] sm:$0xff]  ;;  %v319_v21 = vld [vmem:[%s6459_s27 + $0x10] sm:$0xff] }
  0xf1   : > { %4160 = vmatpush1.bf16.msra.mxu1 %v4159_v29  ;;  %v481_v29 = vld [vmem:[%s6329_s26 + $0x390] sm:$0xff]  ;;  %v1270_v20 = vld [vmem:[%s6329_s26 + $0x1c38] sm:$0xff] }
  0xf2   : > { %4928 = vmatpush1.bf16.msra.mxu0 %v4927_v30  ;;  %4162 = vmatprep.subr.bf16.mxu1 %v4161_v31  ;;  %v1247_v30 = vld [vmem:[%s6329_s26 + $0x1b80] sm:$0xff]  ;;  %v4949_v31 = vpack.c.bf16 %v1250_v24, %v1248_v23  ;;  %v4183_v37 = vpack.c.bf16 %v481_v29, %v479_v28 }
  0xf3   : > { %4930 = vmatprep.subr.bf16.mxu0 %v4929_v35  ;;  %v1252_v35 = vld [vmem:[%s6329_s26 + $0x1ba8] sm:$0xff]  ;;  %v4951_v38 = vpack.c.bf16 %v1249_v32, %v1247_v30  ;;  %v343_v23 = vld [vmem:[%s6459_s27 + $0xd0] sm:$0xff]  ;;  %v1269_v30 = vld [vmem:[%s6329_s26 + $0x1c30] sm:$0xff] }
  0xf4   : > { %v1267_v28 = vld [vmem:[%s6329_s26 + $0x1c20] sm:$0xff]  ;;  %v506_v32 = vld [vmem:[%s6329_s26 + $0x458] sm:$0xff] }
  0xf5   : > { %4164 = vmatpush1.bf16.msra.mxu1 %v4163_v41  ;;  %v485_v41 = vld [vmem:[%s6329_s26 + $0x3b0] sm:$0xff] }
  0xf6   : > { %4932 = vmatpush1.bf16.msra.mxu0 %v4931_v42  ;;  %4166 = vmatprep.subr.bf16.mxu1 %v4165_v43  ;;  %v1251_v42 = vld [vmem:[%s6329_s26 + $0x1ba0] sm:$0xff]  ;;  %v4953_v43 = vpack.c.bf16 %v1254_v36, %v1252_v35  ;;  %v4187_v49 = vpack.c.bf16 %v485_v41, %v483_v40  ;;  %v322_v35 = vld [vmem:[%s6459_s27 + $0x28] sm:$0xff]  ;;  %v505_v41 = vld [vmem:[%s6329_s26 + $0x450] sm:$0xff] }
  0xf7   : > { %4934 = vmatprep.subr.bf16.mxu0 %v4933_v47  ;;  %v1256_v47 = vld [vmem:[%s6329_s26 + $0x1bc8] sm:$0xff]  ;;  %v4955_v50 = vpack.c.bf16 %v1253_v44, %v1251_v42  ;;  %v503_v40 = vld [vmem:[%s6329_s26 + $0x440] sm:$0xff]  ;;  %v1273_v44 = vld [vmem:[%s6329_s26 + $0x1c50] sm:$0xff] }
  0xf8   : > { %v1271_v42 = vld [vmem:[%s6329_s26 + $0x1c40] sm:$0xff] }
  0xf9   : > { %4168 = vmatpush1.bf16.msra.mxu1 %v4167_v53  ;;  %v489_v53 = vld [vmem:[%s6329_s26 + $0x3d0] sm:$0xff] }
  0xfa   : > { %4936 = vmatpush1.bf16.msra.mxu0 %v4935_v54  ;;  %4170 = vmatprep.subr.bf16.mxu1 %v4169_v55  ;;  %v1255_v54 = vld [vmem:[%s6329_s26 + $0x1bc0] sm:$0xff]  ;;  %v4957_v55 = vpack.c.bf16 %v1258_v48, %v1256_v47  ;;  %v4191_v61 = vpack.c.bf16 %v489_v53, %v487_v52  ;;  %v1276_v47 = vld [vmem:[%s6329_s26 + $0x1c68] sm:$0xff]  ;;  %v1278_v48 = vld [vmem:[%s6329_s26 + $0x1c78] sm:$0xff] }
  0xfb   : > { %4938 = vmatprep.subr.bf16.mxu0 %v4937_v59  ;;  %v1260_v59 = vld [vmem:[%s6329_s26 + $0x1be8] sm:$0xff]  ;;  %v4959_v62 = vpack.c.bf16 %v1257_v56, %v1255_v54  ;;  %v507_v52 = vld [vmem:[%s6329_s26 + $0x460] sm:$0xff]  ;;  %v509_v53 = vld [vmem:[%s6329_s26 + $0x470] sm:$0xff] }
  0xfc   : > { %v1275_v54 = vld [vmem:[%s6329_s26 + $0x1c60] sm:$0xff]  ;;  %v1277_v56 = vld [vmem:[%s6329_s26 + $0x1c70] sm:$0xff] }
  0xfd   : > { %4172 = vmatpush1.bf16.msra.mxu1 %v4171_v1  ;;  %v493_v1 = vld [vmem:[%s6329_s26 + $0x3f0] sm:$0xff] }
  0xfe   : > { %4940 = vmatpush1.bf16.msra.mxu0 %v4939_v2  ;;  %4174 = vmatprep.subr.bf16.mxu1 %v4173_v3  ;;  %v1259_v2 = vld [vmem:[%s6329_s26 + $0x1be0] sm:$0xff]  ;;  %v4961_v3 = vpack.c.bf16 %v1262_v60, %v1260_v59  ;;  %v4195_v9 = vpack.c.bf16 %v493_v1, %v491_v0  ;;  %v1280_v59 = vld [vmem:[%s6329_s26 + $0x1c88] sm:$0xff]  ;;  %v1282_v60 = vld [vmem:[%s6329_s26 + $0x1c98] sm:$0xff] }
  0xff   : > { %4942 = vmatprep.subr.bf16.mxu0 %v4941_v7  ;;  %v1264_v7 = vld [vmem:[%s6329_s26 + $0x1c08] sm:$0xff]  ;;  %v4963_v10 = vpack.c.bf16 %v1261_v4, %v1259_v2  ;;  %v511_v0 = vld [vmem:[%s6329_s26 + $0x480] sm:$0xff]  ;;  %v513_v1 = vld [vmem:[%s6329_s26 + $0x490] sm:$0xff] }
 0x100   : > { %v1279_v2 = vld [vmem:[%s6329_s26 + $0x1c80] sm:$0xff]  ;;  %v1281_v4 = vld [vmem:[%s6329_s26 + $0x1c90] sm:$0xff] }
 0x101   : > { %4176 = vmatpush1.bf16.msra.mxu1 %v4175_v13  ;;  %v497_v13 = vld [vmem:[%s6329_s26 + $0x410] sm:$0xff] }
 0x102   : > { %4944 = vmatpush1.bf16.msra.mxu0 %v4943_v14  ;;  %4178 = vmatprep.subr.bf16.mxu1 %v4177_v15  ;;  %v1263_v14 = vld [vmem:[%s6329_s26 + $0x1c00] sm:$0xff]  ;;  %v4965_v15 = vpack.c.bf16 %v1266_v8, %v1264_v7  ;;  %v4199_v22 = vpack.c.bf16 %v497_v13, %v495_v12  ;;  %v1284_v7 = vld [vmem:[%s6329_s26 + $0x1ca8] sm:$0xff]  ;;  %v1286_v8 = vld [vmem:[%s6329_s26 + $0x1cb8] sm:$0xff] }
 0x103   : > { %4946 = vmatprep.subr.bf16.mxu0 %v4945_v19  ;;  %v1268_v19 = vld [vmem:[%s6329_s26 + $0x1c28] sm:$0xff]  ;;  %v4967_v24 = vpack.c.bf16 %v1265_v16, %v1263_v14  ;;  %v515_v12 = vld [vmem:[%s6329_s26 + $0x4a0] sm:$0xff]  ;;  %v517_v13 = vld [vmem:[%s6329_s26 + $0x4b0] sm:$0xff] }
 0x104   : > { %v4969_v29 = vpack.c.bf16 %v1270_v20, %v1268_v19  ;;  %v1283_v14 = vld [vmem:[%s6329_s26 + $0x1ca0] sm:$0xff]  ;;  %v1285_v16 = vld [vmem:[%s6329_s26 + $0x1cb0] sm:$0xff]  ;;  %v1288_v19 = vld [vmem:[%s6329_s26 + $0x1cc8] sm:$0xff] }
 0x105   : > { %4180 = vmatpush1.bf16.msra.mxu1 %v4179_v25  ;;  %v4201_v25 = vpack.c.bf16 %v502_v18, %v500_v17  ;;  %v520_v17 = vld [vmem:[%s6329_s26 + $0x4c8] sm:$0xff]  ;;  %v522_v18 = vld [vmem:[%s6329_s26 + $0x4d8] sm:$0xff] }
 0x106   : > { %4948 = vmatpush1.bf16.msra.mxu0 %v4947_v26  ;;  %4182 = vmatprep.subr.bf16.mxu1 %v4181_v27  ;;  %v499_v26 = vld [vmem:[%s6329_s26 + $0x420] sm:$0xff]  ;;  %v501_v27 = vld [vmem:[%s6329_s26 + $0x430] sm:$0xff]  ;;  %v1290_v20 = vld [vmem:[%s6329_s26 + $0x1cd8] sm:$0xff] }
 0x107   : > { %4950 = vmatprep.subr.bf16.mxu0 %v4949_v31  ;;  %v504_v31 = vld [vmem:[%s6329_s26 + $0x448] sm:$0xff]  ;;  %v4203_v36 = vpack.c.bf16 %v501_v27, %v499_v26  ;;  %v1287_v26 = vld [vmem:[%s6329_s26 + $0x1cc0] sm:$0xff]  ;;  %v4989_v27 = vpack.c.bf16 %v1290_v20, %v1288_v19 }
 0x108   : > { %v539_v20 = vld [vmem:[%s6329_s26 + $0x560] sm:$0xff] }
 0x109   : > { %4184 = vmatpush1.bf16.msra.mxu1 %v4183_v37  ;;  %v346_v37 = vld [vmem:[%s6459_s27 + $0xe8] sm:$0xff] }
 0x10a   : > { %4952 = vmatpush1.bf16.msra.mxu0 %v4951_v38  ;;  %4186 = vmatprep.subr.bf16.mxu1 %v4185_v39  ;;  %v4971_v38 = vpack.c.bf16 %v1269_v30, %v1267_v28  ;;  %v4205_v39 = vpack.c.bf16 %v506_v32, %v504_v31  ;;  %v1289_v28 = vld [vmem:[%s6329_s26 + $0x1cd0] sm:$0xff]  ;;  %v526_v30 = vld [vmem:[%s6329_s26 + $0x4f8] sm:$0xff]  ;;  %v1292_v31 = vld [vmem:[%s6329_s26 + $0x1ce8] sm:$0xff] }
 0x10b   : > { %4954 = vmatprep.subr.bf16.mxu0 %v4953_v43  ;;  %v4973_v43 = vpack.c.bf16 %v1274_v34, %v1272_v33  ;;  %v1294_v32 = vld [vmem:[%s6329_s26 + $0x1cf8] sm:$0xff]  ;;  %v4991_v34 = vpack.c.bf16 %v1289_v28, %v1287_v26 }
 0x10c   : > { %v546_v26 = vld [vmem:[%s6329_s26 + $0x598] sm:$0xff] }
 0x10d   : > { %4188 = vmatpush1.bf16.msra.mxu1 %v4187_v49  ;;  %v4207_v49 = vpack.c.bf16 %v505_v41, %v503_v40  ;;  %v1293_v40 = vld [vmem:[%s6329_s26 + $0x1cf0] sm:$0xff]  ;;  %v528_v41 = vld [vmem:[%s6329_s26 + $0x508] sm:$0xff]  ;;  %v1314_v28 = vld [vmem:[%s6329_s26 + $0x1d98] sm:$0xff] }
 0x10e   : > { %4956 = vmatpush1.bf16.msra.mxu0 %v4955_v50  ;;  %4190 = vmatprep.subr.bf16.mxu1 %v4189_v51  ;;  %v4975_v50 = vpack.c.bf16 %v1273_v44, %v1271_v42  ;;  %v4209_v51 = vpack.c.bf16 %v510_v46, %v508_v45  ;;  %v530_v42 = vld [vmem:[%s6329_s26 + $0x518] sm:$0xff] }
 0x10f   : > { %4958 = vmatprep.subr.bf16.mxu0 %v4957_v55  ;;  %v4977_v55 = vpack.c.bf16 %v1278_v48, %v1276_v47  ;;  %v1298_v44 = vld [vmem:[%s6329_s26 + $0x1d18] sm:$0xff]  ;;  %v4229_v47 = vpack.c.bf16 %v530_v42, %v528_v41  ;;  %v527_v48 = vld [vmem:[%s6329_s26 + $0x500] sm:$0xff] }
 0x111   : > { %4192 = vmatpush1.bf16.msra.mxu1 %v4191_v61  ;;  %v4211_v61 = vpack.c.bf16 %v509_v53, %v507_v52  ;;  %v1297_v52 = vld [vmem:[%s6329_s26 + $0x1d10] sm:$0xff]  ;;  %v532_v53 = vld [vmem:[%s6329_s26 + $0x528] sm:$0xff] }
 0x112   : > { %4960 = vmatpush1.bf16.msra.mxu0 %v4959_v62  ;;  %4194 = vmatprep.subr.bf16.mxu1 %v4193_v63  ;;  %v4979_v62 = vpack.c.bf16 %v1277_v56, %v1275_v54  ;;  %v4213_v63 = vpack.c.bf16 %v514_v58, %v512_v57  ;;  %v534_v54 = vld [vmem:[%s6329_s26 + $0x538] sm:$0xff] }
 0x113   : > { %4962 = vmatprep.subr.bf16.mxu0 %v4961_v3  ;;  %v4981_v3 = vpack.c.bf16 %v1282_v60, %v1280_v59  ;;  %v1302_v56 = vld [vmem:[%s6329_s26 + $0x1d38] sm:$0xff]  ;;  %v4233_v59 = vpack.c.bf16 %v534_v54, %v532_v53  ;;  %v531_v60 = vld [vmem:[%s6329_s26 + $0x520] sm:$0xff] }
 0x115   : > { %4196 = vmatpush1.bf16.msra.mxu1 %v4195_v9  ;;  %v4215_v9 = vpack.c.bf16 %v513_v1, %v511_v0  ;;  %v1301_v0 = vld [vmem:[%s6329_s26 + $0x1d30] sm:$0xff]  ;;  %v536_v1 = vld [vmem:[%s6329_s26 + $0x548] sm:$0xff] }
 0x116   : > { %4964 = vmatpush1.bf16.msra.mxu0 %v4963_v10  ;;  %4198 = vmatprep.subr.bf16.mxu1 %v4197_v11  ;;  %v4983_v10 = vpack.c.bf16 %v1281_v4, %v1279_v2  ;;  %v4217_v11 = vpack.c.bf16 %v518_v6, %v516_v5  ;;  %v538_v2 = vld [vmem:[%s6329_s26 + $0x558] sm:$0xff] }
 0x117   : > { %4966 = vmatprep.subr.bf16.mxu0 %v4965_v15  ;;  %v4985_v15 = vpack.c.bf16 %v1286_v8, %v1284_v7  ;;  %v1306_v4 = vld [vmem:[%s6329_s26 + $0x1d58] sm:$0xff]  ;;  %v4237_v7 = vpack.c.bf16 %v538_v2, %v536_v1  ;;  %v535_v8 = vld [vmem:[%s6329_s26 + $0x540] sm:$0xff] }
 0x118   : > { %2105 = vmatmul.mubr.f32.vlgmr.msra.gmra.mrb[0].mxu1 %v319_v21  ;;  %v4219_v21 = vpack.c.bf16 %v517_v13, %v515_v12  ;;  %v1305_v12 = vld [vmem:[%s6329_s26 + $0x1d50] sm:$0xff]  ;;  %v540_v13 = vld [vmem:[%s6329_s26 + $0x568] sm:$0xff] }
 0x119   : > { %4200 = vmatpush1.bf16.msra.mxu1 %v4199_v22  ;;  %2957 = vmatmul.mubr.f32.vlgmr.msra.gmra.mrb[0].mxu0 %v343_v23  ;;  %v4987_v22 = vpack.c.bf16 %v1285_v16, %v1283_v14  ;;  %v4221_v23 = vpack.c.bf16 %v522_v18, %v520_v17  ;;  %v542_v14 = vld [vmem:[%s6329_s26 + $0x578] sm:$0xff] }
 0x11a   : > { %4968 = vmatpush1.bf16.msra.mxu0 %v4967_v24  ;;  %4202 = vmatprep.subr.bf16.mxu1 %v4201_v25  ;;  %v519_v24 = vld [vmem:[%s6329_s26 + $0x4c0] sm:$0xff]  ;;  %v521_v25 = vld [vmem:[%s6329_s26 + $0x4d0] sm:$0xff]  ;;  %v1310_v16 = vld [vmem:[%s6329_s26 + $0x1d78] sm:$0xff]  ;;  %v4241_v19 = vpack.c.bf16 %v542_v14, %v540_v13 }
 0x11b   : > { %4970 = vmatprep.subr.bf16.mxu0 %v4969_v29  ;;  %2175 = vmatprep.mubr.f32.mxu1 %v322_v35  ;;  %v524_v29 = vld [vmem:[%s6329_s26 + $0x4e8] sm:$0xff]  ;;  %v4223_v33 = vpack.c.bf16 %v521_v25, %v519_v24  ;;  %v1309_v24 = vld [vmem:[%s6329_s26 + $0x1d70] sm:$0xff] }
 0x11c   : > { %3027 = vmatprep.mubr.f32.mxu0 %v346_v37  ;;  %v4225_v35 = vpack.c.bf16 %v526_v30, %v524_v29  ;;  %v525_v37 = vld [vmem:[%s6329_s26 + $0x4f0] sm:$0xff]  ;;  %v544_v25 = vld [vmem:[%s6329_s26 + $0x588] sm:$0xff] }
 0x11d   : > { %4204 = vmatpush1.bf16.msra.mxu1 %v4203_v36  ;;  %v523_v36 = vld [vmem:[%s6329_s26 + $0x4e0] sm:$0xff] }
 0x11e   : > { %4972 = vmatpush1.bf16.msra.mxu0 %v4971_v38  ;;  %4206 = vmatprep.subr.bf16.mxu1 %v4205_v39  ;;  %v1291_v38 = vld [vmem:[%s6329_s26 + $0x1ce0] sm:$0xff]  ;;  %v4993_v39 = vpack.c.bf16 %v1294_v32, %v1292_v31  ;;  %v4227_v45 = vpack.c.bf16 %v525_v37, %v523_v36  ;;  %v4245_v31 = vpack.c.bf16 %v546_v26, %v544_v25  ;;  %v1313_v36 = vld [vmem:[%s6329_s26 + $0x1d90] sm:$0xff]  ;;  %v548_v37 = vld [vmem:[%s6329_s26 + $0x5a8] sm:$0xff] }
 0x11f   : > { %4974 = vmatprep.subr.bf16.mxu0 %v4973_v43  ;;  %v1296_v43 = vld [vmem:[%s6329_s26 + $0x1d08] sm:$0xff]  ;;  %v4995_v46 = vpack.c.bf16 %v1293_v40, %v1291_v38  ;;  %v543_v32 = vld [vmem:[%s6329_s26 + $0x580] sm:$0xff]  ;;  %v550_v38 = vld [vmem:[%s6329_s26 + $0x5b8] sm:$0xff] }
 0x120   : > { %v1318_v40 = vld [vmem:[%s6329_s26 + $0x1db8] sm:$0xff]  ;;  %v321_v25 = vld [vmem:[%s6459_s27 + $0x20] sm:$0xff] }
 0x121   : > { %4208 = vmatpush1.bf16.msra.mxu1 %v4207_v49  ;;  %v529_v49 = vld [vmem:[%s6329_s26 + $0x510] sm:$0xff] }
 0x122   : > { %4976 = vmatpush1.bf16.msra.mxu0 %v4975_v50  ;;  %4210 = vmatprep.subr.bf16.mxu1 %v4209_v51  ;;  %v1295_v50 = vld [vmem:[%s6329_s26 + $0x1d00] sm:$0xff]  ;;  %v4997_v51 = vpack.c.bf16 %v1298_v44, %v1296_v43  ;;  %v4231_v57 = vpack.c.bf16 %v529_v49, %v527_v48  ;;  %v4249_v43 = vpack.c.bf16 %v550_v38, %v548_v37  ;;  %v1317_v48 = vld [vmem:[%s6329_s26 + $0x1db0] sm:$0xff]  ;;  %v552_v49 = vld [vmem:[%s6329_s26 + $0x5c8] sm:$0xff] }
 0x123   : > { %4978 = vmatprep.subr.bf16.mxu0 %v4977_v55  ;;  %v1300_v55 = vld [vmem:[%s6329_s26 + $0x1d28] sm:$0xff]  ;;  %v4999_v58 = vpack.c.bf16 %v1297_v52, %v1295_v50  ;;  %v547_v44 = vld [vmem:[%s6329_s26 + $0x5a0] sm:$0xff]  ;;  %v554_v50 = vld [vmem:[%s6329_s26 + $0x5d8] sm:$0xff] }
 0x124   : > { %v1322_v52 = vld [vmem:[%s6329_s26 + $0x1dd8] sm:$0xff]  ;;  %v1336_v37 = vld [vmem:[%s6329_s26 + $0x1e48] sm:$0xff] }
 0x125   : > { %4212 = vmatpush1.bf16.msra.mxu1 %v4211_v61  ;;  %v533_v61 = vld [vmem:[%s6329_s26 + $0x530] sm:$0xff]  ;;  %v1338_v38 = vld [vmem:[%s6329_s26 + $0x1e58] sm:$0xff] }
 0x126   : > { %4980 = vmatpush1.bf16.msra.mxu0 %v4979_v62  ;;  %4214 = vmatprep.subr.bf16.mxu1 %v4213_v63  ;;  %v1299_v62 = vld [vmem:[%s6329_s26 + $0x1d20] sm:$0xff]  ;;  %v5001_v63 = vpack.c.bf16 %v1302_v56, %v1300_v55  ;;  %v4235_v5 = vpack.c.bf16 %v533_v61, %v531_v60  ;;  %v4253_v55 = vpack.c.bf16 %v554_v50, %v552_v49  ;;  %v1321_v60 = vld [vmem:[%s6329_s26 + $0x1dd0] sm:$0xff]  ;;  %v556_v61 = vld [vmem:[%s6329_s26 + $0x5e8] sm:$0xff] }
 0x127   : > { %4982 = vmatprep.subr.bf16.mxu0 %v4981_v3  ;;  %v1304_v3 = vld [vmem:[%s6329_s26 + $0x1d48] sm:$0xff]  ;;  %v5003_v6 = vpack.c.bf16 %v1301_v0, %v1299_v62  ;;  %v551_v56 = vld [vmem:[%s6329_s26 + $0x5c0] sm:$0xff]  ;;  %v558_v62 = vld [vmem:[%s6329_s26 + $0x5f8] sm:$0xff] }
 0x128   : > { %v1326_v0 = vld [vmem:[%s6329_s26 + $0x1df8] sm:$0xff]  ;;  %v572_v49 = vld [vmem:[%s6329_s26 + $0x668] sm:$0xff] }
 0x129   : > { %4216 = vmatpush1.bf16.msra.mxu1 %v4215_v9  ;;  %v537_v9 = vld [vmem:[%s6329_s26 + $0x550] sm:$0xff]  ;;  %v574_v50 = vld [vmem:[%s6329_s26 + $0x678] sm:$0xff] }
 0x12a   : > { %4984 = vmatpush1.bf16.msra.mxu0 %v4983_v10  ;;  %4218 = vmatprep.subr.bf16.mxu1 %v4217_v11  ;;  %v1303_v10 = vld [vmem:[%s6329_s26 + $0x1d40] sm:$0xff]  ;;  %v5005_v11 = vpack.c.bf16 %v1306_v4, %v1304_v3  ;;  %v4239_v17 = vpack.c.bf16 %v537_v9, %v535_v8  ;;  %v4257_v3 = vpack.c.bf16 %v558_v62, %v556_v61  ;;  %v1325_v8 = vld [vmem:[%s6329_s26 + $0x1df0] sm:$0xff]  ;;  %v560_v9 = vld [vmem:[%s6329_s26 + $0x608] sm:$0xff] }
 0x12b   : > { %4986 = vmatprep.subr.bf16.mxu0 %v4985_v15  ;;  %v1308_v15 = vld [vmem:[%s6329_s26 + $0x1d68] sm:$0xff]  ;;  %v5007_v18 = vpack.c.bf16 %v1305_v12, %v1303_v10  ;;  %v555_v4 = vld [vmem:[%s6329_s26 + $0x5e0] sm:$0xff]  ;;  %v562_v10 = vld [vmem:[%s6329_s26 + $0x618] sm:$0xff] }
 0x12c   : > { %v1330_v12 = vld [vmem:[%s6329_s26 + $0x1e18] sm:$0xff]  ;;  %v576_v61 = vld [vmem:[%s6329_s26 + $0x688] sm:$0xff] }
 0x12d   : > { %4220 = vmatpush1.bf16.msra.mxu1 %v4219_v21  ;;  %v541_v21 = vld [vmem:[%s6329_s26 + $0x570] sm:$0xff]  ;;  %v578_v62 = vld [vmem:[%s6329_s26 + $0x698] sm:$0xff] }
 0x12e   : > { %4988 = vmatpush1.bf16.msra.mxu0 %v4987_v22  ;;  %4222 = vmatprep.subr.bf16.mxu1 %v4221_v23  ;;  %v1307_v22 = vld [vmem:[%s6329_s26 + $0x1d60] sm:$0xff]  ;;  %v5009_v23 = vpack.c.bf16 %v1310_v16, %v1308_v15  ;;  %v4243_v29 = vpack.c.bf16 %v541_v21, %v539_v20  ;;  %v4261_v15 = vpack.c.bf16 %v562_v10, %v560_v9  ;;  %v1329_v20 = vld [vmem:[%s6329_s26 + $0x1e10] sm:$0xff]  ;;  %v564_v21 = vld [vmem:[%s6329_s26 + $0x628] sm:$0xff] }
 0x12f   : > { %4990 = vmatprep.subr.bf16.mxu0 %v4989_v27  ;;  %v1312_v27 = vld [vmem:[%s6329_s26 + $0x1d88] sm:$0xff]  ;;  %v5011_v30 = vpack.c.bf16 %v1309_v24, %v1307_v22  ;;  %v559_v16 = vld [vmem:[%s6329_s26 + $0x600] sm:$0xff]  ;;  %v566_v22 = vld [vmem:[%s6329_s26 + $0x638] sm:$0xff] }
 0x130   : > { %v1334_v24 = vld [vmem:[%s6329_s26 + $0x1e38] sm:$0xff]  ;;  %v580_v9 = vld [vmem:[%s6329_s26 + $0x6a8] sm:$0xff] }
 0x131   : > { %4224 = vmatpush1.bf16.msra.mxu1 %v4223_v33  ;;  %v545_v33 = vld [vmem:[%s6329_s26 + $0x590] sm:$0xff]  ;;  %v582_v10 = vld [vmem:[%s6329_s26 + $0x6b8] sm:$0xff] }
 0x132   : > { %4992 = vmatpush1.bf16.msra.mxu0 %v4991_v34  ;;  %4226 = vmatprep.subr.bf16.mxu1 %v4225_v35  ;;  %v1311_v34 = vld [vmem:[%s6329_s26 + $0x1d80] sm:$0xff]  ;;  %v5013_v35 = vpack.c.bf16 %v1314_v28, %v1312_v27  ;;  %v4247_v41 = vpack.c.bf16 %v545_v33, %v543_v32  ;;  %v345_v27 = vld [vmem:[%s6459_s27 + $0xe0] sm:$0xff] }
 0x133   : > { %4994 = vmatprep.subr.bf16.mxu0 %v4993_v39  ;;  %v1316_v39 = vld [vmem:[%s6329_s26 + $0x1da8] sm:$0xff]  ;;  %v5015_v42 = vpack.c.bf16 %v1313_v36, %v1311_v34  ;;  %v1331_v32 = vld [vmem:[%s6329_s26 + $0x1e20] sm:$0xff]  ;;  %v1333_v34 = vld [vmem:[%s6329_s26 + $0x1e30] sm:$0xff] }
 0x134   : > { %v570_v36 = vld [vmem:[%s6329_s26 + $0x658] sm:$0xff] }
 0x135   : > { %4228 = vmatpush1.bf16.msra.mxu1 %v4227_v45  ;;  %v549_v45 = vld [vmem:[%s6329_s26 + $0x5b0] sm:$0xff] }
 0x136   : > { %4996 = vmatpush1.bf16.msra.mxu0 %v4995_v46  ;;  %4230 = vmatprep.subr.bf16.mxu1 %v4229_v47  ;;  %v1315_v46 = vld [vmem:[%s6329_s26 + $0x1da0] sm:$0xff]  ;;  %v5017_v47 = vpack.c.bf16 %v1318_v40, %v1316_v39  ;;  %v4251_v53 = vpack.c.bf16 %v549_v45, %v547_v44  ;;  %v324_v39 = vld [vmem:[%s6459_s27 + $0x38] sm:$0xff]  ;;  %v569_v45 = vld [vmem:[%s6329_s26 + $0x650] sm:$0xff] }
 0x137   : > { %4998 = vmatprep.subr.bf16.mxu0 %v4997_v51  ;;  %v1320_v51 = vld [vmem:[%s6329_s26 + $0x1dc8] sm:$0xff]  ;;  %v5019_v54 = vpack.c.bf16 %v1317_v48, %v1315_v46  ;;  %v567_v44 = vld [vmem:[%s6329_s26 + $0x640] sm:$0xff]  ;;  %v1337_v48 = vld [vmem:[%s6329_s26 + $0x1e50] sm:$0xff] }
 0x138   : > { %v1335_v46 = vld [vmem:[%s6329_s26 + $0x1e40] sm:$0xff] }
 0x139   : > { %4232 = vmatpush1.bf16.msra.mxu1 %v4231_v57  ;;  %v553_v57 = vld [vmem:[%s6329_s26 + $0x5d0] sm:$0xff] }
 0x13a   : > { %5000 = vmatpush1.bf16.msra.mxu0 %v4999_v58  ;;  %4234 = vmatprep.subr.bf16.mxu1 %v4233_v59  ;;  %v1319_v58 = vld [vmem:[%s6329_s26 + $0x1dc0] sm:$0xff]  ;;  %v5021_v59 = vpack.c.bf16 %v1322_v52, %v1320_v51  ;;  %v4255_v1 = vpack.c.bf16 %v553_v57, %v551_v56  ;;  %v1340_v51 = vld [vmem:[%s6329_s26 + $0x1e68] sm:$0xff]  ;;  %v1342_v52 = vld [vmem:[%s6329_s26 + $0x1e78] sm:$0xff] }
 0x13b   : > { %5002 = vmatprep.subr.bf16.mxu0 %v5001_v63  ;;  %v1324_v63 = vld [vmem:[%s6329_s26 + $0x1de8] sm:$0xff]  ;;  %v5023_v2 = vpack.c.bf16 %v1321_v60, %v1319_v58  ;;  %v571_v56 = vld [vmem:[%s6329_s26 + $0x660] sm:$0xff]  ;;  %v573_v57 = vld [vmem:[%s6329_s26 + $0x670] sm:$0xff] }
 0x13c   : > { %v1339_v58 = vld [vmem:[%s6329_s26 + $0x1e60] sm:$0xff]  ;;  %v1341_v60 = vld [vmem:[%s6329_s26 + $0x1e70] sm:$0xff] }
 0x13d   : > { %4236 = vmatpush1.bf16.msra.mxu1 %v4235_v5  ;;  %v557_v5 = vld [vmem:[%s6329_s26 + $0x5f0] sm:$0xff] }
 0x13e   : > { %5004 = vmatpush1.bf16.msra.mxu0 %v5003_v6  ;;  %4238 = vmatprep.subr.bf16.mxu1 %v4237_v7  ;;  %v1323_v6 = vld [vmem:[%s6329_s26 + $0x1de0] sm:$0xff]  ;;  %v5025_v7 = vpack.c.bf16 %v1326_v0, %v1324_v63  ;;  %v4259_v13 = vpack.c.bf16 %v557_v5, %v555_v4  ;;  %v1344_v63 = vld [vmem:[%s6329_s26 + $0x1e88] sm:$0xff]  ;;  %v1346_v0 = vld [vmem:[%s6329_s26 + $0x1e98] sm:$0xff] }
 0x13f   : > { %5006 = vmatprep.subr.bf16.mxu0 %v5005_v11  ;;  %v1328_v11 = vld [vmem:[%s6329_s26 + $0x1e08] sm:$0xff]  ;;  %v5027_v14 = vpack.c.bf16 %v1325_v8, %v1323_v6  ;;  %v575_v4 = vld [vmem:[%s6329_s26 + $0x680] sm:$0xff]  ;;  %v577_v5 = vld [vmem:[%s6329_s26 + $0x690] sm:$0xff] }
 0x140   : > { %v1343_v6 = vld [vmem:[%s6329_s26 + $0x1e80] sm:$0xff]  ;;  %v1345_v8 = vld [vmem:[%s6329_s26 + $0x1e90] sm:$0xff] }
 0x141   : > { %4240 = vmatpush1.bf16.msra.mxu1 %v4239_v17  ;;  %v561_v17 = vld [vmem:[%s6329_s26 + $0x610] sm:$0xff] }
 0x142   : > { %5008 = vmatpush1.bf16.msra.mxu0 %v5007_v18  ;;  %4242 = vmatprep.subr.bf16.mxu1 %v4241_v19  ;;  %v1327_v18 = vld [vmem:[%s6329_s26 + $0x1e00] sm:$0xff]  ;;  %v5029_v19 = vpack.c.bf16 %v1330_v12, %v1328_v11  ;;  %v4263_v26 = vpack.c.bf16 %v561_v17, %v559_v16  ;;  %v1348_v11 = vld [vmem:[%s6329_s26 + $0x1ea8] sm:$0xff]  ;;  %v1350_v12 = vld [vmem:[%s6329_s26 + $0x1eb8] sm:$0xff] }
 0x143   : > { %5010 = vmatprep.subr.bf16.mxu0 %v5009_v23  ;;  %v1332_v23 = vld [vmem:[%s6329_s26 + $0x1e28] sm:$0xff]  ;;  %v5031_v28 = vpack.c.bf16 %v1329_v20, %v1327_v18  ;;  %v579_v16 = vld [vmem:[%s6329_s26 + $0x6a0] sm:$0xff]  ;;  %v581_v17 = vld [vmem:[%s6329_s26 + $0x6b0] sm:$0xff] }
 0x144   : > { %v5033_v33 = vpack.c.bf16 %v1334_v24, %v1332_v23  ;;  %v1347_v18 = vld [vmem:[%s6329_s26 + $0x1ea0] sm:$0xff]  ;;  %v1349_v20 = vld [vmem:[%s6329_s26 + $0x1eb0] sm:$0xff]  ;;  %v1352_v23 = vld [vmem:[%s6329_s26 + $0x1ec8] sm:$0xff] }
 0x145   : > { %4244 = vmatpush1.bf16.msra.mxu1 %v4243_v29  ;;  %v4265_v29 = vpack.c.bf16 %v566_v22, %v564_v21  ;;  %v584_v21 = vld [vmem:[%s6329_s26 + $0x6c8] sm:$0xff]  ;;  %v586_v22 = vld [vmem:[%s6329_s26 + $0x6d8] sm:$0xff] }
 0x146   : > { %5012 = vmatpush1.bf16.msra.mxu0 %v5011_v30  ;;  %4246 = vmatprep.subr.bf16.mxu1 %v4245_v31  ;;  %v563_v30 = vld [vmem:[%s6329_s26 + $0x620] sm:$0xff]  ;;  %v565_v31 = vld [vmem:[%s6329_s26 + $0x630] sm:$0xff]  ;;  %v1354_v24 = vld [vmem:[%s6329_s26 + $0x1ed8] sm:$0xff] }
 0x147   : > { %5014 = vmatprep.subr.bf16.mxu0 %v5013_v35  ;;  %v568_v35 = vld [vmem:[%s6329_s26 + $0x648] sm:$0xff]  ;;  %v4267_v40 = vpack.c.bf16 %v565_v31, %v563_v30  ;;  %v1351_v30 = vld [vmem:[%s6329_s26 + $0x1ec0] sm:$0xff]  ;;  %v5053_v31 = vpack.c.bf16 %v1354_v24, %v1352_v23 }
 0x148   : > { %v603_v24 = vld [vmem:[%s6329_s26 + $0x760] sm:$0xff] }
 0x149   : > { %4248 = vmatpush1.bf16.msra.mxu1 %v4247_v41  ;;  %v348_v41 = vld [vmem:[%s6459_s27 + $0xf8] sm:$0xff] }
 0x14a   : > { %5016 = vmatpush1.bf16.msra.mxu0 %v5015_v42  ;;  %4250 = vmatprep.subr.bf16.mxu1 %v4249_v43  ;;  %v5035_v42 = vpack.c.bf16 %v1333_v34, %v1331_v32  ;;  %v4269_v43 = vpack.c.bf16 %v570_v36, %v568_v35  ;;  %v1353_v32 = vld [vmem:[%s6329_s26 + $0x1ed0] sm:$0xff]  ;;  %v590_v34 = vld [vmem:[%s6329_s26 + $0x6f8] sm:$0xff]  ;;  %v1356_v35 = vld [vmem:[%s6329_s26 + $0x1ee8] sm:$0xff] }
 0x14b   : > { %5018 = vmatprep.subr.bf16.mxu0 %v5017_v47  ;;  %v5037_v47 = vpack.c.bf16 %v1338_v38, %v1336_v37  ;;  %v1358_v36 = vld [vmem:[%s6329_s26 + $0x1ef8] sm:$0xff]  ;;  %v5055_v38 = vpack.c.bf16 %v1353_v32, %v1351_v30 }
 0x14c   : > { %v610_v30 = vld [vmem:[%s6329_s26 + $0x798] sm:$0xff] }
 0x14d   : > { %4252 = vmatpush1.bf16.msra.mxu1 %v4251_v53  ;;  %v4271_v53 = vpack.c.bf16 %v569_v45, %v567_v44  ;;  %v1357_v44 = vld [vmem:[%s6329_s26 + $0x1ef0] sm:$0xff]  ;;  %v592_v45 = vld [vmem:[%s6329_s26 + $0x708] sm:$0xff]  ;;  %v1378_v32 = vld [vmem:[%s6329_s26 + $0x1f98] sm:$0xff] }
 0x14e   : > { %5020 = vmatpush1.bf16.msra.mxu0 %v5019_v54  ;;  %4254 = vmatprep.subr.bf16.mxu1 %v4253_v55  ;;  %v5039_v54 = vpack.c.bf16 %v1337_v48, %v1335_v46  ;;  %v4273_v55 = vpack.c.bf16 %v574_v50, %v572_v49  ;;  %v594_v46 = vld [vmem:[%s6329_s26 + $0x718] sm:$0xff] }
 0x14f   : > { %5022 = vmatprep.subr.bf16.mxu0 %v5021_v59  ;;  %v5041_v59 = vpack.c.bf16 %v1342_v52, %v1340_v51  ;;  %v1362_v48 = vld [vmem:[%s6329_s26 + $0x1f18] sm:$0xff]  ;;  %v4293_v51 = vpack.c.bf16 %v594_v46, %v592_v45  ;;  %v591_v52 = vld [vmem:[%s6329_s26 + $0x700] sm:$0xff] }
 0x151   : > { %4256 = vmatpush1.bf16.msra.mxu1 %v4255_v1  ;;  %v4275_v1 = vpack.c.bf16 %v573_v57, %v571_v56  ;;  %v1361_v56 = vld [vmem:[%s6329_s26 + $0x1f10] sm:$0xff]  ;;  %v596_v57 = vld [vmem:[%s6329_s26 + $0x728] sm:$0xff] }
 0x152   : > { %5024 = vmatpush1.bf16.msra.mxu0 %v5023_v2  ;;  %4258 = vmatprep.subr.bf16.mxu1 %v4257_v3  ;;  %v5043_v2 = vpack.c.bf16 %v1341_v60, %v1339_v58  ;;  %v4277_v3 = vpack.c.bf16 %v578_v62, %v576_v61  ;;  %v598_v58 = vld [vmem:[%s6329_s26 + $0x738] sm:$0xff] }
 0x153   : > { %5026 = vmatprep.subr.bf16.mxu0 %v5025_v7  ;;  %v5045_v7 = vpack.c.bf16 %v1346_v0, %v1344_v63  ;;  %v1366_v60 = vld [vmem:[%s6329_s26 + $0x1f38] sm:$0xff]  ;;  %v4297_v63 = vpack.c.bf16 %v598_v58, %v596_v57  ;;  %v595_v0 = vld [vmem:[%s6329_s26 + $0x720] sm:$0xff] }
 0x155   : > { %4260 = vmatpush1.bf16.msra.mxu1 %v4259_v13  ;;  %v4279_v13 = vpack.c.bf16 %v577_v5, %v575_v4  ;;  %v1365_v4 = vld [vmem:[%s6329_s26 + $0x1f30] sm:$0xff]  ;;  %v600_v5 = vld [vmem:[%s6329_s26 + $0x748] sm:$0xff] }
 0x156   : > { %5028 = vmatpush1.bf16.msra.mxu0 %v5027_v14  ;;  %4262 = vmatprep.subr.bf16.mxu1 %v4261_v15  ;;  %v5047_v14 = vpack.c.bf16 %v1345_v8, %v1343_v6  ;;  %v4281_v15 = vpack.c.bf16 %v582_v10, %v580_v9  ;;  %v602_v6 = vld [vmem:[%s6329_s26 + $0x758] sm:$0xff] }
 0x157   : > { %5030 = vmatprep.subr.bf16.mxu0 %v5029_v19  ;;  %v5049_v19 = vpack.c.bf16 %v1350_v12, %v1348_v11  ;;  %v1370_v8 = vld [vmem:[%s6329_s26 + $0x1f58] sm:$0xff]  ;;  %v4301_v11 = vpack.c.bf16 %v602_v6, %v600_v5  ;;  %v599_v12 = vld [vmem:[%s6329_s26 + $0x740] sm:$0xff] }
 0x158   : > { %2176 = vmatmul.mubr.f32.vlgmr.msra.gmra.mrb[0].mxu1 %v321_v25  ;;  %v4283_v25 = vpack.c.bf16 %v581_v17, %v579_v16  ;;  %v1369_v16 = vld [vmem:[%s6329_s26 + $0x1f50] sm:$0xff]  ;;  %v604_v17 = vld [vmem:[%s6329_s26 + $0x768] sm:$0xff] }
 0x159   : > { %4264 = vmatpush1.bf16.msra.mxu1 %v4263_v26  ;;  %3028 = vmatmul.mubr.f32.vlgmr.msra.gmra.mrb[0].mxu0 %v345_v27  ;;  %v5051_v26 = vpack.c.bf16 %v1349_v20, %v1347_v18  ;;  %v4285_v27 = vpack.c.bf16 %v586_v22, %v584_v21  ;;  %v606_v18 = vld [vmem:[%s6329_s26 + $0x778] sm:$0xff] }
 0x15a   : > { %5032 = vmatpush1.bf16.msra.mxu0 %v5031_v28  ;;  %4266 = vmatprep.subr.bf16.mxu1 %v4265_v29  ;;  %v583_v28 = vld [vmem:[%s6329_s26 + $0x6c0] sm:$0xff]  ;;  %v585_v29 = vld [vmem:[%s6329_s26 + $0x6d0] sm:$0xff]  ;;  %v1374_v20 = vld [vmem:[%s6329_s26 + $0x1f78] sm:$0xff]  ;;  %v4305_v23 = vpack.c.bf16 %v606_v18, %v604_v17 }
 0x15b   : > { %5034 = vmatprep.subr.bf16.mxu0 %v5033_v33  ;;  %2246 = vmatprep.mubr.f32.mxu1 %v324_v39  ;;  %v588_v33 = vld [vmem:[%s6329_s26 + $0x6e8] sm:$0xff]  ;;  %v4287_v37 = vpack.c.bf16 %v585_v29, %v583_v28  ;;  %v1373_v28 = vld [vmem:[%s6329_s26 + $0x1f70] sm:$0xff] }
 0x15c   : > { %3098 = vmatprep.mubr.f32.mxu0 %v348_v41  ;;  %v4289_v39 = vpack.c.bf16 %v590_v34, %v588_v33  ;;  %v589_v41 = vld [vmem:[%s6329_s26 + $0x6f0] sm:$0xff]  ;;  %v608_v29 = vld [vmem:[%s6329_s26 + $0x788] sm:$0xff] }
 0x15d   : > { %4268 = vmatpush1.bf16.msra.mxu1 %v4267_v40  ;;  %v587_v40 = vld [vmem:[%s6329_s26 + $0x6e0] sm:$0xff] }
 0x15e   : > { %5036 = vmatpush1.bf16.msra.mxu0 %v5035_v42  ;;  %4270 = vmatprep.subr.bf16.mxu1 %v4269_v43  ;;  %v1355_v42 = vld [vmem:[%s6329_s26 + $0x1ee0] sm:$0xff]  ;;  %v5057_v43 = vpack.c.bf16 %v1358_v36, %v1356_v35  ;;  %v4291_v49 = vpack.c.bf16 %v589_v41, %v587_v40  ;;  %v4309_v35 = vpack.c.bf16 %v610_v30, %v608_v29  ;;  %v1377_v40 = vld [vmem:[%s6329_s26 + $0x1f90] sm:$0xff]  ;;  %v612_v41 = vld [vmem:[%s6329_s26 + $0x7a8] sm:$0xff] }
 0x15f   : > { %5038 = vmatprep.subr.bf16.mxu0 %v5037_v47  ;;  %v1360_v47 = vld [vmem:[%s6329_s26 + $0x1f08] sm:$0xff]  ;;  %v5059_v50 = vpack.c.bf16 %v1357_v44, %v1355_v42  ;;  %v607_v36 = vld [vmem:[%s6329_s26 + $0x780] sm:$0xff]  ;;  %v614_v42 = vld [vmem:[%s6329_s26 + $0x7b8] sm:$0xff] }
 0x160   : > { %v1382_v44 = vld [vmem:[%s6329_s26 + $0x1fb8] sm:$0xff]  ;;  %v323_v29 = vld [vmem:[%s6459_s27 + $0x30] sm:$0xff] }
 0x161   : > { %4272 = vmatpush1.bf16.msra.mxu1 %v4271_v53  ;;  %v593_v53 = vld [vmem:[%s6329_s26 + $0x710] sm:$0xff] }
 0x162   : > { %5040 = vmatpush1.bf16.msra.mxu0 %v5039_v54  ;;  %4274 = vmatprep.subr.bf16.mxu1 %v4273_v55  ;;  %v1359_v54 = vld [vmem:[%s6329_s26 + $0x1f00] sm:$0xff]  ;;  %v5061_v55 = vpack.c.bf16 %v1362_v48, %v1360_v47  ;;  %v4295_v61 = vpack.c.bf16 %v593_v53, %v591_v52  ;;  %v4313_v47 = vpack.c.bf16 %v614_v42, %v612_v41  ;;  %v1381_v52 = vld [vmem:[%s6329_s26 + $0x1fb0] sm:$0xff]  ;;  %v616_v53 = vld [vmem:[%s6329_s26 + $0x7c8] sm:$0xff] }
 0x163   : > { %5042 = vmatprep.subr.bf16.mxu0 %v5041_v59  ;;  %v1364_v59 = vld [vmem:[%s6329_s26 + $0x1f28] sm:$0xff]  ;;  %v5063_v62 = vpack.c.bf16 %v1361_v56, %v1359_v54  ;;  %v611_v48 = vld [vmem:[%s6329_s26 + $0x7a0] sm:$0xff]  ;;  %v618_v54 = vld [vmem:[%s6329_s26 + $0x7d8] sm:$0xff] }
 0x164   : > { %v1386_v56 = vld [vmem:[%s6329_s26 + $0x1fd8] sm:$0xff]  ;;  %v1400_v41 = vld [vmem:[%s6329_s26 + $0x2048] sm:$0xff] }
 0x165   : > { %4276 = vmatpush1.bf16.msra.mxu1 %v4275_v1  ;;  %v597_v1 = vld [vmem:[%s6329_s26 + $0x730] sm:$0xff]  ;;  %v1402_v42 = vld [vmem:[%s6329_s26 + $0x2058] sm:$0xff] }
 0x166   : > { %5044 = vmatpush1.bf16.msra.mxu0 %v5043_v2  ;;  %4278 = vmatprep.subr.bf16.mxu1 %v4277_v3  ;;  %v1363_v2 = vld [vmem:[%s6329_s26 + $0x1f20] sm:$0xff]  ;;  %v5065_v3 = vpack.c.bf16 %v1366_v60, %v1364_v59  ;;  %v4299_v9 = vpack.c.bf16 %v597_v1, %v595_v0  ;;  %v4317_v59 = vpack.c.bf16 %v618_v54, %v616_v53  ;;  %v1385_v0 = vld [vmem:[%s6329_s26 + $0x1fd0] sm:$0xff]  ;;  %v620_v1 = vld [vmem:[%s6329_s26 + $0x7e8] sm:$0xff] }
 0x167   : > { %5046 = vmatprep.subr.bf16.mxu0 %v5045_v7  ;;  %v1368_v7 = vld [vmem:[%s6329_s26 + $0x1f48] sm:$0xff]  ;;  %v5067_v10 = vpack.c.bf16 %v1365_v4, %v1363_v2  ;;  %v615_v60 = vld [vmem:[%s6329_s26 + $0x7c0] sm:$0xff]  ;;  %v622_v2 = vld [vmem:[%s6329_s26 + $0x7f8] sm:$0xff] }
 0x168   : > { %v1390_v4 = vld [vmem:[%s6329_s26 + $0x1ff8] sm:$0xff]  ;;  %v636_v53 = vld [vmem:[%s6329_s26 + $0x868] sm:$0xff] }
 0x169   : > { %4280 = vmatpush1.bf16.msra.mxu1 %v4279_v13  ;;  %v601_v13 = vld [vmem:[%s6329_s26 + $0x750] sm:$0xff]  ;;  %v638_v54 = vld [vmem:[%s6329_s26 + $0x878] sm:$0xff] }
 0x16a   : > { %5048 = vmatpush1.bf16.msra.mxu0 %v5047_v14  ;;  %4282 = vmatprep.subr.bf16.mxu1 %v4281_v15  ;;  %v1367_v14 = vld [vmem:[%s6329_s26 + $0x1f40] sm:$0xff]  ;;  %v5069_v15 = vpack.c.bf16 %v1370_v8, %v1368_v7  ;;  %v4303_v21 = vpack.c.bf16 %v601_v13, %v599_v12  ;;  %v4321_v7 = vpack.c.bf16 %v622_v2, %v620_v1  ;;  %v1389_v12 = vld [vmem:[%s6329_s26 + $0x1ff0] sm:$0xff]  ;;  %v624_v13 = vld [vmem:[%s6329_s26 + $0x808] sm:$0xff] }
 0x16b   : > { %5050 = vmatprep.subr.bf16.mxu0 %v5049_v19  ;;  %v1372_v19 = vld [vmem:[%s6329_s26 + $0x1f68] sm:$0xff]  ;;  %v5071_v22 = vpack.c.bf16 %v1369_v16, %v1367_v14  ;;  %v619_v8 = vld [vmem:[%s6329_s26 + $0x7e0] sm:$0xff]  ;;  %v626_v14 = vld [vmem:[%s6329_s26 + $0x818] sm:$0xff] }
 0x16c   : > { %v1394_v16 = vld [vmem:[%s6329_s26 + $0x2018] sm:$0xff]  ;;  %v640_v1 = vld [vmem:[%s6329_s26 + $0x888] sm:$0xff] }
 0x16d   : > { %4284 = vmatpush1.bf16.msra.mxu1 %v4283_v25  ;;  %v605_v25 = vld [vmem:[%s6329_s26 + $0x770] sm:$0xff]  ;;  %v642_v2 = vld [vmem:[%s6329_s26 + $0x898] sm:$0xff] }
 0x16e   : > { %5052 = vmatpush1.bf16.msra.mxu0 %v5051_v26  ;;  %4286 = vmatprep.subr.bf16.mxu1 %v4285_v27  ;;  %v1371_v26 = vld [vmem:[%s6329_s26 + $0x1f60] sm:$0xff]  ;;  %v5073_v27 = vpack.c.bf16 %v1374_v20, %v1372_v19  ;;  %v4307_v33 = vpack.c.bf16 %v605_v25, %v603_v24  ;;  %v4325_v19 = vpack.c.bf16 %v626_v14, %v624_v13  ;;  %v1393_v24 = vld [vmem:[%s6329_s26 + $0x2010] sm:$0xff]  ;;  %v628_v25 = vld [vmem:[%s6329_s26 + $0x828] sm:$0xff] }
 0x16f   : > { %5054 = vmatprep.subr.bf16.mxu0 %v5053_v31  ;;  %v1376_v31 = vld [vmem:[%s6329_s26 + $0x1f88] sm:$0xff]  ;;  %v5075_v34 = vpack.c.bf16 %v1373_v28, %v1371_v26  ;;  %v623_v20 = vld [vmem:[%s6329_s26 + $0x800] sm:$0xff]  ;;  %v630_v26 = vld [vmem:[%s6329_s26 + $0x838] sm:$0xff] }
 0x170   : > { %v1398_v28 = vld [vmem:[%s6329_s26 + $0x2038] sm:$0xff]  ;;  %v644_v13 = vld [vmem:[%s6329_s26 + $0x8a8] sm:$0xff] }
 0x171   : > { %4288 = vmatpush1.bf16.msra.mxu1 %v4287_v37  ;;  %v609_v37 = vld [vmem:[%s6329_s26 + $0x790] sm:$0xff]  ;;  %v646_v14 = vld [vmem:[%s6329_s26 + $0x8b8] sm:$0xff] }
 0x172   : > { %5056 = vmatpush1.bf16.msra.mxu0 %v5055_v38  ;;  %4290 = vmatprep.subr.bf16.mxu1 %v4289_v39  ;;  %v1375_v38 = vld [vmem:[%s6329_s26 + $0x1f80] sm:$0xff]  ;;  %v5077_v39 = vpack.c.bf16 %v1378_v32, %v1376_v31  ;;  %v4311_v45 = vpack.c.bf16 %v609_v37, %v607_v36 }
 0x173   : > { %5058 = vmatprep.subr.bf16.mxu0 %v5057_v43  ;;  %v1380_v43 = vld [vmem:[%s6329_s26 + $0x1fa8] sm:$0xff]  ;;  %v5079_v46 = vpack.c.bf16 %v1377_v40, %v1375_v38  ;;  %v347_v31 = vld [vmem:[%s6459_s27 + $0xf0] sm:$0xff]  ;;  %v1397_v38 = vld [vmem:[%s6329_s26 + $0x2030] sm:$0xff] }
 0x174   : > { %v1395_v36 = vld [vmem:[%s6329_s26 + $0x2020] sm:$0xff]  ;;  %v634_v40 = vld [vmem:[%s6329_s26 + $0x858] sm:$0xff] }
 0x175   : > { %4292 = vmatpush1.bf16.msra.mxu1 %v4291_v49  ;;  %v613_v49 = vld [vmem:[%s6329_s26 + $0x7b0] sm:$0xff] }
 0x176   : > { %5060 = vmatpush1.bf16.msra.mxu0 %v5059_v50  ;;  %4294 = vmatprep.subr.bf16.mxu1 %v4293_v51  ;;  %v1379_v50 = vld [vmem:[%s6329_s26 + $0x1fa0] sm:$0xff]  ;;  %v5081_v51 = vpack.c.bf16 %v1382_v44, %v1380_v43  ;;  %v4315_v57 = vpack.c.bf16 %v613_v49, %v611_v48  ;;  %v326_v43 = vld [vmem:[%s6459_s27 + $0x48] sm:$0xff]  ;;  %v633_v49 = vld [vmem:[%s6329_s26 + $0x850] sm:$0xff] }
 0x177   : > { %5062 = vmatprep.subr.bf16.mxu0 %v5061_v55  ;;  %v1384_v55 = vld [vmem:[%s6329_s26 + $0x1fc8] sm:$0xff]  ;;  %v5083_v58 = vpack.c.bf16 %v1381_v52, %v1379_v50  ;;  %v631_v48 = vld [vmem:[%s6329_s26 + $0x840] sm:$0xff]  ;;  %v1401_v52 = vld [vmem:[%s6329_s26 + $0x2050] sm:$0xff] }
 0x178   : > { %v1399_v50 = vld [vmem:[%s6329_s26 + $0x2040] sm:$0xff] }
 0x179   : > { %4296 = vmatpush1.bf16.msra.mxu1 %v4295_v61  ;;  %v617_v61 = vld [vmem:[%s6329_s26 + $0x7d0] sm:$0xff] }
 0x17a   : > { %5064 = vmatpush1.bf16.msra.mxu0 %v5063_v62  ;;  %4298 = vmatprep.subr.bf16.mxu1 %v4297_v63  ;;  %v1383_v62 = vld [vmem:[%s6329_s26 + $0x1fc0] sm:$0xff]  ;;  %v5085_v63 = vpack.c.bf16 %v1386_v56, %v1384_v55  ;;  %v4319_v5 = vpack.c.bf16 %v617_v61, %v615_v60  ;;  %v1404_v55 = vld [vmem:[%s6329_s26 + $0x2068] sm:$0xff]  ;;  %v1406_v56 = vld [vmem:[%s6329_s26 + $0x2078] sm:$0xff] }
 0x17b   : > { %5066 = vmatprep.subr.bf16.mxu0 %v5065_v3  ;;  %v1388_v3 = vld [vmem:[%s6329_s26 + $0x1fe8] sm:$0xff]  ;;  %v5087_v6 = vpack.c.bf16 %v1385_v0, %v1383_v62  ;;  %v635_v60 = vld [vmem:[%s6329_s26 + $0x860] sm:$0xff]  ;;  %v637_v61 = vld [vmem:[%s6329_s26 + $0x870] sm:$0xff] }
 0x17c   : > { %v1403_v62 = vld [vmem:[%s6329_s26 + $0x2060] sm:$0xff]  ;;  %v1405_v0 = vld [vmem:[%s6329_s26 + $0x2070] sm:$0xff] }
 0x17d   : > { %4300 = vmatpush1.bf16.msra.mxu1 %v4299_v9  ;;  %v621_v9 = vld [vmem:[%s6329_s26 + $0x7f0] sm:$0xff] }
 0x17e   : > { %5068 = vmatpush1.bf16.msra.mxu0 %v5067_v10  ;;  %4302 = vmatprep.subr.bf16.mxu1 %v4301_v11  ;;  %v1387_v10 = vld [vmem:[%s6329_s26 + $0x1fe0] sm:$0xff]  ;;  %v5089_v11 = vpack.c.bf16 %v1390_v4, %v1388_v3  ;;  %v4323_v17 = vpack.c.bf16 %v621_v9, %v619_v8  ;;  %v1408_v3 = vld [vmem:[%s6329_s26 + $0x2088] sm:$0xff]  ;;  %v1410_v4 = vld [vmem:[%s6329_s26 + $0x2098] sm:$0xff] }
 0x17f   : > { %5070 = vmatprep.subr.bf16.mxu0 %v5069_v15  ;;  %v1392_v15 = vld [vmem:[%s6329_s26 + $0x2008] sm:$0xff]  ;;  %v5091_v18 = vpack.c.bf16 %v1389_v12, %v1387_v10  ;;  %v639_v8 = vld [vmem:[%s6329_s26 + $0x880] sm:$0xff]  ;;  %v641_v9 = vld [vmem:[%s6329_s26 + $0x890] sm:$0xff] }
 0x180   : > { %v1407_v10 = vld [vmem:[%s6329_s26 + $0x2080] sm:$0xff]  ;;  %v1409_v12 = vld [vmem:[%s6329_s26 + $0x2090] sm:$0xff] }
 0x181   : > { %4304 = vmatpush1.bf16.msra.mxu1 %v4303_v21  ;;  %v625_v21 = vld [vmem:[%s6329_s26 + $0x810] sm:$0xff] }
 0x182   : > { %5072 = vmatpush1.bf16.msra.mxu0 %v5071_v22  ;;  %4306 = vmatprep.subr.bf16.mxu1 %v4305_v23  ;;  %v1391_v22 = vld [vmem:[%s6329_s26 + $0x2000] sm:$0xff]  ;;  %v5093_v23 = vpack.c.bf16 %v1394_v16, %v1392_v15  ;;  %v4327_v30 = vpack.c.bf16 %v625_v21, %v623_v20  ;;  %v1412_v15 = vld [vmem:[%s6329_s26 + $0x20a8] sm:$0xff]  ;;  %v1414_v16 = vld [vmem:[%s6329_s26 + $0x20b8] sm:$0xff] }
 0x183   : > { %5074 = vmatprep.subr.bf16.mxu0 %v5073_v27  ;;  %v1396_v27 = vld [vmem:[%s6329_s26 + $0x2028] sm:$0xff]  ;;  %v5095_v32 = vpack.c.bf16 %v1393_v24, %v1391_v22  ;;  %v643_v20 = vld [vmem:[%s6329_s26 + $0x8a0] sm:$0xff]  ;;  %v645_v21 = vld [vmem:[%s6329_s26 + $0x8b0] sm:$0xff] }
 0x184   : > { %v5097_v37 = vpack.c.bf16 %v1398_v28, %v1396_v27  ;;  %v1411_v22 = vld [vmem:[%s6329_s26 + $0x20a0] sm:$0xff]  ;;  %v1413_v24 = vld [vmem:[%s6329_s26 + $0x20b0] sm:$0xff]  ;;  %v1416_v27 = vld [vmem:[%s6329_s26 + $0x20c8] sm:$0xff] }
 0x185   : > { %4308 = vmatpush1.bf16.msra.mxu1 %v4307_v33  ;;  %v4329_v33 = vpack.c.bf16 %v630_v26, %v628_v25  ;;  %v648_v25 = vld [vmem:[%s6329_s26 + $0x8c8] sm:$0xff]  ;;  %v650_v26 = vld [vmem:[%s6329_s26 + $0x8d8] sm:$0xff] }
 0x186   : > { %5076 = vmatpush1.bf16.msra.mxu0 %v5075_v34  ;;  %4310 = vmatprep.subr.bf16.mxu1 %v4309_v35  ;;  %v627_v34 = vld [vmem:[%s6329_s26 + $0x820] sm:$0xff]  ;;  %v629_v35 = vld [vmem:[%s6329_s26 + $0x830] sm:$0xff]  ;;  %v1418_v28 = vld [vmem:[%s6329_s26 + $0x20d8] sm:$0xff] }
 0x187   : > { %5078 = vmatprep.subr.bf16.mxu0 %v5077_v39  ;;  %v632_v39 = vld [vmem:[%s6329_s26 + $0x848] sm:$0xff]  ;;  %v4331_v44 = vpack.c.bf16 %v629_v35, %v627_v34  ;;  %v1415_v34 = vld [vmem:[%s6329_s26 + $0x20c0] sm:$0xff]  ;;  %v5117_v35 = vpack.c.bf16 %v1418_v28, %v1416_v27 }
 0x188   : > { %v667_v28 = vld [vmem:[%s6329_s26 + $0x960] sm:$0xff] }
 0x189   : > { %4312 = vmatpush1.bf16.msra.mxu1 %v4311_v45  ;;  %v350_v45 = vld [vmem:[%s6459_s27 + $0x108] sm:$0xff] }
 0x18a   : > { %5080 = vmatpush1.bf16.msra.mxu0 %v5079_v46  ;;  %4314 = vmatprep.subr.bf16.mxu1 %v4313_v47  ;;  %v5099_v46 = vpack.c.bf16 %v1397_v38, %v1395_v36  ;;  %v4333_v47 = vpack.c.bf16 %v634_v40, %v632_v39  ;;  %v1417_v36 = vld [vmem:[%s6329_s26 + $0x20d0] sm:$0xff]  ;;  %v654_v38 = vld [vmem:[%s6329_s26 + $0x8f8] sm:$0xff]  ;;  %v1420_v39 = vld [vmem:[%s6329_s26 + $0x20e8] sm:$0xff] }
 0x18b   : > { %5082 = vmatprep.subr.bf16.mxu0 %v5081_v51  ;;  %v5101_v51 = vpack.c.bf16 %v1402_v42, %v1400_v41  ;;  %v1422_v40 = vld [vmem:[%s6329_s26 + $0x20f8] sm:$0xff]  ;;  %v5119_v42 = vpack.c.bf16 %v1417_v36, %v1415_v34 }
 0x18c   : > { %v674_v34 = vld [vmem:[%s6329_s26 + $0x998] sm:$0xff] }
 0x18d   : > { %4316 = vmatpush1.bf16.msra.mxu1 %v4315_v57  ;;  %v4335_v57 = vpack.c.bf16 %v633_v49, %v631_v48  ;;  %v1421_v48 = vld [vmem:[%s6329_s26 + $0x20f0] sm:$0xff]  ;;  %v656_v49 = vld [vmem:[%s6329_s26 + $0x908] sm:$0xff]  ;;  %v1442_v36 = vld [vmem:[%s6329_s26 + $0x2198] sm:$0xff] }
 0x18e   : > { %5084 = vmatpush1.bf16.msra.mxu0 %v5083_v58  ;;  %4318 = vmatprep.subr.bf16.mxu1 %v4317_v59  ;;  %v5103_v58 = vpack.c.bf16 %v1401_v52, %v1399_v50  ;;  %v4337_v59 = vpack.c.bf16 %v638_v54, %v636_v53  ;;  %v658_v50 = vld [vmem:[%s6329_s26 + $0x918] sm:$0xff] }
 0x18f   : > { %5086 = vmatprep.subr.bf16.mxu0 %v5085_v63  ;;  %v5105_v63 = vpack.c.bf16 %v1406_v56, %v1404_v55  ;;  %v1426_v52 = vld [vmem:[%s6329_s26 + $0x2118] sm:$0xff]  ;;  %v4357_v55 = vpack.c.bf16 %v658_v50, %v656_v49  ;;  %v655_v56 = vld [vmem:[%s6329_s26 + $0x900] sm:$0xff] }
 0x191   : > { %4320 = vmatpush1.bf16.msra.mxu1 %v4319_v5  ;;  %v4339_v5 = vpack.c.bf16 %v637_v61, %v635_v60  ;;  %v1425_v60 = vld [vmem:[%s6329_s26 + $0x2110] sm:$0xff]  ;;  %v660_v61 = vld [vmem:[%s6329_s26 + $0x928] sm:$0xff] }
 0x192   : > { %5088 = vmatpush1.bf16.msra.mxu0 %v5087_v6  ;;  %4322 = vmatprep.subr.bf16.mxu1 %v4321_v7  ;;  %v5107_v6 = vpack.c.bf16 %v1405_v0, %v1403_v62  ;;  %v4341_v7 = vpack.c.bf16 %v642_v2, %v640_v1  ;;  %v662_v62 = vld [vmem:[%s6329_s26 + $0x938] sm:$0xff] }
 0x193   : > { %5090 = vmatprep.subr.bf16.mxu0 %v5089_v11  ;;  %v5109_v11 = vpack.c.bf16 %v1410_v4, %v1408_v3  ;;  %v1430_v0 = vld [vmem:[%s6329_s26 + $0x2138] sm:$0xff]  ;;  %v4361_v3 = vpack.c.bf16 %v662_v62, %v660_v61  ;;  %v659_v4 = vld [vmem:[%s6329_s26 + $0x920] sm:$0xff] }
 0x195   : > { %4324 = vmatpush1.bf16.msra.mxu1 %v4323_v17  ;;  %v4343_v17 = vpack.c.bf16 %v641_v9, %v639_v8  ;;  %v1429_v8 = vld [vmem:[%s6329_s26 + $0x2130] sm:$0xff]  ;;  %v664_v9 = vld [vmem:[%s6329_s26 + $0x948] sm:$0xff] }
 0x196   : > { %5092 = vmatpush1.bf16.msra.mxu0 %v5091_v18  ;;  %4326 = vmatprep.subr.bf16.mxu1 %v4325_v19  ;;  %v5111_v18 = vpack.c.bf16 %v1409_v12, %v1407_v10  ;;  %v4345_v19 = vpack.c.bf16 %v646_v14, %v644_v13  ;;  %v666_v10 = vld [vmem:[%s6329_s26 + $0x958] sm:$0xff] }
 0x197   : > { %5094 = vmatprep.subr.bf16.mxu0 %v5093_v23  ;;  %v5113_v23 = vpack.c.bf16 %v1414_v16, %v1412_v15  ;;  %v1434_v12 = vld [vmem:[%s6329_s26 + $0x2158] sm:$0xff]  ;;  %v4365_v15 = vpack.c.bf16 %v666_v10, %v664_v9  ;;  %v663_v16 = vld [vmem:[%s6329_s26 + $0x940] sm:$0xff] }
 0x198   : > { %2247 = vmatmul.mubr.f32.vlgmr.msra.gmra.mrb[0].mxu1 %v323_v29  ;;  %v4347_v29 = vpack.c.bf16 %v645_v21, %v643_v20  ;;  %v1433_v20 = vld [vmem:[%s6329_s26 + $0x2150] sm:$0xff]  ;;  %v668_v21 = vld [vmem:[%s6329_s26 + $0x968] sm:$0xff] }
 0x199   : > { %4328 = vmatpush1.bf16.msra.mxu1 %v4327_v30  ;;  %3099 = vmatmul.mubr.f32.vlgmr.msra.gmra.mrb[0].mxu0 %v347_v31  ;;  %v5115_v30 = vpack.c.bf16 %v1413_v24, %v1411_v22  ;;  %v4349_v31 = vpack.c.bf16 %v650_v26, %v648_v25  ;;  %v670_v22 = vld [vmem:[%s6329_s26 + $0x978] sm:$0xff] }
 0x19a   : > { %5096 = vmatpush1.bf16.msra.mxu0 %v5095_v32  ;;  %4330 = vmatprep.subr.bf16.mxu1 %v4329_v33  ;;  %v647_v32 = vld [vmem:[%s6329_s26 + $0x8c0] sm:$0xff]  ;;  %v649_v33 = vld [vmem:[%s6329_s26 + $0x8d0] sm:$0xff]  ;;  %v1438_v24 = vld [vmem:[%s6329_s26 + $0x2178] sm:$0xff]  ;;  %v4369_v27 = vpack.c.bf16 %v670_v22, %v668_v21 }
 0x19b   : > { %5098 = vmatprep.subr.bf16.mxu0 %v5097_v37  ;;  %2317 = vmatprep.mubr.f32.mxu1 %v326_v43  ;;  %v652_v37 = vld [vmem:[%s6329_s26 + $0x8e8] sm:$0xff]  ;;  %v4351_v41 = vpack.c.bf16 %v649_v33, %v647_v32  ;;  %v1437_v32 = vld [vmem:[%s6329_s26 + $0x2170] sm:$0xff] }
 0x19c   : > { %3169 = vmatprep.mubr.f32.mxu0 %v350_v45  ;;  %v4353_v43 = vpack.c.bf16 %v654_v38, %v652_v37  ;;  %v653_v45 = vld [vmem:[%s6329_s26 + $0x8f0] sm:$0xff]  ;;  %v672_v33 = vld [vmem:[%s6329_s26 + $0x988] sm:$0xff] }
 0x19d   : > { %4332 = vmatpush1.bf16.msra.mxu1 %v4331_v44  ;;  %v651_v44 = vld [vmem:[%s6329_s26 + $0x8e0] sm:$0xff] }
 0x19e   : > { %5100 = vmatpush1.bf16.msra.mxu0 %v5099_v46  ;;  %4334 = vmatprep.subr.bf16.mxu1 %v4333_v47  ;;  %v1419_v46 = vld [vmem:[%s6329_s26 + $0x20e0] sm:$0xff]  ;;  %v5121_v47 = vpack.c.bf16 %v1422_v40, %v1420_v39  ;;  %v4355_v53 = vpack.c.bf16 %v653_v45, %v651_v44  ;;  %v4373_v39 = vpack.c.bf16 %v674_v34, %v672_v33  ;;  %v1441_v44 = vld [vmem:[%s6329_s26 + $0x2190] sm:$0xff]  ;;  %v676_v45 = vld [vmem:[%s6329_s26 + $0x9a8] sm:$0xff] }
 0x19f   : > { %5102 = vmatprep.subr.bf16.mxu0 %v5101_v51  ;;  %v1424_v51 = vld [vmem:[%s6329_s26 + $0x2108] sm:$0xff]  ;;  %v5123_v54 = vpack.c.bf16 %v1421_v48, %v1419_v46  ;;  %v671_v40 = vld [vmem:[%s6329_s26 + $0x980] sm:$0xff]  ;;  %v678_v46 = vld [vmem:[%s6329_s26 + $0x9b8] sm:$0xff] }
 0x1a0   : > { %v1446_v48 = vld [vmem:[%s6329_s26 + $0x21b8] sm:$0xff]  ;;  %v325_v33 = vld [vmem:[%s6459_s27 + $0x40] sm:$0xff] }
 0x1a1   : > { %4336 = vmatpush1.bf16.msra.mxu1 %v4335_v57  ;;  %v657_v57 = vld [vmem:[%s6329_s26 + $0x910] sm:$0xff] }
 0x1a2   : > { %5104 = vmatpush1.bf16.msra.mxu0 %v5103_v58  ;;  %4338 = vmatprep.subr.bf16.mxu1 %v4337_v59  ;;  %v1423_v58 = vld [vmem:[%s6329_s26 + $0x2100] sm:$0xff]  ;;  %v5125_v59 = vpack.c.bf16 %v1426_v52, %v1424_v51  ;;  %v4359_v1 = vpack.c.bf16 %v657_v57, %v655_v56  ;;  %v4377_v51 = vpack.c.bf16 %v678_v46, %v676_v45  ;;  %v1445_v56 = vld [vmem:[%s6329_s26 + $0x21b0] sm:$0xff]  ;;  %v680_v57 = vld [vmem:[%s6329_s26 + $0x9c8] sm:$0xff] }
 0x1a3   : > { %5106 = vmatprep.subr.bf16.mxu0 %v5105_v63  ;;  %v1428_v63 = vld [vmem:[%s6329_s26 + $0x2128] sm:$0xff]  ;;  %v5127_v2 = vpack.c.bf16 %v1425_v60, %v1423_v58  ;;  %v675_v52 = vld [vmem:[%s6329_s26 + $0x9a0] sm:$0xff]  ;;  %v682_v58 = vld [vmem:[%s6329_s26 + $0x9d8] sm:$0xff] }
 0x1a4   : > { %v1450_v60 = vld [vmem:[%s6329_s26 + $0x21d8] sm:$0xff]  ;;  %v1464_v45 = vld [vmem:[%s6329_s26 + $0x2248] sm:$0xff] }
 0x1a5   : > { %4340 = vmatpush1.bf16.msra.mxu1 %v4339_v5  ;;  %v661_v5 = vld [vmem:[%s6329_s26 + $0x930] sm:$0xff]  ;;  %v1466_v46 = vld [vmem:[%s6329_s26 + $0x2258] sm:$0xff] }
 0x1a6   : > { %5108 = vmatpush1.bf16.msra.mxu0 %v5107_v6  ;;  %4342 = vmatprep.subr.bf16.mxu1 %v4341_v7  ;;  %v1427_v6 = vld [vmem:[%s6329_s26 + $0x2120] sm:$0xff]  ;;  %v5129_v7 = vpack.c.bf16 %v1430_v0, %v1428_v63  ;;  %v4363_v13 = vpack.c.bf16 %v661_v5, %v659_v4  ;;  %v4381_v63 = vpack.c.bf16 %v682_v58, %v680_v57  ;;  %v1449_v4 = vld [vmem:[%s6329_s26 + $0x21d0] sm:$0xff]  ;;  %v684_v5 = vld [vmem:[%s6329_s26 + $0x9e8] sm:$0xff] }
 0x1a7   : > { %5110 = vmatprep.subr.bf16.mxu0 %v5109_v11  ;;  %v1432_v11 = vld [vmem:[%s6329_s26 + $0x2148] sm:$0xff]  ;;  %v5131_v14 = vpack.c.bf16 %v1429_v8, %v1427_v6  ;;  %v679_v0 = vld [vmem:[%s6329_s26 + $0x9c0] sm:$0xff]  ;;  %v686_v6 = vld [vmem:[%s6329_s26 + $0x9f8] sm:$0xff] }
 0x1a8   : > { %v1454_v8 = vld [vmem:[%s6329_s26 + $0x21f8] sm:$0xff]  ;;  %v700_v57 = vld [vmem:[%s6329_s26 + $0xa68] sm:$0xff] }
 0x1a9   : > { %4344 = vmatpush1.bf16.msra.mxu1 %v4343_v17  ;;  %v665_v17 = vld [vmem:[%s6329_s26 + $0x950] sm:$0xff]  ;;  %v702_v58 = vld [vmem:[%s6329_s26 + $0xa78] sm:$0xff] }
 0x1aa   : > { %5112 = vmatpush1.bf16.msra.mxu0 %v5111_v18  ;;  %4346 = vmatprep.subr.bf16.mxu1 %v4345_v19  ;;  %v1431_v18 = vld [vmem:[%s6329_s26 + $0x2140] sm:$0xff]  ;;  %v5133_v19 = vpack.c.bf16 %v1434_v12, %v1432_v11  ;;  %v4367_v25 = vpack.c.bf16 %v665_v17, %v663_v16  ;;  %v4385_v11 = vpack.c.bf16 %v686_v6, %v684_v5  ;;  %v1453_v16 = vld [vmem:[%s6329_s26 + $0x21f0] sm:$0xff]  ;;  %v688_v17 = vld [vmem:[%s6329_s26 + $0xa08] sm:$0xff] }
 0x1ab   : > { %5114 = vmatprep.subr.bf16.mxu0 %v5113_v23  ;;  %v1436_v23 = vld [vmem:[%s6329_s26 + $0x2168] sm:$0xff]  ;;  %v5135_v26 = vpack.c.bf16 %v1433_v20, %v1431_v18  ;;  %v683_v12 = vld [vmem:[%s6329_s26 + $0x9e0] sm:$0xff]  ;;  %v690_v18 = vld [vmem:[%s6329_s26 + $0xa18] sm:$0xff] }
 0x1ac   : > { %v1458_v20 = vld [vmem:[%s6329_s26 + $0x2218] sm:$0xff]  ;;  %v704_v5 = vld [vmem:[%s6329_s26 + $0xa88] sm:$0xff] }
 0x1ad   : > { %4348 = vmatpush1.bf16.msra.mxu1 %v4347_v29  ;;  %v669_v29 = vld [vmem:[%s6329_s26 + $0x970] sm:$0xff]  ;;  %v706_v6 = vld [vmem:[%s6329_s26 + $0xa98] sm:$0xff] }
 0x1ae   : > { %5116 = vmatpush1.bf16.msra.mxu0 %v5115_v30  ;;  %4350 = vmatprep.subr.bf16.mxu1 %v4349_v31  ;;  %v1435_v30 = vld [vmem:[%s6329_s26 + $0x2160] sm:$0xff]  ;;  %v5137_v31 = vpack.c.bf16 %v1438_v24, %v1436_v23  ;;  %v4371_v37 = vpack.c.bf16 %v669_v29, %v667_v28  ;;  %v4389_v23 = vpack.c.bf16 %v690_v18, %v688_v17  ;;  %v1457_v28 = vld [vmem:[%s6329_s26 + $0x2210] sm:$0xff]  ;;  %v692_v29 = vld [vmem:[%s6329_s26 + $0xa28] sm:$0xff] }
 0x1af   : > { %5118 = vmatprep.subr.bf16.mxu0 %v5117_v35  ;;  %v1440_v35 = vld [vmem:[%s6329_s26 + $0x2188] sm:$0xff]  ;;  %v5139_v38 = vpack.c.bf16 %v1437_v32, %v1435_v30  ;;  %v687_v24 = vld [vmem:[%s6329_s26 + $0xa00] sm:$0xff]  ;;  %v694_v30 = vld [vmem:[%s6329_s26 + $0xa38] sm:$0xff] }
 0x1b0   : > { %v1462_v32 = vld [vmem:[%s6329_s26 + $0x2238] sm:$0xff]  ;;  %v708_v17 = vld [vmem:[%s6329_s26 + $0xaa8] sm:$0xff] }
 0x1b1   : > { %4352 = vmatpush1.bf16.msra.mxu1 %v4351_v41  ;;  %v673_v41 = vld [vmem:[%s6329_s26 + $0x990] sm:$0xff]  ;;  %v710_v18 = vld [vmem:[%s6329_s26 + $0xab8] sm:$0xff] }
 0x1b2   : > { %5120 = vmatpush1.bf16.msra.mxu0 %v5119_v42  ;;  %4354 = vmatprep.subr.bf16.mxu1 %v4353_v43  ;;  %v1439_v42 = vld [vmem:[%s6329_s26 + $0x2180] sm:$0xff]  ;;  %v5141_v43 = vpack.c.bf16 %v1442_v36, %v1440_v35  ;;  %v4375_v49 = vpack.c.bf16 %v673_v41, %v671_v40  ;;  %v349_v35 = vld [vmem:[%s6459_s27 + $0x100] sm:$0xff] }
 0x1b3   : > { %5122 = vmatprep.subr.bf16.mxu0 %v5121_v47  ;;  %v1444_v47 = vld [vmem:[%s6329_s26 + $0x21a8] sm:$0xff]  ;;  %v5143_v50 = vpack.c.bf16 %v1441_v44, %v1439_v42  ;;  %v1459_v40 = vld [vmem:[%s6329_s26 + $0x2220] sm:$0xff]  ;;  %v1461_v42 = vld [vmem:[%s6329_s26 + $0x2230] sm:$0xff] }
 0x1b4   : > { %v698_v44 = vld [vmem:[%s6329_s26 + $0xa58] sm:$0xff] }
 0x1b5   : > { %4356 = vmatpush1.bf16.msra.mxu1 %v4355_v53  ;;  %v677_v53 = vld [vmem:[%s6329_s26 + $0x9b0] sm:$0xff] }
 0x1b6   : > { %5124 = vmatpush1.bf16.msra.mxu0 %v5123_v54  ;;  %4358 = vmatprep.subr.bf16.mxu1 %v4357_v55  ;;  %v1443_v54 = vld [vmem:[%s6329_s26 + $0x21a0] sm:$0xff]  ;;  %v5145_v55 = vpack.c.bf16 %v1446_v48, %v1444_v47  ;;  %v4379_v61 = vpack.c.bf16 %v677_v53, %v675_v52  ;;  %v328_v47 = vld [vmem:[%s6459_s27 + $0x58] sm:$0xff]  ;;  %v697_v53 = vld [vmem:[%s6329_s26 + $0xa50] sm:$0xff] }
 0x1b7   : > { %5126 = vmatprep.subr.bf16.mxu0 %v5125_v59  ;;  %v1448_v59 = vld [vmem:[%s6329_s26 + $0x21c8] sm:$0xff]  ;;  %v5147_v62 = vpack.c.bf16 %v1445_v56, %v1443_v54  ;;  %v695_v52 = vld [vmem:[%s6329_s26 + $0xa40] sm:$0xff]  ;;  %v1465_v56 = vld [vmem:[%s6329_s26 + $0x2250] sm:$0xff] }
 0x1b8   : > { %v1463_v54 = vld [vmem:[%s6329_s26 + $0x2240] sm:$0xff] }
 0x1b9   : > { %4360 = vmatpush1.bf16.msra.mxu1 %v4359_v1  ;;  %v681_v1 = vld [vmem:[%s6329_s26 + $0x9d0] sm:$0xff] }
 0x1ba   : > { %5128 = vmatpush1.bf16.msra.mxu0 %v5127_v2  ;;  %4362 = vmatprep.subr.bf16.mxu1 %v4361_v3  ;;  %v1447_v2 = vld [vmem:[%s6329_s26 + $0x21c0] sm:$0xff]  ;;  %v5149_v3 = vpack.c.bf16 %v1450_v60, %v1448_v59  ;;  %v4383_v9 = vpack.c.bf16 %v681_v1, %v679_v0  ;;  %v1468_v59 = vld [vmem:[%s6329_s26 + $0x2268] sm:$0xff]  ;;  %v1470_v60 = vld [vmem:[%s6329_s26 + $0x2278] sm:$0xff] }
 0x1bb   : > { %5130 = vmatprep.subr.bf16.mxu0 %v5129_v7  ;;  %v1452_v7 = vld [vmem:[%s6329_s26 + $0x21e8] sm:$0xff]  ;;  %v5151_v10 = vpack.c.bf16 %v1449_v4, %v1447_v2  ;;  %v699_v0 = vld [vmem:[%s6329_s26 + $0xa60] sm:$0xff]  ;;  %v701_v1 = vld [vmem:[%s6329_s26 + $0xa70] sm:$0xff] }
 0x1bc   : > { %v1467_v2 = vld [vmem:[%s6329_s26 + $0x2260] sm:$0xff]  ;;  %v1469_v4 = vld [vmem:[%s6329_s26 + $0x2270] sm:$0xff] }
 0x1bd   : > { %4364 = vmatpush1.bf16.msra.mxu1 %v4363_v13  ;;  %v685_v13 = vld [vmem:[%s6329_s26 + $0x9f0] sm:$0xff] }
 0x1be   : > { %5132 = vmatpush1.bf16.msra.mxu0 %v5131_v14  ;;  %4366 = vmatprep.subr.bf16.mxu1 %v4365_v15  ;;  %v1451_v14 = vld [vmem:[%s6329_s26 + $0x21e0] sm:$0xff]  ;;  %v5153_v15 = vpack.c.bf16 %v1454_v8, %v1452_v7  ;;  %v4387_v21 = vpack.c.bf16 %v685_v13, %v683_v12  ;;  %v1472_v7 = vld [vmem:[%s6329_s26 + $0x2288] sm:$0xff]  ;;  %v1474_v8 = vld [vmem:[%s6329_s26 + $0x2298] sm:$0xff] }
 0x1bf   : > { %5134 = vmatprep.subr.bf16.mxu0 %v5133_v19  ;;  %v1456_v19 = vld [vmem:[%s6329_s26 + $0x2208] sm:$0xff]  ;;  %v5155_v22 = vpack.c.bf16 %v1453_v16, %v1451_v14  ;;  %v703_v12 = vld [vmem:[%s6329_s26 + $0xa80] sm:$0xff]  ;;  %v705_v13 = vld [vmem:[%s6329_s26 + $0xa90] sm:$0xff] }
 0x1c0   : > { %v1471_v14 = vld [vmem:[%s6329_s26 + $0x2280] sm:$0xff]  ;;  %v1473_v16 = vld [vmem:[%s6329_s26 + $0x2290] sm:$0xff] }
 0x1c1   : > { %4368 = vmatpush1.bf16.msra.mxu1 %v4367_v25  ;;  %v689_v25 = vld [vmem:[%s6329_s26 + $0xa10] sm:$0xff] }
 0x1c2   : > { %5136 = vmatpush1.bf16.msra.mxu0 %v5135_v26  ;;  %4370 = vmatprep.subr.bf16.mxu1 %v4369_v27  ;;  %v1455_v26 = vld [vmem:[%s6329_s26 + $0x2200] sm:$0xff]  ;;  %v5157_v27 = vpack.c.bf16 %v1458_v20, %v1456_v19  ;;  %v4391_v34 = vpack.c.bf16 %v689_v25, %v687_v24  ;;  %v1476_v19 = vld [vmem:[%s6329_s26 + $0x22a8] sm:$0xff]  ;;  %v1478_v20 = vld [vmem:[%s6329_s26 + $0x22b8] sm:$0xff] }
 0x1c3   : > { %5138 = vmatprep.subr.bf16.mxu0 %v5137_v31  ;;  %v1460_v31 = vld [vmem:[%s6329_s26 + $0x2228] sm:$0xff]  ;;  %v5159_v36 = vpack.c.bf16 %v1457_v28, %v1455_v26  ;;  %v707_v24 = vld [vmem:[%s6329_s26 + $0xaa0] sm:$0xff]  ;;  %v709_v25 = vld [vmem:[%s6329_s26 + $0xab0] sm:$0xff] }
 0x1c4   : > { %v5161_v41 = vpack.c.bf16 %v1462_v32, %v1460_v31  ;;  %v1475_v26 = vld [vmem:[%s6329_s26 + $0x22a0] sm:$0xff]  ;;  %v1477_v28 = vld [vmem:[%s6329_s26 + $0x22b0] sm:$0xff]  ;;  %v1480_v31 = vld [vmem:[%s6329_s26 + $0x22c8] sm:$0xff] }
 0x1c5   : > { %4372 = vmatpush1.bf16.msra.mxu1 %v4371_v37  ;;  %v4393_v37 = vpack.c.bf16 %v694_v30, %v692_v29  ;;  %v712_v29 = vld [vmem:[%s6329_s26 + $0xac8] sm:$0xff]  ;;  %v714_v30 = vld [vmem:[%s6329_s26 + $0xad8] sm:$0xff] }
 0x1c6   : > { %5140 = vmatpush1.bf16.msra.mxu0 %v5139_v38  ;;  %4374 = vmatprep.subr.bf16.mxu1 %v4373_v39  ;;  %v691_v38 = vld [vmem:[%s6329_s26 + $0xa20] sm:$0xff]  ;;  %v693_v39 = vld [vmem:[%s6329_s26 + $0xa30] sm:$0xff]  ;;  %v1482_v32 = vld [vmem:[%s6329_s26 + $0x22d8] sm:$0xff] }
 0x1c7   : > { %5142 = vmatprep.subr.bf16.mxu0 %v5141_v43  ;;  %v696_v43 = vld [vmem:[%s6329_s26 + $0xa48] sm:$0xff]  ;;  %v4395_v48 = vpack.c.bf16 %v693_v39, %v691_v38  ;;  %v1479_v38 = vld [vmem:[%s6329_s26 + $0x22c0] sm:$0xff]  ;;  %v5181_v39 = vpack.c.bf16 %v1482_v32, %v1480_v31 }
 0x1c8   : > { %v731_v32 = vld [vmem:[%s6329_s26 + $0xb60] sm:$0xff] }
 0x1c9   : > { %4376 = vmatpush1.bf16.msra.mxu1 %v4375_v49  ;;  %v352_v49 = vld [vmem:[%s6459_s27 + $0x118] sm:$0xff] }
 0x1ca   : > { %5144 = vmatpush1.bf16.msra.mxu0 %v5143_v50  ;;  %4378 = vmatprep.subr.bf16.mxu1 %v4377_v51  ;;  %v5163_v50 = vpack.c.bf16 %v1461_v42, %v1459_v40  ;;  %v4397_v51 = vpack.c.bf16 %v698_v44, %v696_v43  ;;  %v1481_v40 = vld [vmem:[%s6329_s26 + $0x22d0] sm:$0xff]  ;;  %v718_v42 = vld [vmem:[%s6329_s26 + $0xaf8] sm:$0xff]  ;;  %v1484_v43 = vld [vmem:[%s6329_s26 + $0x22e8] sm:$0xff] }
 0x1cb   : > { %5146 = vmatprep.subr.bf16.mxu0 %v5145_v55  ;;  %v5165_v55 = vpack.c.bf16 %v1466_v46, %v1464_v45  ;;  %v1486_v44 = vld [vmem:[%s6329_s26 + $0x22f8] sm:$0xff]  ;;  %v5183_v46 = vpack.c.bf16 %v1481_v40, %v1479_v38 }
 0x1cc   : > { %v738_v38 = vld [vmem:[%s6329_s26 + $0xb98] sm:$0xff] }
 0x1cd   : > { %4380 = vmatpush1.bf16.msra.mxu1 %v4379_v61  ;;  %v4399_v61 = vpack.c.bf16 %v697_v53, %v695_v52  ;;  %v1485_v52 = vld [vmem:[%s6329_s26 + $0x22f0] sm:$0xff]  ;;  %v720_v53 = vld [vmem:[%s6329_s26 + $0xb08] sm:$0xff]  ;;  %v1506_v40 = vld [vmem:[%s6329_s26 + $0x2398] sm:$0xff] }
 0x1ce   : > { %5148 = vmatpush1.bf16.msra.mxu0 %v5147_v62  ;;  %4382 = vmatprep.subr.bf16.mxu1 %v4381_v63  ;;  %v5167_v62 = vpack.c.bf16 %v1465_v56, %v1463_v54  ;;  %v4401_v63 = vpack.c.bf16 %v702_v58, %v700_v57  ;;  %v722_v54 = vld [vmem:[%s6329_s26 + $0xb18] sm:$0xff] }
 0x1cf   : > { %5150 = vmatprep.subr.bf16.mxu0 %v5149_v3  ;;  %v5169_v3 = vpack.c.bf16 %v1470_v60, %v1468_v59  ;;  %v1490_v56 = vld [vmem:[%s6329_s26 + $0x2318] sm:$0xff]  ;;  %v4421_v59 = vpack.c.bf16 %v722_v54, %v720_v53  ;;  %v719_v60 = vld [vmem:[%s6329_s26 + $0xb00] sm:$0xff] }
 0x1d1   : > { %4384 = vmatpush1.bf16.msra.mxu1 %v4383_v9  ;;  %v4403_v9 = vpack.c.bf16 %v701_v1, %v699_v0  ;;  %v1489_v0 = vld [vmem:[%s6329_s26 + $0x2310] sm:$0xff]  ;;  %v724_v1 = vld [vmem:[%s6329_s26 + $0xb28] sm:$0xff] }
 0x1d2   : > { %5152 = vmatpush1.bf16.msra.mxu0 %v5151_v10  ;;  %4386 = vmatprep.subr.bf16.mxu1 %v4385_v11  ;;  %v5171_v10 = vpack.c.bf16 %v1469_v4, %v1467_v2  ;;  %v4405_v11 = vpack.c.bf16 %v706_v6, %v704_v5  ;;  %v726_v2 = vld [vmem:[%s6329_s26 + $0xb38] sm:$0xff] }
 0x1d3   : > { %5154 = vmatprep.subr.bf16.mxu0 %v5153_v15  ;;  %v5173_v15 = vpack.c.bf16 %v1474_v8, %v1472_v7  ;;  %v1494_v4 = vld [vmem:[%s6329_s26 + $0x2338] sm:$0xff]  ;;  %v4425_v7 = vpack.c.bf16 %v726_v2, %v724_v1  ;;  %v723_v8 = vld [vmem:[%s6329_s26 + $0xb20] sm:$0xff] }
 0x1d5   : > { %4388 = vmatpush1.bf16.msra.mxu1 %v4387_v21  ;;  %v4407_v21 = vpack.c.bf16 %v705_v13, %v703_v12  ;;  %v1493_v12 = vld [vmem:[%s6329_s26 + $0x2330] sm:$0xff]  ;;  %v728_v13 = vld [vmem:[%s6329_s26 + $0xb48] sm:$0xff] }
 0x1d6   : > { %5156 = vmatpush1.bf16.msra.mxu0 %v5155_v22  ;;  %4390 = vmatprep.subr.bf16.mxu1 %v4389_v23  ;;  %v5175_v22 = vpack.c.bf16 %v1473_v16, %v1471_v14  ;;  %v4409_v23 = vpack.c.bf16 %v710_v18, %v708_v17  ;;  %v730_v14 = vld [vmem:[%s6329_s26 + $0xb58] sm:$0xff] }
 0x1d7   : > { %5158 = vmatprep.subr.bf16.mxu0 %v5157_v27  ;;  %v5177_v27 = vpack.c.bf16 %v1478_v20, %v1476_v19  ;;  %v1498_v16 = vld [vmem:[%s6329_s26 + $0x2358] sm:$0xff]  ;;  %v4429_v19 = vpack.c.bf16 %v730_v14, %v728_v13  ;;  %v727_v20 = vld [vmem:[%s6329_s26 + $0xb40] sm:$0xff] }
 0x1d8   : > { %2318 = vmatmul.mubr.f32.vlgmr.msra.gmra.mrb[0].mxu1 %v325_v33  ;;  %v4411_v33 = vpack.c.bf16 %v709_v25, %v707_v24  ;;  %v1497_v24 = vld [vmem:[%s6329_s26 + $0x2350] sm:$0xff]  ;;  %v732_v25 = vld [vmem:[%s6329_s26 + $0xb68] sm:$0xff] }
 0x1d9   : > { %4392 = vmatpush1.bf16.msra.mxu1 %v4391_v34  ;;  %3170 = vmatmul.mubr.f32.vlgmr.msra.gmra.mrb[0].mxu0 %v349_v35  ;;  %v5179_v34 = vpack.c.bf16 %v1477_v28, %v1475_v26  ;;  %v4413_v35 = vpack.c.bf16 %v714_v30, %v712_v29  ;;  %v734_v26 = vld [vmem:[%s6329_s26 + $0xb78] sm:$0xff] }
 0x1da   : > { %5160 = vmatpush1.bf16.msra.mxu0 %v5159_v36  ;;  %4394 = vmatprep.subr.bf16.mxu1 %v4393_v37  ;;  %v711_v36 = vld [vmem:[%s6329_s26 + $0xac0] sm:$0xff]  ;;  %v713_v37 = vld [vmem:[%s6329_s26 + $0xad0] sm:$0xff]  ;;  %v1502_v28 = vld [vmem:[%s6329_s26 + $0x2378] sm:$0xff]  ;;  %v4433_v31 = vpack.c.bf16 %v734_v26, %v732_v25 }
 0x1db   : > { %5162 = vmatprep.subr.bf16.mxu0 %v5161_v41  ;;  %2388 = vmatprep.mubr.f32.mxu1 %v328_v47  ;;  %v716_v41 = vld [vmem:[%s6329_s26 + $0xae8] sm:$0xff]  ;;  %v4415_v45 = vpack.c.bf16 %v713_v37, %v711_v36  ;;  %v1501_v36 = vld [vmem:[%s6329_s26 + $0x2370] sm:$0xff] }
 0x1dc   : > { %3240 = vmatprep.mubr.f32.mxu0 %v352_v49  ;;  %v4417_v47 = vpack.c.bf16 %v718_v42, %v716_v41  ;;  %v717_v49 = vld [vmem:[%s6329_s26 + $0xaf0] sm:$0xff]  ;;  %v736_v37 = vld [vmem:[%s6329_s26 + $0xb88] sm:$0xff] }
 0x1dd   : > { %4396 = vmatpush1.bf16.msra.mxu1 %v4395_v48  ;;  %v715_v48 = vld [vmem:[%s6329_s26 + $0xae0] sm:$0xff] }
 0x1de   : > { %5164 = vmatpush1.bf16.msra.mxu0 %v5163_v50  ;;  %4398 = vmatprep.subr.bf16.mxu1 %v4397_v51  ;;  %v1483_v50 = vld [vmem:[%s6329_s26 + $0x22e0] sm:$0xff]  ;;  %v5185_v51 = vpack.c.bf16 %v1486_v44, %v1484_v43  ;;  %v4419_v57 = vpack.c.bf16 %v717_v49, %v715_v48  ;;  %v4437_v43 = vpack.c.bf16 %v738_v38, %v736_v37  ;;  %v1505_v48 = vld [vmem:[%s6329_s26 + $0x2390] sm:$0xff]  ;;  %v740_v49 = vld [vmem:[%s6329_s26 + $0xba8] sm:$0xff] }
 0x1df   : > { %5166 = vmatprep.subr.bf16.mxu0 %v5165_v55  ;;  %v1488_v55 = vld [vmem:[%s6329_s26 + $0x2308] sm:$0xff]  ;;  %v5187_v58 = vpack.c.bf16 %v1485_v52, %v1483_v50  ;;  %v735_v44 = vld [vmem:[%s6329_s26 + $0xb80] sm:$0xff]  ;;  %v742_v50 = vld [vmem:[%s6329_s26 + $0xbb8] sm:$0xff] }
 0x1e0   : > { %v1510_v52 = vld [vmem:[%s6329_s26 + $0x23b8] sm:$0xff]  ;;  %v327_v37 = vld [vmem:[%s6459_s27 + $0x50] sm:$0xff] }
 0x1e1   : > { %4400 = vmatpush1.bf16.msra.mxu1 %v4399_v61  ;;  %v721_v61 = vld [vmem:[%s6329_s26 + $0xb10] sm:$0xff] }
 0x1e2   : > { %5168 = vmatpush1.bf16.msra.mxu0 %v5167_v62  ;;  %4402 = vmatprep.subr.bf16.mxu1 %v4401_v63  ;;  %v1487_v62 = vld [vmem:[%s6329_s26 + $0x2300] sm:$0xff]  ;;  %v5189_v63 = vpack.c.bf16 %v1490_v56, %v1488_v55  ;;  %v4423_v5 = vpack.c.bf16 %v721_v61, %v719_v60  ;;  %v4441_v55 = vpack.c.bf16 %v742_v50, %v740_v49  ;;  %v1509_v60 = vld [vmem:[%s6329_s26 + $0x23b0] sm:$0xff]  ;;  %v744_v61 = vld [vmem:[%s6329_s26 + $0xbc8] sm:$0xff] }
 0x1e3   : > { %5170 = vmatprep.subr.bf16.mxu0 %v5169_v3  ;;  %v1492_v3 = vld [vmem:[%s6329_s26 + $0x2328] sm:$0xff]  ;;  %v5191_v6 = vpack.c.bf16 %v1489_v0, %v1487_v62  ;;  %v739_v56 = vld [vmem:[%s6329_s26 + $0xba0] sm:$0xff]  ;;  %v746_v62 = vld [vmem:[%s6329_s26 + $0xbd8] sm:$0xff] }
 0x1e4   : > { %v1514_v0 = vld [vmem:[%s6329_s26 + $0x23d8] sm:$0xff]  ;;  %v1528_v49 = vld [vmem:[%s6329_s26 + $0x2448] sm:$0xff] }
 0x1e5   : > { %4404 = vmatpush1.bf16.msra.mxu1 %v4403_v9  ;;  %v725_v9 = vld [vmem:[%s6329_s26 + $0xb30] sm:$0xff]  ;;  %v1530_v50 = vld [vmem:[%s6329_s26 + $0x2458] sm:$0xff] }
 0x1e6   : > { %5172 = vmatpush1.bf16.msra.mxu0 %v5171_v10  ;;  %4406 = vmatprep.subr.bf16.mxu1 %v4405_v11  ;;  %v1491_v10 = vld [vmem:[%s6329_s26 + $0x2320] sm:$0xff]  ;;  %v5193_v11 = vpack.c.bf16 %v1494_v4, %v1492_v3  ;;  %v4427_v17 = vpack.c.bf16 %v725_v9, %v723_v8  ;;  %v4445_v3 = vpack.c.bf16 %v746_v62, %v744_v61  ;;  %v1513_v8 = vld [vmem:[%s6329_s26 + $0x23d0] sm:$0xff]  ;;  %v748_v9 = vld [vmem:[%s6329_s26 + $0xbe8] sm:$0xff] }
 0x1e7   : > { %5174 = vmatprep.subr.bf16.mxu0 %v5173_v15  ;;  %v1496_v15 = vld [vmem:[%s6329_s26 + $0x2348] sm:$0xff]  ;;  %v5195_v18 = vpack.c.bf16 %v1493_v12, %v1491_v10  ;;  %v743_v4 = vld [vmem:[%s6329_s26 + $0xbc0] sm:$0xff]  ;;  %v750_v10 = vld [vmem:[%s6329_s26 + $0xbf8] sm:$0xff] }
 0x1e8   : > { %v1518_v12 = vld [vmem:[%s6329_s26 + $0x23f8] sm:$0xff]  ;;  %v764_v61 = vld [vmem:[%s6329_s26 + $0xc68] sm:$0xff] }
 0x1e9   : > { %4408 = vmatpush1.bf16.msra.mxu1 %v4407_v21  ;;  %v729_v21 = vld [vmem:[%s6329_s26 + $0xb50] sm:$0xff]  ;;  %v766_v62 = vld [vmem:[%s6329_s26 + $0xc78] sm:$0xff] }
 0x1ea   : > { %5176 = vmatpush1.bf16.msra.mxu0 %v5175_v22  ;;  %4410 = vmatprep.subr.bf16.mxu1 %v4409_v23  ;;  %v1495_v22 = vld [vmem:[%s6329_s26 + $0x2340] sm:$0xff]  ;;  %v5197_v23 = vpack.c.bf16 %v1498_v16, %v1496_v15  ;;  %v4431_v29 = vpack.c.bf16 %v729_v21, %v727_v20  ;;  %v4449_v15 = vpack.c.bf16 %v750_v10, %v748_v9  ;;  %v1517_v20 = vld [vmem:[%s6329_s26 + $0x23f0] sm:$0xff]  ;;  %v752_v21 = vld [vmem:[%s6329_s26 + $0xc08] sm:$0xff] }
 0x1eb   : > { %5178 = vmatprep.subr.bf16.mxu0 %v5177_v27  ;;  %v1500_v27 = vld [vmem:[%s6329_s26 + $0x2368] sm:$0xff]  ;;  %v5199_v30 = vpack.c.bf16 %v1497_v24, %v1495_v22  ;;  %v747_v16 = vld [vmem:[%s6329_s26 + $0xbe0] sm:$0xff]  ;;  %v754_v22 = vld [vmem:[%s6329_s26 + $0xc18] sm:$0xff] }
 0x1ec   : > { %v1522_v24 = vld [vmem:[%s6329_s26 + $0x2418] sm:$0xff]  ;;  %v768_v9 = vld [vmem:[%s6329_s26 + $0xc88] sm:$0xff] }
 0x1ed   : > { %4412 = vmatpush1.bf16.msra.mxu1 %v4411_v33  ;;  %v733_v33 = vld [vmem:[%s6329_s26 + $0xb70] sm:$0xff]  ;;  %v770_v10 = vld [vmem:[%s6329_s26 + $0xc98] sm:$0xff] }
 0x1ee   : > { %5180 = vmatpush1.bf16.msra.mxu0 %v5179_v34  ;;  %4414 = vmatprep.subr.bf16.mxu1 %v4413_v35  ;;  %v1499_v34 = vld [vmem:[%s6329_s26 + $0x2360] sm:$0xff]  ;;  %v5201_v35 = vpack.c.bf16 %v1502_v28, %v1500_v27  ;;  %v4435_v41 = vpack.c.bf16 %v733_v33, %v731_v32  ;;  %v4453_v27 = vpack.c.bf16 %v754_v22, %v752_v21  ;;  %v1521_v32 = vld [vmem:[%s6329_s26 + $0x2410] sm:$0xff]  ;;  %v756_v33 = vld [vmem:[%s6329_s26 + $0xc28] sm:$0xff] }
 0x1ef   : > { %5182 = vmatprep.subr.bf16.mxu0 %v5181_v39  ;;  %v1504_v39 = vld [vmem:[%s6329_s26 + $0x2388] sm:$0xff]  ;;  %v5203_v42 = vpack.c.bf16 %v1501_v36, %v1499_v34  ;;  %v751_v28 = vld [vmem:[%s6329_s26 + $0xc00] sm:$0xff]  ;;  %v758_v34 = vld [vmem:[%s6329_s26 + $0xc38] sm:$0xff] }
 0x1f0   : > { %v1526_v36 = vld [vmem:[%s6329_s26 + $0x2438] sm:$0xff]  ;;  %v772_v21 = vld [vmem:[%s6329_s26 + $0xca8] sm:$0xff] }
 0x1f1   : > { %4416 = vmatpush1.bf16.msra.mxu1 %v4415_v45  ;;  %v737_v45 = vld [vmem:[%s6329_s26 + $0xb90] sm:$0xff]  ;;  %v774_v22 = vld [vmem:[%s6329_s26 + $0xcb8] sm:$0xff] }
 0x1f2   : > { %5184 = vmatpush1.bf16.msra.mxu0 %v5183_v46  ;;  %4418 = vmatprep.subr.bf16.mxu1 %v4417_v47  ;;  %v1503_v46 = vld [vmem:[%s6329_s26 + $0x2380] sm:$0xff]  ;;  %v5205_v47 = vpack.c.bf16 %v1506_v40, %v1504_v39  ;;  %v4439_v53 = vpack.c.bf16 %v737_v45, %v735_v44 }
 0x1f3   : > { %5186 = vmatprep.subr.bf16.mxu0 %v5185_v51  ;;  %v1508_v51 = vld [vmem:[%s6329_s26 + $0x23a8] sm:$0xff]  ;;  %v5207_v54 = vpack.c.bf16 %v1505_v48, %v1503_v46  ;;  %v351_v39 = vld [vmem:[%s6459_s27 + $0x110] sm:$0xff]  ;;  %v1525_v46 = vld [vmem:[%s6329_s26 + $0x2430] sm:$0xff] }
 0x1f4   : > { %v1523_v44 = vld [vmem:[%s6329_s26 + $0x2420] sm:$0xff]  ;;  %v762_v48 = vld [vmem:[%s6329_s26 + $0xc58] sm:$0xff] }
 0x1f5   : > { %4420 = vmatpush1.bf16.msra.mxu1 %v4419_v57  ;;  %v741_v57 = vld [vmem:[%s6329_s26 + $0xbb0] sm:$0xff] }
 0x1f6   : > { %5188 = vmatpush1.bf16.msra.mxu0 %v5187_v58  ;;  %4422 = vmatprep.subr.bf16.mxu1 %v4421_v59  ;;  %v1507_v58 = vld [vmem:[%s6329_s26 + $0x23a0] sm:$0xff]  ;;  %v5209_v59 = vpack.c.bf16 %v1510_v52, %v1508_v51  ;;  %v4443_v1 = vpack.c.bf16 %v741_v57, %v739_v56  ;;  %v330_v51 = vld [vmem:[%s6459_s27 + $0x68] sm:$0xff]  ;;  %v761_v57 = vld [vmem:[%s6329_s26 + $0xc50] sm:$0xff] }
 0x1f7   : > { %5190 = vmatprep.subr.bf16.mxu0 %v5189_v63  ;;  %v1512_v63 = vld [vmem:[%s6329_s26 + $0x23c8] sm:$0xff]  ;;  %v5211_v2 = vpack.c.bf16 %v1509_v60, %v1507_v58  ;;  %v759_v56 = vld [vmem:[%s6329_s26 + $0xc40] sm:$0xff]  ;;  %v1529_v60 = vld [vmem:[%s6329_s26 + $0x2450] sm:$0xff] }
 0x1f8   : > { %v1527_v58 = vld [vmem:[%s6329_s26 + $0x2440] sm:$0xff] }
 0x1f9   : > { %4424 = vmatpush1.bf16.msra.mxu1 %v4423_v5  ;;  %v745_v5 = vld [vmem:[%s6329_s26 + $0xbd0] sm:$0xff] }
 0x1fa   : > { %5192 = vmatpush1.bf16.msra.mxu0 %v5191_v6  ;;  %4426 = vmatprep.subr.bf16.mxu1 %v4425_v7  ;;  %v1511_v6 = vld [vmem:[%s6329_s26 + $0x23c0] sm:$0xff]  ;;  %v5213_v7 = vpack.c.bf16 %v1514_v0, %v1512_v63  ;;  %v4447_v13 = vpack.c.bf16 %v745_v5, %v743_v4  ;;  %v1532_v63 = vld [vmem:[%s6329_s26 + $0x2468] sm:$0xff]  ;;  %v1534_v0 = vld [vmem:[%s6329_s26 + $0x2478] sm:$0xff] }
 0x1fb   : > { %5194 = vmatprep.subr.bf16.mxu0 %v5193_v11  ;;  %v1516_v11 = vld [vmem:[%s6329_s26 + $0x23e8] sm:$0xff]  ;;  %v5215_v14 = vpack.c.bf16 %v1513_v8, %v1511_v6  ;;  %v763_v4 = vld [vmem:[%s6329_s26 + $0xc60] sm:$0xff]  ;;  %v765_v5 = vld [vmem:[%s6329_s26 + $0xc70] sm:$0xff] }
 0x1fc   : > { %v1531_v6 = vld [vmem:[%s6329_s26 + $0x2460] sm:$0xff]  ;;  %v1533_v8 = vld [vmem:[%s6329_s26 + $0x2470] sm:$0xff] }
 0x1fd   : > { %4428 = vmatpush1.bf16.msra.mxu1 %v4427_v17  ;;  %v749_v17 = vld [vmem:[%s6329_s26 + $0xbf0] sm:$0xff] }
 0x1fe   : > { %5196 = vmatpush1.bf16.msra.mxu0 %v5195_v18  ;;  %4430 = vmatprep.subr.bf16.mxu1 %v4429_v19  ;;  %v1515_v18 = vld [vmem:[%s6329_s26 + $0x23e0] sm:$0xff]  ;;  %v5217_v19 = vpack.c.bf16 %v1518_v12, %v1516_v11  ;;  %v4451_v25 = vpack.c.bf16 %v749_v17, %v747_v16  ;;  %v1536_v11 = vld [vmem:[%s6329_s26 + $0x2488] sm:$0xff]  ;;  %v1538_v12 = vld [vmem:[%s6329_s26 + $0x2498] sm:$0xff] }
 0x1ff   : > { %5198 = vmatprep.subr.bf16.mxu0 %v5197_v23  ;;  %v1520_v23 = vld [vmem:[%s6329_s26 + $0x2408] sm:$0xff]  ;;  %v5219_v26 = vpack.c.bf16 %v1517_v20, %v1515_v18  ;;  %v767_v16 = vld [vmem:[%s6329_s26 + $0xc80] sm:$0xff]  ;;  %v769_v17 = vld [vmem:[%s6329_s26 + $0xc90] sm:$0xff] }
 0x200   : > { %v1535_v18 = vld [vmem:[%s6329_s26 + $0x2480] sm:$0xff]  ;;  %v1537_v20 = vld [vmem:[%s6329_s26 + $0x2490] sm:$0xff] }
 0x201   : > { %4432 = vmatpush1.bf16.msra.mxu1 %v4431_v29  ;;  %v753_v29 = vld [vmem:[%s6329_s26 + $0xc10] sm:$0xff] }
 0x202   : > { %5200 = vmatpush1.bf16.msra.mxu0 %v5199_v30  ;;  %4434 = vmatprep.subr.bf16.mxu1 %v4433_v31  ;;  %v1519_v30 = vld [vmem:[%s6329_s26 + $0x2400] sm:$0xff]  ;;  %v5221_v31 = vpack.c.bf16 %v1522_v24, %v1520_v23  ;;  %v4455_v38 = vpack.c.bf16 %v753_v29, %v751_v28  ;;  %v1540_v23 = vld [vmem:[%s6329_s26 + $0x24a8] sm:$0xff]  ;;  %v1542_v24 = vld [vmem:[%s6329_s26 + $0x24b8] sm:$0xff] }
 0x203   : > { %5202 = vmatprep.subr.bf16.mxu0 %v5201_v35  ;;  %v1524_v35 = vld [vmem:[%s6329_s26 + $0x2428] sm:$0xff]  ;;  %v5223_v40 = vpack.c.bf16 %v1521_v32, %v1519_v30  ;;  %v771_v28 = vld [vmem:[%s6329_s26 + $0xca0] sm:$0xff]  ;;  %v773_v29 = vld [vmem:[%s6329_s26 + $0xcb0] sm:$0xff] }
 0x204   : > { %v5225_v45 = vpack.c.bf16 %v1526_v36, %v1524_v35  ;;  %v1539_v30 = vld [vmem:[%s6329_s26 + $0x24a0] sm:$0xff]  ;;  %v1541_v32 = vld [vmem:[%s6329_s26 + $0x24b0] sm:$0xff]  ;;  %v1544_v35 = vld [vmem:[%s6329_s26 + $0x24c8] sm:$0xff] }
 0x205   : > { %4436 = vmatpush1.bf16.msra.mxu1 %v4435_v41  ;;  %v4457_v41 = vpack.c.bf16 %v758_v34, %v756_v33  ;;  %v776_v33 = vld [vmem:[%s6329_s26 + $0xcc8] sm:$0xff]  ;;  %v778_v34 = vld [vmem:[%s6329_s26 + $0xcd8] sm:$0xff] }
 0x206   : > { %5204 = vmatpush1.bf16.msra.mxu0 %v5203_v42  ;;  %4438 = vmatprep.subr.bf16.mxu1 %v4437_v43  ;;  %v755_v42 = vld [vmem:[%s6329_s26 + $0xc20] sm:$0xff]  ;;  %v757_v43 = vld [vmem:[%s6329_s26 + $0xc30] sm:$0xff]  ;;  %v1546_v36 = vld [vmem:[%s6329_s26 + $0x24d8] sm:$0xff] }
 0x207   : > { %5206 = vmatprep.subr.bf16.mxu0 %v5205_v47  ;;  %v760_v47 = vld [vmem:[%s6329_s26 + $0xc48] sm:$0xff]  ;;  %v4459_v52 = vpack.c.bf16 %v757_v43, %v755_v42  ;;  %v1543_v42 = vld [vmem:[%s6329_s26 + $0x24c0] sm:$0xff]  ;;  %v5245_v43 = vpack.c.bf16 %v1546_v36, %v1544_v35 }
 0x208   : > { %v795_v36 = vld [vmem:[%s6329_s26 + $0xd60] sm:$0xff] }
 0x209   : > { %4440 = vmatpush1.bf16.msra.mxu1 %v4439_v53  ;;  %v354_v53 = vld [vmem:[%s6459_s27 + $0x128] sm:$0xff] }
 0x20a   : > { %5208 = vmatpush1.bf16.msra.mxu0 %v5207_v54  ;;  %4442 = vmatprep.subr.bf16.mxu1 %v4441_v55  ;;  %v5227_v54 = vpack.c.bf16 %v1525_v46, %v1523_v44  ;;  %v4461_v55 = vpack.c.bf16 %v762_v48, %v760_v47  ;;  %v1545_v44 = vld [vmem:[%s6329_s26 + $0x24d0] sm:$0xff]  ;;  %v782_v46 = vld [vmem:[%s6329_s26 + $0xcf8] sm:$0xff]  ;;  %v1548_v47 = vld [vmem:[%s6329_s26 + $0x24e8] sm:$0xff] }
 0x20b   : > { %5210 = vmatprep.subr.bf16.mxu0 %v5209_v59  ;;  %v5229_v59 = vpack.c.bf16 %v1530_v50, %v1528_v49  ;;  %v1550_v48 = vld [vmem:[%s6329_s26 + $0x24f8] sm:$0xff]  ;;  %v5247_v50 = vpack.c.bf16 %v1545_v44, %v1543_v42 }
 0x20c   : > { %v802_v42 = vld [vmem:[%s6329_s26 + $0xd98] sm:$0xff] }
 0x20d   : > { %4444 = vmatpush1.bf16.msra.mxu1 %v4443_v1  ;;  %v4463_v1 = vpack.c.bf16 %v761_v57, %v759_v56  ;;  %v1549_v56 = vld [vmem:[%s6329_s26 + $0x24f0] sm:$0xff]  ;;  %v784_v57 = vld [vmem:[%s6329_s26 + $0xd08] sm:$0xff]  ;;  %v1570_v44 = vld [vmem:[%s6329_s26 + $0x2598] sm:$0xff] }
 0x20e   : > { %5212 = vmatpush1.bf16.msra.mxu0 %v5211_v2  ;;  %4446 = vmatprep.subr.bf16.mxu1 %v4445_v3  ;;  %v5231_v2 = vpack.c.bf16 %v1529_v60, %v1527_v58  ;;  %v4465_v3 = vpack.c.bf16 %v766_v62, %v764_v61  ;;  %v786_v58 = vld [vmem:[%s6329_s26 + $0xd18] sm:$0xff] }
 0x20f   : > { %5214 = vmatprep.subr.bf16.mxu0 %v5213_v7  ;;  %v5233_v7 = vpack.c.bf16 %v1534_v0, %v1532_v63  ;;  %v1554_v60 = vld [vmem:[%s6329_s26 + $0x2518] sm:$0xff]  ;;  %v4485_v63 = vpack.c.bf16 %v786_v58, %v784_v57  ;;  %v783_v0 = vld [vmem:[%s6329_s26 + $0xd00] sm:$0xff] }
 0x211   : > { %4448 = vmatpush1.bf16.msra.mxu1 %v4447_v13  ;;  %v4467_v13 = vpack.c.bf16 %v765_v5, %v763_v4  ;;  %v1553_v4 = vld [vmem:[%s6329_s26 + $0x2510] sm:$0xff]  ;;  %v788_v5 = vld [vmem:[%s6329_s26 + $0xd28] sm:$0xff] }
 0x212   : > { %5216 = vmatpush1.bf16.msra.mxu0 %v5215_v14  ;;  %4450 = vmatprep.subr.bf16.mxu1 %v4449_v15  ;;  %v5235_v14 = vpack.c.bf16 %v1533_v8, %v1531_v6  ;;  %v4469_v15 = vpack.c.bf16 %v770_v10, %v768_v9  ;;  %v790_v6 = vld [vmem:[%s6329_s26 + $0xd38] sm:$0xff] }
 0x213   : > { %5218 = vmatprep.subr.bf16.mxu0 %v5217_v19  ;;  %v5237_v19 = vpack.c.bf16 %v1538_v12, %v1536_v11  ;;  %v1558_v8 = vld [vmem:[%s6329_s26 + $0x2538] sm:$0xff]  ;;  %v4489_v11 = vpack.c.bf16 %v790_v6, %v788_v5  ;;  %v787_v12 = vld [vmem:[%s6329_s26 + $0xd20] sm:$0xff] }
 0x215   : > { %4452 = vmatpush1.bf16.msra.mxu1 %v4451_v25  ;;  %v4471_v25 = vpack.c.bf16 %v769_v17, %v767_v16  ;;  %v1557_v16 = vld [vmem:[%s6329_s26 + $0x2530] sm:$0xff]  ;;  %v792_v17 = vld [vmem:[%s6329_s26 + $0xd48] sm:$0xff] }
 0x216   : > { %5220 = vmatpush1.bf16.msra.mxu0 %v5219_v26  ;;  %4454 = vmatprep.subr.bf16.mxu1 %v4453_v27  ;;  %v5239_v26 = vpack.c.bf16 %v1537_v20, %v1535_v18  ;;  %v4473_v27 = vpack.c.bf16 %v774_v22, %v772_v21  ;;  %v794_v18 = vld [vmem:[%s6329_s26 + $0xd58] sm:$0xff] }
 0x217   : > { %5222 = vmatprep.subr.bf16.mxu0 %v5221_v31  ;;  %v5241_v31 = vpack.c.bf16 %v1542_v24, %v1540_v23  ;;  %v1562_v20 = vld [vmem:[%s6329_s26 + $0x2558] sm:$0xff]  ;;  %v4493_v23 = vpack.c.bf16 %v794_v18, %v792_v17  ;;  %v791_v24 = vld [vmem:[%s6329_s26 + $0xd40] sm:$0xff] }
 0x218   : > { %2389 = vmatmul.mubr.f32.vlgmr.msra.gmra.mrb[0].mxu1 %v327_v37  ;;  %v4475_v37 = vpack.c.bf16 %v773_v29, %v771_v28  ;;  %v1561_v28 = vld [vmem:[%s6329_s26 + $0x2550] sm:$0xff]  ;;  %v796_v29 = vld [vmem:[%s6329_s26 + $0xd68] sm:$0xff] }
 0x219   : > { %4456 = vmatpush1.bf16.msra.mxu1 %v4455_v38  ;;  %3241 = vmatmul.mubr.f32.vlgmr.msra.gmra.mrb[0].mxu0 %v351_v39  ;;  %v5243_v38 = vpack.c.bf16 %v1541_v32, %v1539_v30  ;;  %v4477_v39 = vpack.c.bf16 %v778_v34, %v776_v33  ;;  %v798_v30 = vld [vmem:[%s6329_s26 + $0xd78] sm:$0xff] }
 0x21a   : > { %5224 = vmatpush1.bf16.msra.mxu0 %v5223_v40  ;;  %4458 = vmatprep.subr.bf16.mxu1 %v4457_v41  ;;  %v775_v40 = vld [vmem:[%s6329_s26 + $0xcc0] sm:$0xff]  ;;  %v777_v41 = vld [vmem:[%s6329_s26 + $0xcd0] sm:$0xff]  ;;  %v1566_v32 = vld [vmem:[%s6329_s26 + $0x2578] sm:$0xff]  ;;  %v4497_v35 = vpack.c.bf16 %v798_v30, %v796_v29 }
 0x21b   : > { %5226 = vmatprep.subr.bf16.mxu0 %v5225_v45  ;;  %2459 = vmatprep.mubr.f32.mxu1 %v330_v51  ;;  %v780_v45 = vld [vmem:[%s6329_s26 + $0xce8] sm:$0xff]  ;;  %v4479_v49 = vpack.c.bf16 %v777_v41, %v775_v40  ;;  %v1565_v40 = vld [vmem:[%s6329_s26 + $0x2570] sm:$0xff] }
 0x21c   : > { %3311 = vmatprep.mubr.f32.mxu0 %v354_v53  ;;  %v4481_v51 = vpack.c.bf16 %v782_v46, %v780_v45  ;;  %v781_v53 = vld [vmem:[%s6329_s26 + $0xcf0] sm:$0xff]  ;;  %v800_v41 = vld [vmem:[%s6329_s26 + $0xd88] sm:$0xff] }
 0x21d   : > { %4460 = vmatpush1.bf16.msra.mxu1 %v4459_v52  ;;  %v779_v52 = vld [vmem:[%s6329_s26 + $0xce0] sm:$0xff] }
 0x21e   : > { %5228 = vmatpush1.bf16.msra.mxu0 %v5227_v54  ;;  %4462 = vmatprep.subr.bf16.mxu1 %v4461_v55  ;;  %v1547_v54 = vld [vmem:[%s6329_s26 + $0x24e0] sm:$0xff]  ;;  %v5249_v55 = vpack.c.bf16 %v1550_v48, %v1548_v47  ;;  %v4483_v61 = vpack.c.bf16 %v781_v53, %v779_v52  ;;  %v4501_v47 = vpack.c.bf16 %v802_v42, %v800_v41  ;;  %v1569_v52 = vld [vmem:[%s6329_s26 + $0x2590] sm:$0xff]  ;;  %v804_v53 = vld [vmem:[%s6329_s26 + $0xda8] sm:$0xff] }
 0x21f   : > { %5230 = vmatprep.subr.bf16.mxu0 %v5229_v59  ;;  %v1552_v59 = vld [vmem:[%s6329_s26 + $0x2508] sm:$0xff]  ;;  %v5251_v62 = vpack.c.bf16 %v1549_v56, %v1547_v54  ;;  %v799_v48 = vld [vmem:[%s6329_s26 + $0xd80] sm:$0xff]  ;;  %v806_v54 = vld [vmem:[%s6329_s26 + $0xdb8] sm:$0xff] }
 0x220   : > { %v1574_v56 = vld [vmem:[%s6329_s26 + $0x25b8] sm:$0xff]  ;;  %v329_v41 = vld [vmem:[%s6459_s27 + $0x60] sm:$0xff] }
 0x221   : > { %4464 = vmatpush1.bf16.msra.mxu1 %v4463_v1  ;;  %v785_v1 = vld [vmem:[%s6329_s26 + $0xd10] sm:$0xff] }
 0x222   : > { %5232 = vmatpush1.bf16.msra.mxu0 %v5231_v2  ;;  %4466 = vmatprep.subr.bf16.mxu1 %v4465_v3  ;;  %v1551_v2 = vld [vmem:[%s6329_s26 + $0x2500] sm:$0xff]  ;;  %v5253_v3 = vpack.c.bf16 %v1554_v60, %v1552_v59  ;;  %v4487_v9 = vpack.c.bf16 %v785_v1, %v783_v0  ;;  %v4505_v59 = vpack.c.bf16 %v806_v54, %v804_v53  ;;  %v1573_v0 = vld [vmem:[%s6329_s26 + $0x25b0] sm:$0xff]  ;;  %v808_v1 = vld [vmem:[%s6329_s26 + $0xdc8] sm:$0xff] }
 0x223   : > { %5234 = vmatprep.subr.bf16.mxu0 %v5233_v7  ;;  %v1556_v7 = vld [vmem:[%s6329_s26 + $0x2528] sm:$0xff]  ;;  %v5255_v10 = vpack.c.bf16 %v1553_v4, %v1551_v2  ;;  %v803_v60 = vld [vmem:[%s6329_s26 + $0xda0] sm:$0xff]  ;;  %v810_v2 = vld [vmem:[%s6329_s26 + $0xdd8] sm:$0xff] }
 0x224   : > { %v1578_v4 = vld [vmem:[%s6329_s26 + $0x25d8] sm:$0xff]  ;;  %v1592_v53 = vld [vmem:[%s6329_s26 + $0x2648] sm:$0xff] }
 0x225   : > { %4468 = vmatpush1.bf16.msra.mxu1 %v4467_v13  ;;  %v789_v13 = vld [vmem:[%s6329_s26 + $0xd30] sm:$0xff]  ;;  %v1594_v54 = vld [vmem:[%s6329_s26 + $0x2658] sm:$0xff] }
 0x226   : > { %5236 = vmatpush1.bf16.msra.mxu0 %v5235_v14  ;;  %4470 = vmatprep.subr.bf16.mxu1 %v4469_v15  ;;  %v1555_v14 = vld [vmem:[%s6329_s26 + $0x2520] sm:$0xff]  ;;  %v5257_v15 = vpack.c.bf16 %v1558_v8, %v1556_v7  ;;  %v4491_v21 = vpack.c.bf16 %v789_v13, %v787_v12  ;;  %v4509_v7 = vpack.c.bf16 %v810_v2, %v808_v1  ;;  %v1577_v12 = vld [vmem:[%s6329_s26 + $0x25d0] sm:$0xff]  ;;  %v812_v13 = vld [vmem:[%s6329_s26 + $0xde8] sm:$0xff] }
 0x227   : > { %5238 = vmatprep.subr.bf16.mxu0 %v5237_v19  ;;  %v1560_v19 = vld [vmem:[%s6329_s26 + $0x2548] sm:$0xff]  ;;  %v5259_v22 = vpack.c.bf16 %v1557_v16, %v1555_v14  ;;  %v807_v8 = vld [vmem:[%s6329_s26 + $0xdc0] sm:$0xff]  ;;  %v814_v14 = vld [vmem:[%s6329_s26 + $0xdf8] sm:$0xff] }
 0x228   : > { %v1582_v16 = vld [vmem:[%s6329_s26 + $0x25f8] sm:$0xff]  ;;  %v828_v1 = vld [vmem:[%s6329_s26 + $0xe68] sm:$0xff] }
 0x229   : > { %4472 = vmatpush1.bf16.msra.mxu1 %v4471_v25  ;;  %v793_v25 = vld [vmem:[%s6329_s26 + $0xd50] sm:$0xff]  ;;  %v830_v2 = vld [vmem:[%s6329_s26 + $0xe78] sm:$0xff] }
 0x22a   : > { %5240 = vmatpush1.bf16.msra.mxu0 %v5239_v26  ;;  %4474 = vmatprep.subr.bf16.mxu1 %v4473_v27  ;;  %v1559_v26 = vld [vmem:[%s6329_s26 + $0x2540] sm:$0xff]  ;;  %v5261_v27 = vpack.c.bf16 %v1562_v20, %v1560_v19  ;;  %v4495_v33 = vpack.c.bf16 %v793_v25, %v791_v24  ;;  %v4513_v19 = vpack.c.bf16 %v814_v14, %v812_v13  ;;  %v1581_v24 = vld [vmem:[%s6329_s26 + $0x25f0] sm:$0xff]  ;;  %v816_v25 = vld [vmem:[%s6329_s26 + $0xe08] sm:$0xff] }
 0x22b   : > { %5242 = vmatprep.subr.bf16.mxu0 %v5241_v31  ;;  %v1564_v31 = vld [vmem:[%s6329_s26 + $0x2568] sm:$0xff]  ;;  %v5263_v34 = vpack.c.bf16 %v1561_v28, %v1559_v26  ;;  %v811_v20 = vld [vmem:[%s6329_s26 + $0xde0] sm:$0xff]  ;;  %v818_v26 = vld [vmem:[%s6329_s26 + $0xe18] sm:$0xff] }
 0x22c   : > { %v1586_v28 = vld [vmem:[%s6329_s26 + $0x2618] sm:$0xff]  ;;  %v832_v13 = vld [vmem:[%s6329_s26 + $0xe88] sm:$0xff] }
 0x22d   : > { %4476 = vmatpush1.bf16.msra.mxu1 %v4475_v37  ;;  %v797_v37 = vld [vmem:[%s6329_s26 + $0xd70] sm:$0xff]  ;;  %v834_v14 = vld [vmem:[%s6329_s26 + $0xe98] sm:$0xff] }
 0x22e   : > { %5244 = vmatpush1.bf16.msra.mxu0 %v5243_v38  ;;  %4478 = vmatprep.subr.bf16.mxu1 %v4477_v39  ;;  %v1563_v38 = vld [vmem:[%s6329_s26 + $0x2560] sm:$0xff]  ;;  %v5265_v39 = vpack.c.bf16 %v1566_v32, %v1564_v31  ;;  %v4499_v45 = vpack.c.bf16 %v797_v37, %v795_v36  ;;  %v4517_v31 = vpack.c.bf16 %v818_v26, %v816_v25  ;;  %v1585_v36 = vld [vmem:[%s6329_s26 + $0x2610] sm:$0xff]  ;;  %v820_v37 = vld [vmem:[%s6329_s26 + $0xe28] sm:$0xff] }
 0x22f   : > { %5246 = vmatprep.subr.bf16.mxu0 %v5245_v43  ;;  %v1568_v43 = vld [vmem:[%s6329_s26 + $0x2588] sm:$0xff]  ;;  %v5267_v46 = vpack.c.bf16 %v1565_v40, %v1563_v38  ;;  %v815_v32 = vld [vmem:[%s6329_s26 + $0xe00] sm:$0xff]  ;;  %v822_v38 = vld [vmem:[%s6329_s26 + $0xe38] sm:$0xff] }
 0x230   : > { %v1590_v40 = vld [vmem:[%s6329_s26 + $0x2638] sm:$0xff]  ;;  %v836_v25 = vld [vmem:[%s6329_s26 + $0xea8] sm:$0xff] }
 0x231   : > { %4480 = vmatpush1.bf16.msra.mxu1 %v4479_v49  ;;  %v801_v49 = vld [vmem:[%s6329_s26 + $0xd90] sm:$0xff]  ;;  %v838_v26 = vld [vmem:[%s6329_s26 + $0xeb8] sm:$0xff] }
 0x232   : > { %5248 = vmatpush1.bf16.msra.mxu0 %v5247_v50  ;;  %4482 = vmatprep.subr.bf16.mxu1 %v4481_v51  ;;  %v1567_v50 = vld [vmem:[%s6329_s26 + $0x2580] sm:$0xff]  ;;  %v5269_v51 = vpack.c.bf16 %v1570_v44, %v1568_v43  ;;  %v4503_v57 = vpack.c.bf16 %v801_v49, %v799_v48  ;;  %v353_v43 = vld [vmem:[%s6459_s27 + $0x120] sm:$0xff] }
 0x233   : > { %5250 = vmatprep.subr.bf16.mxu0 %v5249_v55  ;;  %v1572_v55 = vld [vmem:[%s6329_s26 + $0x25a8] sm:$0xff]  ;;  %v5271_v58 = vpack.c.bf16 %v1569_v52, %v1567_v50  ;;  %v1587_v48 = vld [vmem:[%s6329_s26 + $0x2620] sm:$0xff]  ;;  %v1589_v50 = vld [vmem:[%s6329_s26 + $0x2630] sm:$0xff] }
 0x234   : > { %v826_v52 = vld [vmem:[%s6329_s26 + $0xe58] sm:$0xff] }
 0x235   : > { %4484 = vmatpush1.bf16.msra.mxu1 %v4483_v61  ;;  %v805_v61 = vld [vmem:[%s6329_s26 + $0xdb0] sm:$0xff] }
 0x236   : > { %5252 = vmatpush1.bf16.msra.mxu0 %v5251_v62  ;;  %4486 = vmatprep.subr.bf16.mxu1 %v4485_v63  ;;  %v1571_v62 = vld [vmem:[%s6329_s26 + $0x25a0] sm:$0xff]  ;;  %v5273_v63 = vpack.c.bf16 %v1574_v56, %v1572_v55  ;;  %v4507_v5 = vpack.c.bf16 %v805_v61, %v803_v60  ;;  %v332_v55 = vld [vmem:[%s6459_s27 + $0x78] sm:$0xff]  ;;  %v825_v61 = vld [vmem:[%s6329_s26 + $0xe50] sm:$0xff] }
 0x237   : > { %5254 = vmatprep.subr.bf16.mxu0 %v5253_v3  ;;  %v1576_v3 = vld [vmem:[%s6329_s26 + $0x25c8] sm:$0xff]  ;;  %v5275_v6 = vpack.c.bf16 %v1573_v0, %v1571_v62  ;;  %v823_v60 = vld [vmem:[%s6329_s26 + $0xe40] sm:$0xff]  ;;  %v1593_v0 = vld [vmem:[%s6329_s26 + $0x2650] sm:$0xff] }
 0x238   : > { %v1591_v62 = vld [vmem:[%s6329_s26 + $0x2640] sm:$0xff] }
 0x239   : > { %4488 = vmatpush1.bf16.msra.mxu1 %v4487_v9  ;;  %v809_v9 = vld [vmem:[%s6329_s26 + $0xdd0] sm:$0xff] }
 0x23a   : > { %5256 = vmatpush1.bf16.msra.mxu0 %v5255_v10  ;;  %4490 = vmatprep.subr.bf16.mxu1 %v4489_v11  ;;  %v1575_v10 = vld [vmem:[%s6329_s26 + $0x25c0] sm:$0xff]  ;;  %v5277_v11 = vpack.c.bf16 %v1578_v4, %v1576_v3  ;;  %v4511_v17 = vpack.c.bf16 %v809_v9, %v807_v8  ;;  %v1596_v3 = vld [vmem:[%s6329_s26 + $0x2668] sm:$0xff]  ;;  %v1598_v4 = vld [vmem:[%s6329_s26 + $0x2678] sm:$0xff] }
 0x23b   : > { %5258 = vmatprep.subr.bf16.mxu0 %v5257_v15  ;;  %v1580_v15 = vld [vmem:[%s6329_s26 + $0x25e8] sm:$0xff]  ;;  %v5279_v18 = vpack.c.bf16 %v1577_v12, %v1575_v10  ;;  %v827_v8 = vld [vmem:[%s6329_s26 + $0xe60] sm:$0xff]  ;;  %v829_v9 = vld [vmem:[%s6329_s26 + $0xe70] sm:$0xff] }
 0x23c   : > { %v1595_v10 = vld [vmem:[%s6329_s26 + $0x2660] sm:$0xff]  ;;  %v1597_v12 = vld [vmem:[%s6329_s26 + $0x2670] sm:$0xff] }
 0x23d   : > { %4492 = vmatpush1.bf16.msra.mxu1 %v4491_v21  ;;  %v813_v21 = vld [vmem:[%s6329_s26 + $0xdf0] sm:$0xff] }
 0x23e   : > { %5260 = vmatpush1.bf16.msra.mxu0 %v5259_v22  ;;  %4494 = vmatprep.subr.bf16.mxu1 %v4493_v23  ;;  %v1579_v22 = vld [vmem:[%s6329_s26 + $0x25e0] sm:$0xff]  ;;  %v5281_v23 = vpack.c.bf16 %v1582_v16, %v1580_v15  ;;  %v4515_v29 = vpack.c.bf16 %v813_v21, %v811_v20  ;;  %v1600_v15 = vld [vmem:[%s6329_s26 + $0x2688] sm:$0xff]  ;;  %v1602_v16 = vld [vmem:[%s6329_s26 + $0x2698] sm:$0xff] }
 0x23f   : > { %5262 = vmatprep.subr.bf16.mxu0 %v5261_v27  ;;  %v1584_v27 = vld [vmem:[%s6329_s26 + $0x2608] sm:$0xff]  ;;  %v5283_v30 = vpack.c.bf16 %v1581_v24, %v1579_v22  ;;  %v831_v20 = vld [vmem:[%s6329_s26 + $0xe80] sm:$0xff]  ;;  %v833_v21 = vld [vmem:[%s6329_s26 + $0xe90] sm:$0xff] }
 0x240   : > { %v1599_v22 = vld [vmem:[%s6329_s26 + $0x2680] sm:$0xff]  ;;  %v1601_v24 = vld [vmem:[%s6329_s26 + $0x2690] sm:$0xff] }
 0x241   : > { %4496 = vmatpush1.bf16.msra.mxu1 %v4495_v33  ;;  %v817_v33 = vld [vmem:[%s6329_s26 + $0xe10] sm:$0xff] }
 0x242   : > { %5264 = vmatpush1.bf16.msra.mxu0 %v5263_v34  ;;  %4498 = vmatprep.subr.bf16.mxu1 %v4497_v35  ;;  %v1583_v34 = vld [vmem:[%s6329_s26 + $0x2600] sm:$0xff]  ;;  %v5285_v35 = vpack.c.bf16 %v1586_v28, %v1584_v27  ;;  %v4519_v42 = vpack.c.bf16 %v817_v33, %v815_v32  ;;  %v1604_v27 = vld [vmem:[%s6329_s26 + $0x26a8] sm:$0xff]  ;;  %v1606_v28 = vld [vmem:[%s6329_s26 + $0x26b8] sm:$0xff] }
 0x243   : > { %5266 = vmatprep.subr.bf16.mxu0 %v5265_v39  ;;  %v1588_v39 = vld [vmem:[%s6329_s26 + $0x2628] sm:$0xff]  ;;  %v5287_v44 = vpack.c.bf16 %v1585_v36, %v1583_v34  ;;  %v835_v32 = vld [vmem:[%s6329_s26 + $0xea0] sm:$0xff]  ;;  %v837_v33 = vld [vmem:[%s6329_s26 + $0xeb0] sm:$0xff] }
 0x244   : > { %v5289_v49 = vpack.c.bf16 %v1590_v40, %v1588_v39  ;;  %v1603_v34 = vld [vmem:[%s6329_s26 + $0x26a0] sm:$0xff]  ;;  %v1605_v36 = vld [vmem:[%s6329_s26 + $0x26b0] sm:$0xff]  ;;  %v1608_v39 = vld [vmem:[%s6329_s26 + $0x26c8] sm:$0xff] }
 0x245   : > { %4500 = vmatpush1.bf16.msra.mxu1 %v4499_v45  ;;  %v4521_v45 = vpack.c.bf16 %v822_v38, %v820_v37  ;;  %v840_v37 = vld [vmem:[%s6329_s26 + $0xec8] sm:$0xff]  ;;  %v842_v38 = vld [vmem:[%s6329_s26 + $0xed8] sm:$0xff] }
 0x246   : > { %5268 = vmatpush1.bf16.msra.mxu0 %v5267_v46  ;;  %4502 = vmatprep.subr.bf16.mxu1 %v4501_v47  ;;  %v819_v46 = vld [vmem:[%s6329_s26 + $0xe20] sm:$0xff]  ;;  %v821_v47 = vld [vmem:[%s6329_s26 + $0xe30] sm:$0xff]  ;;  %v1610_v40 = vld [vmem:[%s6329_s26 + $0x26d8] sm:$0xff] }
 0x247   : > { %5270 = vmatprep.subr.bf16.mxu0 %v5269_v51  ;;  %v824_v51 = vld [vmem:[%s6329_s26 + $0xe48] sm:$0xff]  ;;  %v4523_v56 = vpack.c.bf16 %v821_v47, %v819_v46  ;;  %v1607_v46 = vld [vmem:[%s6329_s26 + $0x26c0] sm:$0xff]  ;;  %v5309_v47 = vpack.c.bf16 %v1610_v40, %v1608_v39 }
 0x248   : > { %v859_v40 = vld [vmem:[%s6329_s26 + $0xf60] sm:$0xff] }
 0x249   : > { %4504 = vmatpush1.bf16.msra.mxu1 %v4503_v57  ;;  %v356_v57 = vld [vmem:[%s6459_s27 + $0x138] sm:$0xff] }
 0x24a   : > { %5272 = vmatpush1.bf16.msra.mxu0 %v5271_v58  ;;  %4506 = vmatprep.subr.bf16.mxu1 %v4505_v59  ;;  %v5291_v58 = vpack.c.bf16 %v1589_v50, %v1587_v48  ;;  %v4525_v59 = vpack.c.bf16 %v826_v52, %v824_v51  ;;  %v1609_v48 = vld [vmem:[%s6329_s26 + $0x26d0] sm:$0xff]  ;;  %v846_v50 = vld [vmem:[%s6329_s26 + $0xef8] sm:$0xff]  ;;  %v1612_v51 = vld [vmem:[%s6329_s26 + $0x26e8] sm:$0xff] }
 0x24b   : > { %5274 = vmatprep.subr.bf16.mxu0 %v5273_v63  ;;  %v5293_v63 = vpack.c.bf16 %v1594_v54, %v1592_v53  ;;  %v1614_v52 = vld [vmem:[%s6329_s26 + $0x26f8] sm:$0xff]  ;;  %v5311_v54 = vpack.c.bf16 %v1609_v48, %v1607_v46 }
 0x24c   : > { %v866_v46 = vld [vmem:[%s6329_s26 + $0xf98] sm:$0xff] }
 0x24d   : > { %4508 = vmatpush1.bf16.msra.mxu1 %v4507_v5  ;;  %v4527_v5 = vpack.c.bf16 %v825_v61, %v823_v60  ;;  %v1613_v60 = vld [vmem:[%s6329_s26 + $0x26f0] sm:$0xff]  ;;  %v848_v61 = vld [vmem:[%s6329_s26 + $0xf08] sm:$0xff]  ;;  %v1634_v48 = vld [vmem:[%s6329_s26 + $0x2798] sm:$0xff] }
 0x24e   : > { %5276 = vmatpush1.bf16.msra.mxu0 %v5275_v6  ;;  %4510 = vmatprep.subr.bf16.mxu1 %v4509_v7  ;;  %v5295_v6 = vpack.c.bf16 %v1593_v0, %v1591_v62  ;;  %v4529_v7 = vpack.c.bf16 %v830_v2, %v828_v1  ;;  %v850_v62 = vld [vmem:[%s6329_s26 + $0xf18] sm:$0xff] }
 0x24f   : > { %5278 = vmatprep.subr.bf16.mxu0 %v5277_v11  ;;  %v5297_v11 = vpack.c.bf16 %v1598_v4, %v1596_v3  ;;  %v1618_v0 = vld [vmem:[%s6329_s26 + $0x2718] sm:$0xff]  ;;  %v4549_v3 = vpack.c.bf16 %v850_v62, %v848_v61  ;;  %v847_v4 = vld [vmem:[%s6329_s26 + $0xf00] sm:$0xff] }
 0x251   : > { %4512 = vmatpush1.bf16.msra.mxu1 %v4511_v17  ;;  %v4531_v17 = vpack.c.bf16 %v829_v9, %v827_v8  ;;  %v1617_v8 = vld [vmem:[%s6329_s26 + $0x2710] sm:$0xff]  ;;  %v852_v9 = vld [vmem:[%s6329_s26 + $0xf28] sm:$0xff] }
 0x252   : > { %5280 = vmatpush1.bf16.msra.mxu0 %v5279_v18  ;;  %4514 = vmatprep.subr.bf16.mxu1 %v4513_v19  ;;  %v5299_v18 = vpack.c.bf16 %v1597_v12, %v1595_v10  ;;  %v4533_v19 = vpack.c.bf16 %v834_v14, %v832_v13  ;;  %v854_v10 = vld [vmem:[%s6329_s26 + $0xf38] sm:$0xff] }
 0x253   : > { %5282 = vmatprep.subr.bf16.mxu0 %v5281_v23  ;;  %v5301_v23 = vpack.c.bf16 %v1602_v16, %v1600_v15  ;;  %v1622_v12 = vld [vmem:[%s6329_s26 + $0x2738] sm:$0xff]  ;;  %v4553_v15 = vpack.c.bf16 %v854_v10, %v852_v9  ;;  %v851_v16 = vld [vmem:[%s6329_s26 + $0xf20] sm:$0xff] }
 0x255   : > { %4516 = vmatpush1.bf16.msra.mxu1 %v4515_v29  ;;  %v4535_v29 = vpack.c.bf16 %v833_v21, %v831_v20  ;;  %v1621_v20 = vld [vmem:[%s6329_s26 + $0x2730] sm:$0xff]  ;;  %v856_v21 = vld [vmem:[%s6329_s26 + $0xf48] sm:$0xff] }
 0x256   : > { %5284 = vmatpush1.bf16.msra.mxu0 %v5283_v30  ;;  %4518 = vmatprep.subr.bf16.mxu1 %v4517_v31  ;;  %v5303_v30 = vpack.c.bf16 %v1601_v24, %v1599_v22  ;;  %v4537_v31 = vpack.c.bf16 %v838_v26, %v836_v25  ;;  %v858_v22 = vld [vmem:[%s6329_s26 + $0xf58] sm:$0xff] }
 0x257   : > { %5286 = vmatprep.subr.bf16.mxu0 %v5285_v35  ;;  %v5305_v35 = vpack.c.bf16 %v1606_v28, %v1604_v27  ;;  %v1626_v24 = vld [vmem:[%s6329_s26 + $0x2758] sm:$0xff]  ;;  %v4557_v27 = vpack.c.bf16 %v858_v22, %v856_v21  ;;  %v855_v28 = vld [vmem:[%s6329_s26 + $0xf40] sm:$0xff] }
 0x258   : > { %2460 = vmatmul.mubr.f32.vlgmr.msra.gmra.mrb[0].mxu1 %v329_v41  ;;  %v4539_v41 = vpack.c.bf16 %v837_v33, %v835_v32  ;;  %v1625_v32 = vld [vmem:[%s6329_s26 + $0x2750] sm:$0xff]  ;;  %v860_v33 = vld [vmem:[%s6329_s26 + $0xf68] sm:$0xff] }
 0x259   : > { %4520 = vmatpush1.bf16.msra.mxu1 %v4519_v42  ;;  %3312 = vmatmul.mubr.f32.vlgmr.msra.gmra.mrb[0].mxu0 %v353_v43  ;;  %v5307_v42 = vpack.c.bf16 %v1605_v36, %v1603_v34  ;;  %v4541_v43 = vpack.c.bf16 %v842_v38, %v840_v37  ;;  %v862_v34 = vld [vmem:[%s6329_s26 + $0xf78] sm:$0xff] }
 0x25a   : > { %5288 = vmatpush1.bf16.msra.mxu0 %v5287_v44  ;;  %4522 = vmatprep.subr.bf16.mxu1 %v4521_v45  ;;  %v839_v44 = vld [vmem:[%s6329_s26 + $0xec0] sm:$0xff]  ;;  %v841_v45 = vld [vmem:[%s6329_s26 + $0xed0] sm:$0xff]  ;;  %v1630_v36 = vld [vmem:[%s6329_s26 + $0x2778] sm:$0xff]  ;;  %v4561_v39 = vpack.c.bf16 %v862_v34, %v860_v33 }
 0x25b   : > { %5290 = vmatprep.subr.bf16.mxu0 %v5289_v49  ;;  %2530 = vmatprep.mubr.f32.mxu1 %v332_v55  ;;  %v844_v49 = vld [vmem:[%s6329_s26 + $0xee8] sm:$0xff]  ;;  %v4543_v53 = vpack.c.bf16 %v841_v45, %v839_v44  ;;  %v1629_v44 = vld [vmem:[%s6329_s26 + $0x2770] sm:$0xff] }
 0x25c   : > { %3382 = vmatprep.mubr.f32.mxu0 %v356_v57  ;;  %v4545_v55 = vpack.c.bf16 %v846_v50, %v844_v49  ;;  %v845_v57 = vld [vmem:[%s6329_s26 + $0xef0] sm:$0xff]  ;;  %v864_v45 = vld [vmem:[%s6329_s26 + $0xf88] sm:$0xff] }
 0x25d   : > { %4524 = vmatpush1.bf16.msra.mxu1 %v4523_v56  ;;  %v843_v56 = vld [vmem:[%s6329_s26 + $0xee0] sm:$0xff] }
 0x25e   : > { %5292 = vmatpush1.bf16.msra.mxu0 %v5291_v58  ;;  %4526 = vmatprep.subr.bf16.mxu1 %v4525_v59  ;;  %v1611_v58 = vld [vmem:[%s6329_s26 + $0x26e0] sm:$0xff]  ;;  %v5313_v59 = vpack.c.bf16 %v1614_v52, %v1612_v51  ;;  %v4547_v1 = vpack.c.bf16 %v845_v57, %v843_v56  ;;  %v4565_v51 = vpack.c.bf16 %v866_v46, %v864_v45  ;;  %v1633_v56 = vld [vmem:[%s6329_s26 + $0x2790] sm:$0xff]  ;;  %v868_v57 = vld [vmem:[%s6329_s26 + $0xfa8] sm:$0xff] }
 0x25f   : > { %5294 = vmatprep.subr.bf16.mxu0 %v5293_v63  ;;  %v1616_v63 = vld [vmem:[%s6329_s26 + $0x2708] sm:$0xff]  ;;  %v5315_v2 = vpack.c.bf16 %v1613_v60, %v1611_v58  ;;  %v863_v52 = vld [vmem:[%s6329_s26 + $0xf80] sm:$0xff]  ;;  %v870_v58 = vld [vmem:[%s6329_s26 + $0xfb8] sm:$0xff] }
 0x260   : > { %v1638_v60 = vld [vmem:[%s6329_s26 + $0x27b8] sm:$0xff]  ;;  %v331_v45 = vld [vmem:[%s6459_s27 + $0x70] sm:$0xff] }
 0x261   : > { %4528 = vmatpush1.bf16.msra.mxu1 %v4527_v5  ;;  %v849_v5 = vld [vmem:[%s6329_s26 + $0xf10] sm:$0xff] }
 0x262   : > { %5296 = vmatpush1.bf16.msra.mxu0 %v5295_v6  ;;  %4530 = vmatprep.subr.bf16.mxu1 %v4529_v7  ;;  %v1615_v6 = vld [vmem:[%s6329_s26 + $0x2700] sm:$0xff]  ;;  %v5317_v7 = vpack.c.bf16 %v1618_v0, %v1616_v63  ;;  %v4551_v13 = vpack.c.bf16 %v849_v5, %v847_v4  ;;  %v4569_v63 = vpack.c.bf16 %v870_v58, %v868_v57  ;;  %v1637_v4 = vld [vmem:[%s6329_s26 + $0x27b0] sm:$0xff]  ;;  %v872_v5 = vld [vmem:[%s6329_s26 + $0xfc8] sm:$0xff] }
 0x263   : > { %5298 = vmatprep.subr.bf16.mxu0 %v5297_v11  ;;  %v1620_v11 = vld [vmem:[%s6329_s26 + $0x2728] sm:$0xff]  ;;  %v5319_v14 = vpack.c.bf16 %v1617_v8, %v1615_v6  ;;  %v867_v0 = vld [vmem:[%s6329_s26 + $0xfa0] sm:$0xff]  ;;  %v874_v6 = vld [vmem:[%s6329_s26 + $0xfd8] sm:$0xff] }
 0x264   : > { %v1642_v8 = vld [vmem:[%s6329_s26 + $0x27d8] sm:$0xff]  ;;  %v1656_v57 = vld [vmem:[%s6329_s26 + $0x2848] sm:$0xff] }
 0x265   : > { %4532 = vmatpush1.bf16.msra.mxu1 %v4531_v17  ;;  %v853_v17 = vld [vmem:[%s6329_s26 + $0xf30] sm:$0xff]  ;;  %v1658_v58 = vld [vmem:[%s6329_s26 + $0x2858] sm:$0xff] }
 0x266   : > { %5300 = vmatpush1.bf16.msra.mxu0 %v5299_v18  ;;  %4534 = vmatprep.subr.bf16.mxu1 %v4533_v19  ;;  %v1619_v18 = vld [vmem:[%s6329_s26 + $0x2720] sm:$0xff]  ;;  %v5321_v19 = vpack.c.bf16 %v1622_v12, %v1620_v11  ;;  %v4555_v25 = vpack.c.bf16 %v853_v17, %v851_v16  ;;  %v4573_v11 = vpack.c.bf16 %v874_v6, %v872_v5  ;;  %v1641_v16 = vld [vmem:[%s6329_s26 + $0x27d0] sm:$0xff]  ;;  %v876_v17 = vld [vmem:[%s6329_s26 + $0xfe8] sm:$0xff] }
 0x267   : > { %5302 = vmatprep.subr.bf16.mxu0 %v5301_v23  ;;  %v1624_v23 = vld [vmem:[%s6329_s26 + $0x2748] sm:$0xff]  ;;  %v5323_v26 = vpack.c.bf16 %v1621_v20, %v1619_v18  ;;  %v871_v12 = vld [vmem:[%s6329_s26 + $0xfc0] sm:$0xff]  ;;  %v878_v18 = vld [vmem:[%s6329_s26 + $0xff8] sm:$0xff] }
 0x268   : > { %v1646_v20 = vld [vmem:[%s6329_s26 + $0x27f8] sm:$0xff]  ;;  %v892_v5 = vld [vmem:[%s6329_s26 + $0x1068] sm:$0xff] }
 0x269   : > { %4536 = vmatpush1.bf16.msra.mxu1 %v4535_v29  ;;  %v857_v29 = vld [vmem:[%s6329_s26 + $0xf50] sm:$0xff]  ;;  %v894_v6 = vld [vmem:[%s6329_s26 + $0x1078] sm:$0xff] }
 0x26a   : > { %5304 = vmatpush1.bf16.msra.mxu0 %v5303_v30  ;;  %4538 = vmatprep.subr.bf16.mxu1 %v4537_v31  ;;  %v1623_v30 = vld [vmem:[%s6329_s26 + $0x2740] sm:$0xff]  ;;  %v5325_v31 = vpack.c.bf16 %v1626_v24, %v1624_v23  ;;  %v4559_v37 = vpack.c.bf16 %v857_v29, %v855_v28  ;;  %v4577_v23 = vpack.c.bf16 %v878_v18, %v876_v17  ;;  %v1645_v28 = vld [vmem:[%s6329_s26 + $0x27f0] sm:$0xff]  ;;  %v880_v29 = vld [vmem:[%s6329_s26 + $0x1008] sm:$0xff] }
 0x26b   : > { %5306 = vmatprep.subr.bf16.mxu0 %v5305_v35  ;;  %v1628_v35 = vld [vmem:[%s6329_s26 + $0x2768] sm:$0xff]  ;;  %v5327_v38 = vpack.c.bf16 %v1625_v32, %v1623_v30  ;;  %v875_v24 = vld [vmem:[%s6329_s26 + $0xfe0] sm:$0xff]  ;;  %v882_v30 = vld [vmem:[%s6329_s26 + $0x1018] sm:$0xff] }
 0x26c   : > { %v1650_v32 = vld [vmem:[%s6329_s26 + $0x2818] sm:$0xff]  ;;  %v896_v17 = vld [vmem:[%s6329_s26 + $0x1088] sm:$0xff] }
 0x26d   : > { %4540 = vmatpush1.bf16.msra.mxu1 %v4539_v41  ;;  %v861_v41 = vld [vmem:[%s6329_s26 + $0xf70] sm:$0xff]  ;;  %v898_v18 = vld [vmem:[%s6329_s26 + $0x1098] sm:$0xff] }
 0x26e   : > { %5308 = vmatpush1.bf16.msra.mxu0 %v5307_v42  ;;  %4542 = vmatprep.subr.bf16.mxu1 %v4541_v43  ;;  %v1627_v42 = vld [vmem:[%s6329_s26 + $0x2760] sm:$0xff]  ;;  %v5329_v43 = vpack.c.bf16 %v1630_v36, %v1628_v35  ;;  %v4563_v49 = vpack.c.bf16 %v861_v41, %v859_v40  ;;  %v4581_v35 = vpack.c.bf16 %v882_v30, %v880_v29  ;;  %v1649_v40 = vld [vmem:[%s6329_s26 + $0x2810] sm:$0xff]  ;;  %v884_v41 = vld [vmem:[%s6329_s26 + $0x1028] sm:$0xff] }
 0x26f   : > { %5310 = vmatprep.subr.bf16.mxu0 %v5309_v47  ;;  %v1632_v47 = vld [vmem:[%s6329_s26 + $0x2788] sm:$0xff]  ;;  %v5331_v50 = vpack.c.bf16 %v1629_v44, %v1627_v42  ;;  %v879_v36 = vld [vmem:[%s6329_s26 + $0x1000] sm:$0xff]  ;;  %v886_v42 = vld [vmem:[%s6329_s26 + $0x1038] sm:$0xff] }
 0x270   : > { %v1654_v44 = vld [vmem:[%s6329_s26 + $0x2838] sm:$0xff]  ;;  %v900_v29 = vld [vmem:[%s6329_s26 + $0x10a8] sm:$0xff] }
 0x271   : > { %4544 = vmatpush1.bf16.msra.mxu1 %v4543_v53  ;;  %v865_v53 = vld [vmem:[%s6329_s26 + $0xf90] sm:$0xff]  ;;  %v902_v30 = vld [vmem:[%s6329_s26 + $0x10b8] sm:$0xff] }
 0x272   : > { %5312 = vmatpush1.bf16.msra.mxu0 %v5311_v54  ;;  %4546 = vmatprep.subr.bf16.mxu1 %v4545_v55  ;;  %v1631_v54 = vld [vmem:[%s6329_s26 + $0x2780] sm:$0xff]  ;;  %v5333_v55 = vpack.c.bf16 %v1634_v48, %v1632_v47  ;;  %v4567_v61 = vpack.c.bf16 %v865_v53, %v863_v52 }
 0x273   : > { %5314 = vmatprep.subr.bf16.mxu0 %v5313_v59  ;;  %v1636_v59 = vld [vmem:[%s6329_s26 + $0x27a8] sm:$0xff]  ;;  %v5335_v62 = vpack.c.bf16 %v1633_v56, %v1631_v54  ;;  %v355_v47 = vld [vmem:[%s6459_s27 + $0x130] sm:$0xff]  ;;  %v1653_v54 = vld [vmem:[%s6329_s26 + $0x2830] sm:$0xff] }
 0x274   : > { %v1651_v52 = vld [vmem:[%s6329_s26 + $0x2820] sm:$0xff]  ;;  %v890_v56 = vld [vmem:[%s6329_s26 + $0x1058] sm:$0xff] }
 0x275   : > { %4548 = vmatpush1.bf16.msra.mxu1 %v4547_v1  ;;  %v869_v1 = vld [vmem:[%s6329_s26 + $0xfb0] sm:$0xff] }
 0x276   : > { %5316 = vmatpush1.bf16.msra.mxu0 %v5315_v2  ;;  %4550 = vmatprep.subr.bf16.mxu1 %v4549_v3  ;;  %v1635_v2 = vld [vmem:[%s6329_s26 + $0x27a0] sm:$0xff]  ;;  %v5337_v3 = vpack.c.bf16 %v1638_v60, %v1636_v59  ;;  %v4571_v9 = vpack.c.bf16 %v869_v1, %v867_v0  ;;  %v334_v59 = vld [vmem:[%s6459_s27 + $0x88] sm:$0xff]  ;;  %v889_v1 = vld [vmem:[%s6329_s26 + $0x1050] sm:$0xff] }
 0x277   : > { %5318 = vmatprep.subr.bf16.mxu0 %v5317_v7  ;;  %v1640_v7 = vld [vmem:[%s6329_s26 + $0x27c8] sm:$0xff]  ;;  %v5339_v10 = vpack.c.bf16 %v1637_v4, %v1635_v2  ;;  %v887_v0 = vld [vmem:[%s6329_s26 + $0x1040] sm:$0xff]  ;;  %v1657_v4 = vld [vmem:[%s6329_s26 + $0x2850] sm:$0xff] }
 0x278   : > { %v1655_v2 = vld [vmem:[%s6329_s26 + $0x2840] sm:$0xff] }
 0x279   : > { %4552 = vmatpush1.bf16.msra.mxu1 %v4551_v13  ;;  %v873_v13 = vld [vmem:[%s6329_s26 + $0xfd0] sm:$0xff] }
 0x27a   : > { %5320 = vmatpush1.bf16.msra.mxu0 %v5319_v14  ;;  %4554 = vmatprep.subr.bf16.mxu1 %v4553_v15  ;;  %v1639_v14 = vld [vmem:[%s6329_s26 + $0x27c0] sm:$0xff]  ;;  %v5341_v15 = vpack.c.bf16 %v1642_v8, %v1640_v7  ;;  %v4575_v21 = vpack.c.bf16 %v873_v13, %v871_v12  ;;  %v1660_v7 = vld [vmem:[%s6329_s26 + $0x2868] sm:$0xff]  ;;  %v1662_v8 = vld [vmem:[%s6329_s26 + $0x2878] sm:$0xff] }
 0x27b   : > { %5322 = vmatprep.subr.bf16.mxu0 %v5321_v19  ;;  %v1644_v19 = vld [vmem:[%s6329_s26 + $0x27e8] sm:$0xff]  ;;  %v5343_v22 = vpack.c.bf16 %v1641_v16, %v1639_v14  ;;  %v891_v12 = vld [vmem:[%s6329_s26 + $0x1060] sm:$0xff]  ;;  %v893_v13 = vld [vmem:[%s6329_s26 + $0x1070] sm:$0xff] }
 0x27c   : > { %v1659_v14 = vld [vmem:[%s6329_s26 + $0x2860] sm:$0xff]  ;;  %v1661_v16 = vld [vmem:[%s6329_s26 + $0x2870] sm:$0xff] }
 0x27d   : > { %4556 = vmatpush1.bf16.msra.mxu1 %v4555_v25  ;;  %v877_v25 = vld [vmem:[%s6329_s26 + $0xff0] sm:$0xff] }
 0x27e   : > { %5324 = vmatpush1.bf16.msra.mxu0 %v5323_v26  ;;  %4558 = vmatprep.subr.bf16.mxu1 %v4557_v27  ;;  %v1643_v26 = vld [vmem:[%s6329_s26 + $0x27e0] sm:$0xff]  ;;  %v5345_v27 = vpack.c.bf16 %v1646_v20, %v1644_v19  ;;  %v4579_v33 = vpack.c.bf16 %v877_v25, %v875_v24  ;;  %v1664_v19 = vld [vmem:[%s6329_s26 + $0x2888] sm:$0xff]  ;;  %v1666_v20 = vld [vmem:[%s6329_s26 + $0x2898] sm:$0xff] }
 0x27f   : > { %5326 = vmatprep.subr.bf16.mxu0 %v5325_v31  ;;  %v1648_v31 = vld [vmem:[%s6329_s26 + $0x2808] sm:$0xff]  ;;  %v5347_v34 = vpack.c.bf16 %v1645_v28, %v1643_v26  ;;  %v895_v24 = vld [vmem:[%s6329_s26 + $0x1080] sm:$0xff]  ;;  %v897_v25 = vld [vmem:[%s6329_s26 + $0x1090] sm:$0xff] }
 0x280   : > { %v1663_v26 = vld [vmem:[%s6329_s26 + $0x2880] sm:$0xff]  ;;  %v1665_v28 = vld [vmem:[%s6329_s26 + $0x2890] sm:$0xff] }
 0x281   : > { %4560 = vmatpush1.bf16.msra.mxu1 %v4559_v37  ;;  %v881_v37 = vld [vmem:[%s6329_s26 + $0x1010] sm:$0xff] }
 0x282   : > { %5328 = vmatpush1.bf16.msra.mxu0 %v5327_v38  ;;  %4562 = vmatprep.subr.bf16.mxu1 %v4561_v39  ;;  %v1647_v38 = vld [vmem:[%s6329_s26 + $0x2800] sm:$0xff]  ;;  %v5349_v39 = vpack.c.bf16 %v1650_v32, %v1648_v31  ;;  %v4583_v46 = vpack.c.bf16 %v881_v37, %v879_v36  ;;  %v1668_v31 = vld [vmem:[%s6329_s26 + $0x28a8] sm:$0xff]  ;;  %v1670_v32 = vld [vmem:[%s6329_s26 + $0x28b8] sm:$0xff] }
 0x283   : > { %5330 = vmatprep.subr.bf16.mxu0 %v5329_v43  ;;  %v1652_v43 = vld [vmem:[%s6329_s26 + $0x2828] sm:$0xff]  ;;  %v5351_v48 = vpack.c.bf16 %v1649_v40, %v1647_v38  ;;  %v899_v36 = vld [vmem:[%s6329_s26 + $0x10a0] sm:$0xff]  ;;  %v901_v37 = vld [vmem:[%s6329_s26 + $0x10b0] sm:$0xff] }
 0x284   : > { %v5353_v53 = vpack.c.bf16 %v1654_v44, %v1652_v43  ;;  %v1667_v38 = vld [vmem:[%s6329_s26 + $0x28a0] sm:$0xff]  ;;  %v1669_v40 = vld [vmem:[%s6329_s26 + $0x28b0] sm:$0xff]  ;;  %v1672_v43 = vld [vmem:[%s6329_s26 + $0x28c8] sm:$0xff] }
 0x285   : > { %4564 = vmatpush1.bf16.msra.mxu1 %v4563_v49  ;;  %v4585_v49 = vpack.c.bf16 %v886_v42, %v884_v41  ;;  %v904_v41 = vld [vmem:[%s6329_s26 + $0x10c8] sm:$0xff]  ;;  %v906_v42 = vld [vmem:[%s6329_s26 + $0x10d8] sm:$0xff] }
 0x286   : > { %5332 = vmatpush1.bf16.msra.mxu0 %v5331_v50  ;;  %4566 = vmatprep.subr.bf16.mxu1 %v4565_v51  ;;  %v883_v50 = vld [vmem:[%s6329_s26 + $0x1020] sm:$0xff]  ;;  %v885_v51 = vld [vmem:[%s6329_s26 + $0x1030] sm:$0xff]  ;;  %v1674_v44 = vld [vmem:[%s6329_s26 + $0x28d8] sm:$0xff] }
 0x287   : > { %5334 = vmatprep.subr.bf16.mxu0 %v5333_v55  ;;  %v888_v55 = vld [vmem:[%s6329_s26 + $0x1048] sm:$0xff]  ;;  %v4587_v60 = vpack.c.bf16 %v885_v51, %v883_v50  ;;  %v1671_v50 = vld [vmem:[%s6329_s26 + $0x28c0] sm:$0xff]  ;;  %v5373_v51 = vpack.c.bf16 %v1674_v44, %v1672_v43 }
 0x288   : > { %v923_v44 = vld [vmem:[%s6329_s26 + $0x1160] sm:$0xff] }
 0x289   : > { %4568 = vmatpush1.bf16.msra.mxu1 %v4567_v61  ;;  %v358_v61 = vld [vmem:[%s6459_s27 + $0x148] sm:$0xff] }
 0x28a   : > { %5336 = vmatpush1.bf16.msra.mxu0 %v5335_v62  ;;  %4570 = vmatprep.subr.bf16.mxu1 %v4569_v63  ;;  %v5355_v62 = vpack.c.bf16 %v1653_v54, %v1651_v52  ;;  %v4589_v63 = vpack.c.bf16 %v890_v56, %v888_v55  ;;  %v1673_v52 = vld [vmem:[%s6329_s26 + $0x28d0] sm:$0xff]  ;;  %v910_v54 = vld [vmem:[%s6329_s26 + $0x10f8] sm:$0xff]  ;;  %v1676_v55 = vld [vmem:[%s6329_s26 + $0x28e8] sm:$0xff] }
 0x28b   : > { %5338 = vmatprep.subr.bf16.mxu0 %v5337_v3  ;;  %v5357_v3 = vpack.c.bf16 %v1658_v58, %v1656_v57  ;;  %v1678_v56 = vld [vmem:[%s6329_s26 + $0x28f8] sm:$0xff]  ;;  %v5375_v58 = vpack.c.bf16 %v1673_v52, %v1671_v50 }
 0x28c   : > { %v930_v50 = vld [vmem:[%s6329_s26 + $0x1198] sm:$0xff] }
 0x28d   : > { %4572 = vmatpush1.bf16.msra.mxu1 %v4571_v9  ;;  %v4591_v9 = vpack.c.bf16 %v889_v1, %v887_v0  ;;  %v1677_v0 = vld [vmem:[%s6329_s26 + $0x28f0] sm:$0xff]  ;;  %v912_v1 = vld [vmem:[%s6329_s26 + $0x1108] sm:$0xff]  ;;  %v1698_v52 = vld [vmem:[%s6329_s26 + $0x2998] sm:$0xff] }
 0x28e   : > { %5340 = vmatpush1.bf16.msra.mxu0 %v5339_v10  ;;  %4574 = vmatprep.subr.bf16.mxu1 %v4573_v11  ;;  %v5359_v10 = vpack.c.bf16 %v1657_v4, %v1655_v2  ;;  %v4593_v11 = vpack.c.bf16 %v894_v6, %v892_v5  ;;  %v914_v2 = vld [vmem:[%s6329_s26 + $0x1118] sm:$0xff] }
 0x28f   : > { %5342 = vmatprep.subr.bf16.mxu0 %v5341_v15  ;;  %v5361_v15 = vpack.c.bf16 %v1662_v8, %v1660_v7  ;;  %v1682_v4 = vld [vmem:[%s6329_s26 + $0x2918] sm:$0xff]  ;;  %v4613_v7 = vpack.c.bf16 %v914_v2, %v912_v1  ;;  %v911_v8 = vld [vmem:[%s6329_s26 + $0x1100] sm:$0xff] }
 0x291   : > { %4576 = vmatpush1.bf16.msra.mxu1 %v4575_v21  ;;  %v4595_v21 = vpack.c.bf16 %v893_v13, %v891_v12  ;;  %v1681_v12 = vld [vmem:[%s6329_s26 + $0x2910] sm:$0xff]  ;;  %v916_v13 = vld [vmem:[%s6329_s26 + $0x1128] sm:$0xff] }
 0x292   : > { %5344 = vmatpush1.bf16.msra.mxu0 %v5343_v22  ;;  %4578 = vmatprep.subr.bf16.mxu1 %v4577_v23  ;;  %v5363_v22 = vpack.c.bf16 %v1661_v16, %v1659_v14  ;;  %v4597_v23 = vpack.c.bf16 %v898_v18, %v896_v17  ;;  %v918_v14 = vld [vmem:[%s6329_s26 + $0x1138] sm:$0xff] }
 0x293   : > { %5346 = vmatprep.subr.bf16.mxu0 %v5345_v27  ;;  %v5365_v27 = vpack.c.bf16 %v1666_v20, %v1664_v19  ;;  %v1686_v16 = vld [vmem:[%s6329_s26 + $0x2938] sm:$0xff]  ;;  %v4617_v19 = vpack.c.bf16 %v918_v14, %v916_v13  ;;  %v915_v20 = vld [vmem:[%s6329_s26 + $0x1120] sm:$0xff] }
 0x295   : > { %4580 = vmatpush1.bf16.msra.mxu1 %v4579_v33  ;;  %v4599_v33 = vpack.c.bf16 %v897_v25, %v895_v24  ;;  %v1685_v24 = vld [vmem:[%s6329_s26 + $0x2930] sm:$0xff]  ;;  %v920_v25 = vld [vmem:[%s6329_s26 + $0x1148] sm:$0xff] }
 0x296   : > { %5348 = vmatpush1.bf16.msra.mxu0 %v5347_v34  ;;  %4582 = vmatprep.subr.bf16.mxu1 %v4581_v35  ;;  %v5367_v34 = vpack.c.bf16 %v1665_v28, %v1663_v26  ;;  %v4601_v35 = vpack.c.bf16 %v902_v30, %v900_v29  ;;  %v922_v26 = vld [vmem:[%s6329_s26 + $0x1158] sm:$0xff] }
 0x297   : > { %5350 = vmatprep.subr.bf16.mxu0 %v5349_v39  ;;  %v5369_v39 = vpack.c.bf16 %v1670_v32, %v1668_v31  ;;  %v1690_v28 = vld [vmem:[%s6329_s26 + $0x2958] sm:$0xff]  ;;  %v4621_v31 = vpack.c.bf16 %v922_v26, %v920_v25  ;;  %v919_v32 = vld [vmem:[%s6329_s26 + $0x1140] sm:$0xff] }
 0x298   : > { %2531 = vmatmul.mubr.f32.vlgmr.msra.gmra.mrb[0].mxu1 %v331_v45  ;;  %v4603_v45 = vpack.c.bf16 %v901_v37, %v899_v36  ;;  %v1689_v36 = vld [vmem:[%s6329_s26 + $0x2950] sm:$0xff]  ;;  %v924_v37 = vld [vmem:[%s6329_s26 + $0x1168] sm:$0xff] }
 0x299   : > { %4584 = vmatpush1.bf16.msra.mxu1 %v4583_v46  ;;  %3383 = vmatmul.mubr.f32.vlgmr.msra.gmra.mrb[0].mxu0 %v355_v47  ;;  %v5371_v46 = vpack.c.bf16 %v1669_v40, %v1667_v38  ;;  %v4605_v47 = vpack.c.bf16 %v906_v42, %v904_v41  ;;  %v926_v38 = vld [vmem:[%s6329_s26 + $0x1178] sm:$0xff] }
 0x29a   : > { %5352 = vmatpush1.bf16.msra.mxu0 %v5351_v48  ;;  %4586 = vmatprep.subr.bf16.mxu1 %v4585_v49  ;;  %v903_v48 = vld [vmem:[%s6329_s26 + $0x10c0] sm:$0xff]  ;;  %v905_v49 = vld [vmem:[%s6329_s26 + $0x10d0] sm:$0xff]  ;;  %v1694_v40 = vld [vmem:[%s6329_s26 + $0x2978] sm:$0xff]  ;;  %v4625_v43 = vpack.c.bf16 %v926_v38, %v924_v37 }
 0x29b   : > { %5354 = vmatprep.subr.bf16.mxu0 %v5353_v53  ;;  %2601 = vmatprep.mubr.f32.mxu1 %v334_v59  ;;  %v908_v53 = vld [vmem:[%s6329_s26 + $0x10e8] sm:$0xff]  ;;  %v4607_v57 = vpack.c.bf16 %v905_v49, %v903_v48  ;;  %v1693_v48 = vld [vmem:[%s6329_s26 + $0x2970] sm:$0xff] }
 0x29c   : > { %3453 = vmatprep.mubr.f32.mxu0 %v358_v61  ;;  %v4609_v59 = vpack.c.bf16 %v910_v54, %v908_v53  ;;  %v909_v61 = vld [vmem:[%s6329_s26 + $0x10f0] sm:$0xff]  ;;  %v928_v49 = vld [vmem:[%s6329_s26 + $0x1188] sm:$0xff] }
 0x29d   : > { %4588 = vmatpush1.bf16.msra.mxu1 %v4587_v60  ;;  %v907_v60 = vld [vmem:[%s6329_s26 + $0x10e0] sm:$0xff] }
 0x29e   : > { %5356 = vmatpush1.bf16.msra.mxu0 %v5355_v62  ;;  %4590 = vmatprep.subr.bf16.mxu1 %v4589_v63  ;;  %v1675_v62 = vld [vmem:[%s6329_s26 + $0x28e0] sm:$0xff]  ;;  %v5377_v63 = vpack.c.bf16 %v1678_v56, %v1676_v55  ;;  %v4611_v5 = vpack.c.bf16 %v909_v61, %v907_v60  ;;  %v4629_v55 = vpack.c.bf16 %v930_v50, %v928_v49  ;;  %v1697_v60 = vld [vmem:[%s6329_s26 + $0x2990] sm:$0xff]  ;;  %v932_v61 = vld [vmem:[%s6329_s26 + $0x11a8] sm:$0xff] }
 0x29f   : > { %5358 = vmatprep.subr.bf16.mxu0 %v5357_v3  ;;  %v1680_v3 = vld [vmem:[%s6329_s26 + $0x2908] sm:$0xff]  ;;  %v5379_v6 = vpack.c.bf16 %v1677_v0, %v1675_v62  ;;  %v927_v56 = vld [vmem:[%s6329_s26 + $0x1180] sm:$0xff]  ;;  %v934_v62 = vld [vmem:[%s6329_s26 + $0x11b8] sm:$0xff] }
 0x2a0   : > { %v1702_v0 = vld [vmem:[%s6329_s26 + $0x29b8] sm:$0xff]  ;;  %v333_v49 = vld [vmem:[%s6459_s27 + $0x80] sm:$0xff] }
 0x2a1   : > { %4592 = vmatpush1.bf16.msra.mxu1 %v4591_v9  ;;  %v913_v9 = vld [vmem:[%s6329_s26 + $0x1110] sm:$0xff] }
 0x2a2   : > { %5360 = vmatpush1.bf16.msra.mxu0 %v5359_v10  ;;  %4594 = vmatprep.subr.bf16.mxu1 %v4593_v11  ;;  %v1679_v10 = vld [vmem:[%s6329_s26 + $0x2900] sm:$0xff]  ;;  %v5381_v11 = vpack.c.bf16 %v1682_v4, %v1680_v3  ;;  %v4615_v17 = vpack.c.bf16 %v913_v9, %v911_v8  ;;  %v4633_v3 = vpack.c.bf16 %v934_v62, %v932_v61  ;;  %v1701_v8 = vld [vmem:[%s6329_s26 + $0x29b0] sm:$0xff]  ;;  %v936_v9 = vld [vmem:[%s6329_s26 + $0x11c8] sm:$0xff] }
 0x2a3   : > { %5362 = vmatprep.subr.bf16.mxu0 %v5361_v15  ;;  %v1684_v15 = vld [vmem:[%s6329_s26 + $0x2928] sm:$0xff]  ;;  %v5383_v18 = vpack.c.bf16 %v1681_v12, %v1679_v10  ;;  %v931_v4 = vld [vmem:[%s6329_s26 + $0x11a0] sm:$0xff]  ;;  %v938_v10 = vld [vmem:[%s6329_s26 + $0x11d8] sm:$0xff] }
 0x2a4   : > { %v1706_v12 = vld [vmem:[%s6329_s26 + $0x29d8] sm:$0xff]  ;;  %v1720_v61 = vld [vmem:[%s6329_s26 + $0x2a48] sm:$0xff] }
 0x2a5   : > { %4596 = vmatpush1.bf16.msra.mxu1 %v4595_v21  ;;  %v917_v21 = vld [vmem:[%s6329_s26 + $0x1130] sm:$0xff]  ;;  %v1722_v62 = vld [vmem:[%s6329_s26 + $0x2a58] sm:$0xff] }
 0x2a6   : > { %5364 = vmatpush1.bf16.msra.mxu0 %v5363_v22  ;;  %4598 = vmatprep.subr.bf16.mxu1 %v4597_v23  ;;  %v1683_v22 = vld [vmem:[%s6329_s26 + $0x2920] sm:$0xff]  ;;  %v5385_v23 = vpack.c.bf16 %v1686_v16, %v1684_v15  ;;  %v4619_v29 = vpack.c.bf16 %v917_v21, %v915_v20  ;;  %v4637_v15 = vpack.c.bf16 %v938_v10, %v936_v9  ;;  %v1705_v20 = vld [vmem:[%s6329_s26 + $0x29d0] sm:$0xff]  ;;  %v940_v21 = vld [vmem:[%s6329_s26 + $0x11e8] sm:$0xff] }
 0x2a7   : > { %5366 = vmatprep.subr.bf16.mxu0 %v5365_v27  ;;  %v1688_v27 = vld [vmem:[%s6329_s26 + $0x2948] sm:$0xff]  ;;  %v5387_v30 = vpack.c.bf16 %v1685_v24, %v1683_v22  ;;  %v935_v16 = vld [vmem:[%s6329_s26 + $0x11c0] sm:$0xff]  ;;  %v942_v22 = vld [vmem:[%s6329_s26 + $0x11f8] sm:$0xff] }
 0x2a8   : > { %v1710_v24 = vld [vmem:[%s6329_s26 + $0x29f8] sm:$0xff]  ;;  %v956_v9 = vld [vmem:[%s6329_s26 + $0x1268] sm:$0xff] }
 0x2a9   : > { %4600 = vmatpush1.bf16.msra.mxu1 %v4599_v33  ;;  %v921_v33 = vld [vmem:[%s6329_s26 + $0x1150] sm:$0xff]  ;;  %v958_v10 = vld [vmem:[%s6329_s26 + $0x1278] sm:$0xff] }
 0x2aa   : > { %5368 = vmatpush1.bf16.msra.mxu0 %v5367_v34  ;;  %4602 = vmatprep.subr.bf16.mxu1 %v4601_v35  ;;  %v1687_v34 = vld [vmem:[%s6329_s26 + $0x2940] sm:$0xff]  ;;  %v5389_v35 = vpack.c.bf16 %v1690_v28, %v1688_v27  ;;  %v4623_v41 = vpack.c.bf16 %v921_v33, %v919_v32  ;;  %v4641_v27 = vpack.c.bf16 %v942_v22, %v940_v21  ;;  %v1709_v32 = vld [vmem:[%s6329_s26 + $0x29f0] sm:$0xff]  ;;  %v944_v33 = vld [vmem:[%s6329_s26 + $0x1208] sm:$0xff] }
 0x2ab   : > { %5370 = vmatprep.subr.bf16.mxu0 %v5369_v39  ;;  %v1692_v39 = vld [vmem:[%s6329_s26 + $0x2968] sm:$0xff]  ;;  %v5391_v42 = vpack.c.bf16 %v1689_v36, %v1687_v34  ;;  %v939_v28 = vld [vmem:[%s6329_s26 + $0x11e0] sm:$0xff]  ;;  %v946_v34 = vld [vmem:[%s6329_s26 + $0x1218] sm:$0xff] }
 0x2ac   : > { %v1714_v36 = vld [vmem:[%s6329_s26 + $0x2a18] sm:$0xff]  ;;  %v960_v21 = vld [vmem:[%s6329_s26 + $0x1288] sm:$0xff] }
 0x2ad   : > { %4604 = vmatpush1.bf16.msra.mxu1 %v4603_v45  ;;  %v925_v45 = vld [vmem:[%s6329_s26 + $0x1170] sm:$0xff]  ;;  %v962_v22 = vld [vmem:[%s6329_s26 + $0x1298] sm:$0xff] }
 0x2ae   : > { %5372 = vmatpush1.bf16.msra.mxu0 %v5371_v46  ;;  %4606 = vmatprep.subr.bf16.mxu1 %v4605_v47  ;;  %v1691_v46 = vld [vmem:[%s6329_s26 + $0x2960] sm:$0xff]  ;;  %v5393_v47 = vpack.c.bf16 %v1694_v40, %v1692_v39  ;;  %v4627_v53 = vpack.c.bf16 %v925_v45, %v923_v44  ;;  %v4645_v39 = vpack.c.bf16 %v946_v34, %v944_v33  ;;  %v1713_v44 = vld [vmem:[%s6329_s26 + $0x2a10] sm:$0xff]  ;;  %v948_v45 = vld [vmem:[%s6329_s26 + $0x1228] sm:$0xff] }
 0x2af   : > { %5374 = vmatprep.subr.bf16.mxu0 %v5373_v51  ;;  %v1696_v51 = vld [vmem:[%s6329_s26 + $0x2988] sm:$0xff]  ;;  %v5395_v54 = vpack.c.bf16 %v1693_v48, %v1691_v46  ;;  %v943_v40 = vld [vmem:[%s6329_s26 + $0x1200] sm:$0xff]  ;;  %v950_v46 = vld [vmem:[%s6329_s26 + $0x1238] sm:$0xff] }
 0x2b0   : > { %v1718_v48 = vld [vmem:[%s6329_s26 + $0x2a38] sm:$0xff]  ;;  %v964_v33 = vld [vmem:[%s6329_s26 + $0x12a8] sm:$0xff] }
 0x2b1   : > { %4608 = vmatpush1.bf16.msra.mxu1 %v4607_v57  ;;  %v929_v57 = vld [vmem:[%s6329_s26 + $0x1190] sm:$0xff]  ;;  %v966_v34 = vld [vmem:[%s6329_s26 + $0x12b8] sm:$0xff] }
 0x2b2   : > { %5376 = vmatpush1.bf16.msra.mxu0 %v5375_v58  ;;  %4610 = vmatprep.subr.bf16.mxu1 %v4609_v59  ;;  %v1695_v58 = vld [vmem:[%s6329_s26 + $0x2980] sm:$0xff]  ;;  %v5397_v59 = vpack.c.bf16 %v1698_v52, %v1696_v51  ;;  %v4631_v1 = vpack.c.bf16 %v929_v57, %v927_v56  ;;  %v357_v51 = vld [vmem:[%s6459_s27 + $0x140] sm:$0xff] }
 0x2b3   : > { %5378 = vmatprep.subr.bf16.mxu0 %v5377_v63  ;;  %v1700_v63 = vld [vmem:[%s6329_s26 + $0x29a8] sm:$0xff]  ;;  %v5399_v2 = vpack.c.bf16 %v1697_v60, %v1695_v58  ;;  %v1715_v56 = vld [vmem:[%s6329_s26 + $0x2a20] sm:$0xff]  ;;  %v1717_v58 = vld [vmem:[%s6329_s26 + $0x2a30] sm:$0xff] }
 0x2b4   : > { %v954_v60 = vld [vmem:[%s6329_s26 + $0x1258] sm:$0xff] }
 0x2b5   : > { %4612 = vmatpush1.bf16.msra.mxu1 %v4611_v5  ;;  %v933_v5 = vld [vmem:[%s6329_s26 + $0x11b0] sm:$0xff] }
 0x2b6   : > { %5380 = vmatpush1.bf16.msra.mxu0 %v5379_v6  ;;  %4614 = vmatprep.subr.bf16.mxu1 %v4613_v7  ;;  %v1699_v6 = vld [vmem:[%s6329_s26 + $0x29a0] sm:$0xff]  ;;  %v5401_v7 = vpack.c.bf16 %v1702_v0, %v1700_v63  ;;  %v4635_v13 = vpack.c.bf16 %v933_v5, %v931_v4  ;;  %v336_v63 = vld [vmem:[%s6459_s27 + $0x98] sm:$0xff]  ;;  %v953_v5 = vld [vmem:[%s6329_s26 + $0x1250] sm:$0xff] }
 0x2b7   : > { %5382 = vmatprep.subr.bf16.mxu0 %v5381_v11  ;;  %v1704_v11 = vld [vmem:[%s6329_s26 + $0x29c8] sm:$0xff]  ;;  %v5403_v14 = vpack.c.bf16 %v1701_v8, %v1699_v6  ;;  %v951_v4 = vld [vmem:[%s6329_s26 + $0x1240] sm:$0xff]  ;;  %v1721_v8 = vld [vmem:[%s6329_s26 + $0x2a50] sm:$0xff] }
 0x2b8   : > { %v1719_v6 = vld [vmem:[%s6329_s26 + $0x2a40] sm:$0xff] }
 0x2b9   : > { %4616 = vmatpush1.bf16.msra.mxu1 %v4615_v17  ;;  %v937_v17 = vld [vmem:[%s6329_s26 + $0x11d0] sm:$0xff] }
 0x2ba   : > { %5384 = vmatpush1.bf16.msra.mxu0 %v5383_v18  ;;  %4618 = vmatprep.subr.bf16.mxu1 %v4617_v19  ;;  %v1703_v18 = vld [vmem:[%s6329_s26 + $0x29c0] sm:$0xff]  ;;  %v5405_v19 = vpack.c.bf16 %v1706_v12, %v1704_v11  ;;  %v4639_v25 = vpack.c.bf16 %v937_v17, %v935_v16  ;;  %v1724_v11 = vld [vmem:[%s6329_s26 + $0x2a68] sm:$0xff]  ;;  %v1726_v12 = vld [vmem:[%s6329_s26 + $0x2a78] sm:$0xff] }
 0x2bb   : > { %5386 = vmatprep.subr.bf16.mxu0 %v5385_v23  ;;  %v1708_v23 = vld [vmem:[%s6329_s26 + $0x29e8] sm:$0xff]  ;;  %v5407_v26 = vpack.c.bf16 %v1705_v20, %v1703_v18  ;;  %v955_v16 = vld [vmem:[%s6329_s26 + $0x1260] sm:$0xff]  ;;  %v957_v17 = vld [vmem:[%s6329_s26 + $0x1270] sm:$0xff] }
 0x2bc   : > { %v1723_v18 = vld [vmem:[%s6329_s26 + $0x2a60] sm:$0xff]  ;;  %v1725_v20 = vld [vmem:[%s6329_s26 + $0x2a70] sm:$0xff] }
 0x2bd   : > { %4620 = vmatpush1.bf16.msra.mxu1 %v4619_v29  ;;  %v941_v29 = vld [vmem:[%s6329_s26 + $0x11f0] sm:$0xff] }
 0x2be   : > { %5388 = vmatpush1.bf16.msra.mxu0 %v5387_v30  ;;  %4622 = vmatprep.subr.bf16.mxu1 %v4621_v31  ;;  %v1707_v30 = vld [vmem:[%s6329_s26 + $0x29e0] sm:$0xff]  ;;  %v5409_v31 = vpack.c.bf16 %v1710_v24, %v1708_v23  ;;  %v4643_v37 = vpack.c.bf16 %v941_v29, %v939_v28  ;;  %v1728_v23 = vld [vmem:[%s6329_s26 + $0x2a88] sm:$0xff]  ;;  %v1730_v24 = vld [vmem:[%s6329_s26 + $0x2a98] sm:$0xff] }
 0x2bf   : > { %5390 = vmatprep.subr.bf16.mxu0 %v5389_v35  ;;  %v1712_v35 = vld [vmem:[%s6329_s26 + $0x2a08] sm:$0xff]  ;;  %v5411_v38 = vpack.c.bf16 %v1709_v32, %v1707_v30  ;;  %v959_v28 = vld [vmem:[%s6329_s26 + $0x1280] sm:$0xff]  ;;  %v961_v29 = vld [vmem:[%s6329_s26 + $0x1290] sm:$0xff] }
 0x2c0   : > { %v1727_v30 = vld [vmem:[%s6329_s26 + $0x2a80] sm:$0xff]  ;;  %v1729_v32 = vld [vmem:[%s6329_s26 + $0x2a90] sm:$0xff] }
 0x2c1   : > { %4624 = vmatpush1.bf16.msra.mxu1 %v4623_v41  ;;  %v945_v41 = vld [vmem:[%s6329_s26 + $0x1210] sm:$0xff] }
 0x2c2   : > { %5392 = vmatpush1.bf16.msra.mxu0 %v5391_v42  ;;  %4626 = vmatprep.subr.bf16.mxu1 %v4625_v43  ;;  %v1711_v42 = vld [vmem:[%s6329_s26 + $0x2a00] sm:$0xff]  ;;  %v5413_v43 = vpack.c.bf16 %v1714_v36, %v1712_v35  ;;  %v4647_v50 = vpack.c.bf16 %v945_v41, %v943_v40  ;;  %v1732_v35 = vld [vmem:[%s6329_s26 + $0x2aa8] sm:$0xff]  ;;  %v1734_v36 = vld [vmem:[%s6329_s26 + $0x2ab8] sm:$0xff] }
 0x2c3   : > { %5394 = vmatprep.subr.bf16.mxu0 %v5393_v47  ;;  %v1716_v47 = vld [vmem:[%s6329_s26 + $0x2a28] sm:$0xff]  ;;  %v5415_v52 = vpack.c.bf16 %v1713_v44, %v1711_v42  ;;  %v963_v40 = vld [vmem:[%s6329_s26 + $0x12a0] sm:$0xff]  ;;  %v965_v41 = vld [vmem:[%s6329_s26 + $0x12b0] sm:$0xff] }
 0x2c4   : > { %v5417_v57 = vpack.c.bf16 %v1718_v48, %v1716_v47  ;;  %v1731_v42 = vld [vmem:[%s6329_s26 + $0x2aa0] sm:$0xff]  ;;  %v1733_v44 = vld [vmem:[%s6329_s26 + $0x2ab0] sm:$0xff]  ;;  %v1736_v47 = vld [vmem:[%s6329_s26 + $0x2ac8] sm:$0xff] }
 0x2c5   : > { %4628 = vmatpush1.bf16.msra.mxu1 %v4627_v53  ;;  %v4649_v53 = vpack.c.bf16 %v950_v46, %v948_v45  ;;  %v968_v45 = vld [vmem:[%s6329_s26 + $0x12c8] sm:$0xff]  ;;  %v970_v46 = vld [vmem:[%s6329_s26 + $0x12d8] sm:$0xff] }
 0x2c6   : > { %5396 = vmatpush1.bf16.msra.mxu0 %v5395_v54  ;;  %4630 = vmatprep.subr.bf16.mxu1 %v4629_v55  ;;  %v947_v54 = vld [vmem:[%s6329_s26 + $0x1220] sm:$0xff]  ;;  %v949_v55 = vld [vmem:[%s6329_s26 + $0x1230] sm:$0xff]  ;;  %v1738_v48 = vld [vmem:[%s6329_s26 + $0x2ad8] sm:$0xff] }
 0x2c7   : > { %5398 = vmatprep.subr.bf16.mxu0 %v5397_v59  ;;  %v952_v59 = vld [vmem:[%s6329_s26 + $0x1248] sm:$0xff]  ;;  %v4651_v0 = vpack.c.bf16 %v949_v55, %v947_v54  ;;  %v1735_v54 = vld [vmem:[%s6329_s26 + $0x2ac0] sm:$0xff]  ;;  %v5437_v55 = vpack.c.bf16 %v1738_v48, %v1736_v47 }
 0x2c8   : > { %v987_v48 = vld [vmem:[%s6329_s26 + $0x1360] sm:$0xff] }
 0x2c9   : > { %4632 = vmatpush1.bf16.msra.mxu1 %v4631_v1  ;;  %v360_v1 = vld [vmem:[%s6459_s27 + $0x158] sm:$0xff] }
 0x2ca   : > { %5400 = vmatpush1.bf16.msra.mxu0 %v5399_v2  ;;  %4634 = vmatprep.subr.bf16.mxu1 %v4633_v3  ;;  %v5419_v2 = vpack.c.bf16 %v1717_v58, %v1715_v56  ;;  %v4653_v3 = vpack.c.bf16 %v954_v60, %v952_v59  ;;  %v1737_v56 = vld [vmem:[%s6329_s26 + $0x2ad0] sm:$0xff]  ;;  %v974_v58 = vld [vmem:[%s6329_s26 + $0x12f8] sm:$0xff]  ;;  %v1740_v59 = vld [vmem:[%s6329_s26 + $0x2ae8] sm:$0xff] }
 0x2cb   : > { %5402 = vmatprep.subr.bf16.mxu0 %v5401_v7  ;;  %v5421_v7 = vpack.c.bf16 %v1722_v62, %v1720_v61  ;;  %v1742_v60 = vld [vmem:[%s6329_s26 + $0x2af8] sm:$0xff]  ;;  %v5439_v62 = vpack.c.bf16 %v1737_v56, %v1735_v54 }
 0x2cc   : > { %v994_v54 = vld [vmem:[%s6329_s26 + $0x1398] sm:$0xff] }
 0x2cd   : > { %4636 = vmatpush1.bf16.msra.mxu1 %v4635_v13  ;;  %v4655_v13 = vpack.c.bf16 %v953_v5, %v951_v4  ;;  %v1741_v4 = vld [vmem:[%s6329_s26 + $0x2af0] sm:$0xff]  ;;  %v976_v5 = vld [vmem:[%s6329_s26 + $0x1308] sm:$0xff]  ;;  %v1762_v56 = vld [vmem:[%s6329_s26 + $0x2b98] sm:$0xff] }
 0x2ce   : > { %5404 = vmatpush1.bf16.msra.mxu0 %v5403_v14  ;;  %4638 = vmatprep.subr.bf16.mxu1 %v4637_v15  ;;  %v5423_v14 = vpack.c.bf16 %v1721_v8, %v1719_v6  ;;  %v4657_v15 = vpack.c.bf16 %v958_v10, %v956_v9  ;;  %v978_v6 = vld [vmem:[%s6329_s26 + $0x1318] sm:$0xff] }
 0x2cf   : > { %5406 = vmatprep.subr.bf16.mxu0 %v5405_v19  ;;  %v5425_v19 = vpack.c.bf16 %v1726_v12, %v1724_v11  ;;  %v1746_v8 = vld [vmem:[%s6329_s26 + $0x2b18] sm:$0xff]  ;;  %v4677_v11 = vpack.c.bf16 %v978_v6, %v976_v5  ;;  %v975_v12 = vld [vmem:[%s6329_s26 + $0x1300] sm:$0xff] }
 0x2d1   : > { %4640 = vmatpush1.bf16.msra.mxu1 %v4639_v25  ;;  %v4659_v25 = vpack.c.bf16 %v957_v17, %v955_v16  ;;  %v1745_v16 = vld [vmem:[%s6329_s26 + $0x2b10] sm:$0xff]  ;;  %v980_v17 = vld [vmem:[%s6329_s26 + $0x1328] sm:$0xff] }
 0x2d2   : > { %5408 = vmatpush1.bf16.msra.mxu0 %v5407_v26  ;;  %4642 = vmatprep.subr.bf16.mxu1 %v4641_v27  ;;  %v5427_v26 = vpack.c.bf16 %v1725_v20, %v1723_v18  ;;  %v4661_v27 = vpack.c.bf16 %v962_v22, %v960_v21  ;;  %v982_v18 = vld [vmem:[%s6329_s26 + $0x1338] sm:$0xff] }
 0x2d3   : > { %5410 = vmatprep.subr.bf16.mxu0 %v5409_v31  ;;  %v5429_v31 = vpack.c.bf16 %v1730_v24, %v1728_v23  ;;  %v1750_v20 = vld [vmem:[%s6329_s26 + $0x2b38] sm:$0xff]  ;;  %v4681_v23 = vpack.c.bf16 %v982_v18, %v980_v17  ;;  %v979_v24 = vld [vmem:[%s6329_s26 + $0x1320] sm:$0xff] }
 0x2d5   : > { %4644 = vmatpush1.bf16.msra.mxu1 %v4643_v37  ;;  %v4663_v37 = vpack.c.bf16 %v961_v29, %v959_v28  ;;  %v1749_v28 = vld [vmem:[%s6329_s26 + $0x2b30] sm:$0xff]  ;;  %v984_v29 = vld [vmem:[%s6329_s26 + $0x1348] sm:$0xff] }
 0x2d6   : > { %5412 = vmatpush1.bf16.msra.mxu0 %v5411_v38  ;;  %4646 = vmatprep.subr.bf16.mxu1 %v4645_v39  ;;  %v5431_v38 = vpack.c.bf16 %v1729_v32, %v1727_v30  ;;  %v4665_v39 = vpack.c.bf16 %v966_v34, %v964_v33  ;;  %v986_v30 = vld [vmem:[%s6329_s26 + $0x1358] sm:$0xff] }
 0x2d7   : > { %5414 = vmatprep.subr.bf16.mxu0 %v5413_v43  ;;  %v5433_v43 = vpack.c.bf16 %v1734_v36, %v1732_v35  ;;  %v1754_v32 = vld [vmem:[%s6329_s26 + $0x2b58] sm:$0xff]  ;;  %v4685_v35 = vpack.c.bf16 %v986_v30, %v984_v29  ;;  %v983_v36 = vld [vmem:[%s6329_s26 + $0x1340] sm:$0xff] }
 0x2d8   : > { %2602 = vmatmul.mubr.f32.vlgmr.msra.gmra.mrb[0].mxu1 %v333_v49  ;;  %v4667_v49 = vpack.c.bf16 %v965_v41, %v963_v40  ;;  %v1753_v40 = vld [vmem:[%s6329_s26 + $0x2b50] sm:$0xff]  ;;  %v988_v41 = vld [vmem:[%s6329_s26 + $0x1368] sm:$0xff] }
 0x2d9   : > { %4648 = vmatpush1.bf16.msra.mxu1 %v4647_v50  ;;  %3454 = vmatmul.mubr.f32.vlgmr.msra.gmra.mrb[0].mxu0 %v357_v51  ;;  %v5435_v50 = vpack.c.bf16 %v1733_v44, %v1731_v42  ;;  %v4669_v51 = vpack.c.bf16 %v970_v46, %v968_v45  ;;  %v990_v42 = vld [vmem:[%s6329_s26 + $0x1378] sm:$0xff] }
 0x2da   : > { %5416 = vmatpush1.bf16.msra.mxu0 %v5415_v52  ;;  %4650 = vmatprep.subr.bf16.mxu1 %v4649_v53  ;;  %v967_v52 = vld [vmem:[%s6329_s26 + $0x12c0] sm:$0xff]  ;;  %v969_v53 = vld [vmem:[%s6329_s26 + $0x12d0] sm:$0xff]  ;;  %v1758_v44 = vld [vmem:[%s6329_s26 + $0x2b78] sm:$0xff]  ;;  %v4689_v47 = vpack.c.bf16 %v990_v42, %v988_v41 }
 0x2db   : > { %5418 = vmatprep.subr.bf16.mxu0 %v5417_v57  ;;  %2672 = vmatprep.mubr.f32.mxu1 %v336_v63  ;;  %v972_v57 = vld [vmem:[%s6329_s26 + $0x12e8] sm:$0xff]  ;;  %v4671_v61 = vpack.c.bf16 %v969_v53, %v967_v52  ;;  %v1757_v52 = vld [vmem:[%s6329_s26 + $0x2b70] sm:$0xff] }
 0x2dc   : > { %3524 = vmatprep.mubr.f32.mxu0 %v360_v1  ;;  %v4673_v63 = vpack.c.bf16 %v974_v58, %v972_v57  ;;  %v973_v1 = vld [vmem:[%s6329_s26 + $0x12f0] sm:$0xff]  ;;  %v992_v53 = vld [vmem:[%s6329_s26 + $0x1388] sm:$0xff] }
 0x2dd   : > { %4652 = vmatpush1.bf16.msra.mxu1 %v4651_v0  ;;  %v971_v0 = vld [vmem:[%s6329_s26 + $0x12e0] sm:$0xff] }
 0x2de   : > { %5420 = vmatpush1.bf16.msra.mxu0 %v5419_v2  ;;  %4654 = vmatprep.subr.bf16.mxu1 %v4653_v3  ;;  %v1739_v2 = vld [vmem:[%s6329_s26 + $0x2ae0] sm:$0xff]  ;;  %v5441_v3 = vpack.c.bf16 %v1742_v60, %v1740_v59  ;;  %v4675_v9 = vpack.c.bf16 %v973_v1, %v971_v0  ;;  %v4693_v59 = vpack.c.bf16 %v994_v54, %v992_v53  ;;  %v1761_v0 = vld [vmem:[%s6329_s26 + $0x2b90] sm:$0xff]  ;;  %v996_v1 = vld [vmem:[%s6329_s26 + $0x13a8] sm:$0xff] }
 0x2df   : > { %5422 = vmatprep.subr.bf16.mxu0 %v5421_v7  ;;  %v1744_v7 = vld [vmem:[%s6329_s26 + $0x2b08] sm:$0xff]  ;;  %v5443_v10 = vpack.c.bf16 %v1741_v4, %v1739_v2  ;;  %v991_v60 = vld [vmem:[%s6329_s26 + $0x1380] sm:$0xff]  ;;  %v998_v2 = vld [vmem:[%s6329_s26 + $0x13b8] sm:$0xff] }
 0x2e0   : > { %v1766_v4 = vld [vmem:[%s6329_s26 + $0x2bb8] sm:$0xff]  ;;  %v335_v53 = vld [vmem:[%s6459_s27 + $0x90] sm:$0xff] }
 0x2e1   : > { %4656 = vmatpush1.bf16.msra.mxu1 %v4655_v13  ;;  %v977_v13 = vld [vmem:[%s6329_s26 + $0x1310] sm:$0xff] }
 0x2e2   : > { %5424 = vmatpush1.bf16.msra.mxu0 %v5423_v14  ;;  %4658 = vmatprep.subr.bf16.mxu1 %v4657_v15  ;;  %v1743_v14 = vld [vmem:[%s6329_s26 + $0x2b00] sm:$0xff]  ;;  %v5445_v15 = vpack.c.bf16 %v1746_v8, %v1744_v7  ;;  %v4679_v21 = vpack.c.bf16 %v977_v13, %v975_v12  ;;  %v4697_v7 = vpack.c.bf16 %v998_v2, %v996_v1  ;;  %v1765_v12 = vld [vmem:[%s6329_s26 + $0x2bb0] sm:$0xff]  ;;  %v1000_v13 = vld [vmem:[%s6329_s26 + $0x13c8] sm:$0xff] }
 0x2e3   : > { %5426 = vmatprep.subr.bf16.mxu0 %v5425_v19  ;;  %v1748_v19 = vld [vmem:[%s6329_s26 + $0x2b28] sm:$0xff]  ;;  %v5447_v22 = vpack.c.bf16 %v1745_v16, %v1743_v14  ;;  %v995_v8 = vld [vmem:[%s6329_s26 + $0x13a0] sm:$0xff]  ;;  %v1002_v14 = vld [vmem:[%s6329_s26 + $0x13d8] sm:$0xff] }
 0x2e4   : > { %v1770_v16 = vld [vmem:[%s6329_s26 + $0x2bd8] sm:$0xff]  ;;  %v1784_v1 = vld [vmem:[%s6329_s26 + $0x2c48] sm:$0xff] }
 0x2e5   : > { %4660 = vmatpush1.bf16.msra.mxu1 %v4659_v25  ;;  %v981_v25 = vld [vmem:[%s6329_s26 + $0x1330] sm:$0xff]  ;;  %v1786_v2 = vld [vmem:[%s6329_s26 + $0x2c58] sm:$0xff] }
 0x2e6   : > { %5428 = vmatpush1.bf16.msra.mxu0 %v5427_v26  ;;  %4662 = vmatprep.subr.bf16.mxu1 %v4661_v27  ;;  %v1747_v26 = vld [vmem:[%s6329_s26 + $0x2b20] sm:$0xff]  ;;  %v5449_v27 = vpack.c.bf16 %v1750_v20, %v1748_v19  ;;  %v4683_v33 = vpack.c.bf16 %v981_v25, %v979_v24  ;;  %v4701_v19 = vpack.c.bf16 %v1002_v14, %v1000_v13  ;;  %v1769_v24 = vld [vmem:[%s6329_s26 + $0x2bd0] sm:$0xff]  ;;  %v1004_v25 = vld [vmem:[%s6329_s26 + $0x13e8] sm:$0xff] }
 0x2e7   : > { %5430 = vmatprep.subr.bf16.mxu0 %v5429_v31  ;;  %v1752_v31 = vld [vmem:[%s6329_s26 + $0x2b48] sm:$0xff]  ;;  %v5451_v34 = vpack.c.bf16 %v1749_v28, %v1747_v26  ;;  %v999_v20 = vld [vmem:[%s6329_s26 + $0x13c0] sm:$0xff]  ;;  %v1006_v26 = vld [vmem:[%s6329_s26 + $0x13f8] sm:$0xff] }
 0x2e8   : > { %v1774_v28 = vld [vmem:[%s6329_s26 + $0x2bf8] sm:$0xff]  ;;  %v1020_v13 = vld [vmem:[%s6329_s26 + $0x1468] sm:$0xff] }
 0x2e9   : > { %4664 = vmatpush1.bf16.msra.mxu1 %v4663_v37  ;;  %v985_v37 = vld [vmem:[%s6329_s26 + $0x1350] sm:$0xff]  ;;  %v1022_v14 = vld [vmem:[%s6329_s26 + $0x1478] sm:$0xff] }
 0x2ea   : > { %5432 = vmatpush1.bf16.msra.mxu0 %v5431_v38  ;;  %4666 = vmatprep.subr.bf16.mxu1 %v4665_v39  ;;  %v1751_v38 = vld [vmem:[%s6329_s26 + $0x2b40] sm:$0xff]  ;;  %v5453_v39 = vpack.c.bf16 %v1754_v32, %v1752_v31  ;;  %v4687_v45 = vpack.c.bf16 %v985_v37, %v983_v36  ;;  %v4705_v31 = vpack.c.bf16 %v1006_v26, %v1004_v25  ;;  %v1773_v36 = vld [vmem:[%s6329_s26 + $0x2bf0] sm:$0xff]  ;;  %v1008_v37 = vld [vmem:[%s6329_s26 + $0x1408] sm:$0xff] }
 0x2eb   : > { %5434 = vmatprep.subr.bf16.mxu0 %v5433_v43  ;;  %v1756_v43 = vld [vmem:[%s6329_s26 + $0x2b68] sm:$0xff]  ;;  %v5455_v46 = vpack.c.bf16 %v1753_v40, %v1751_v38  ;;  %v1003_v32 = vld [vmem:[%s6329_s26 + $0x13e0] sm:$0xff]  ;;  %v1010_v38 = vld [vmem:[%s6329_s26 + $0x1418] sm:$0xff] }
 0x2ec   : > { %v1778_v40 = vld [vmem:[%s6329_s26 + $0x2c18] sm:$0xff]  ;;  %v1024_v25 = vld [vmem:[%s6329_s26 + $0x1488] sm:$0xff] }
 0x2ed   : > { %4668 = vmatpush1.bf16.msra.mxu1 %v4667_v49  ;;  %v989_v49 = vld [vmem:[%s6329_s26 + $0x1370] sm:$0xff]  ;;  %v1026_v26 = vld [vmem:[%s6329_s26 + $0x1498] sm:$0xff] }
 0x2ee   : > { %5436 = vmatpush1.bf16.msra.mxu0 %v5435_v50  ;;  %4670 = vmatprep.subr.bf16.mxu1 %v4669_v51  ;;  %v1755_v50 = vld [vmem:[%s6329_s26 + $0x2b60] sm:$0xff]  ;;  %v5457_v51 = vpack.c.bf16 %v1758_v44, %v1756_v43  ;;  %v4691_v57 = vpack.c.bf16 %v989_v49, %v987_v48  ;;  %v4709_v43 = vpack.c.bf16 %v1010_v38, %v1008_v37  ;;  %v1777_v48 = vld [vmem:[%s6329_s26 + $0x2c10] sm:$0xff]  ;;  %v1012_v49 = vld [vmem:[%s6329_s26 + $0x1428] sm:$0xff] }
 0x2ef   : > { %5438 = vmatprep.subr.bf16.mxu0 %v5437_v55  ;;  %v1760_v55 = vld [vmem:[%s6329_s26 + $0x2b88] sm:$0xff]  ;;  %v5459_v58 = vpack.c.bf16 %v1757_v52, %v1755_v50  ;;  %v1007_v44 = vld [vmem:[%s6329_s26 + $0x1400] sm:$0xff]  ;;  %v1014_v50 = vld [vmem:[%s6329_s26 + $0x1438] sm:$0xff] }
 0x2f0   : > { %v1782_v52 = vld [vmem:[%s6329_s26 + $0x2c38] sm:$0xff]  ;;  %v1028_v37 = vld [vmem:[%s6329_s26 + $0x14a8] sm:$0xff] }
 0x2f1   : > { %4672 = vmatpush1.bf16.msra.mxu1 %v4671_v61  ;;  %v993_v61 = vld [vmem:[%s6329_s26 + $0x1390] sm:$0xff]  ;;  %v1030_v38 = vld [vmem:[%s6329_s26 + $0x14b8] sm:$0xff] }
 0x2f2   : > { %5440 = vmatpush1.bf16.msra.mxu0 %v5439_v62  ;;  %4674 = vmatprep.subr.bf16.mxu1 %v4673_v63  ;;  %v1759_v62 = vld [vmem:[%s6329_s26 + $0x2b80] sm:$0xff]  ;;  %v5461_v63 = vpack.c.bf16 %v1762_v56, %v1760_v55  ;;  %v4695_v5 = vpack.c.bf16 %v993_v61, %v991_v60 }
 0x2f3   : > { %5442 = vmatprep.subr.bf16.mxu0 %v5441_v3  ;;  %v1764_v3 = vld [vmem:[%s6329_s26 + $0x2ba8] sm:$0xff]  ;;  %v5463_v6 = vpack.c.bf16 %v1761_v0, %v1759_v62  ;;  %v359_v55 = vld [vmem:[%s6459_s27 + $0x150] sm:$0xff]  ;;  %v1781_v62 = vld [vmem:[%s6329_s26 + $0x2c30] sm:$0xff] }
 0x2f4   : > { %v1779_v60 = vld [vmem:[%s6329_s26 + $0x2c20] sm:$0xff]  ;;  %v1018_v0 = vld [vmem:[%s6329_s26 + $0x1458] sm:$0xff] }
 0x2f5   : > { %4676 = vmatpush1.bf16.msra.mxu1 %v4675_v9  ;;  %v997_v9 = vld [vmem:[%s6329_s26 + $0x13b0] sm:$0xff] }
 0x2f6   : > { %5444 = vmatpush1.bf16.msra.mxu0 %v5443_v10  ;;  %4678 = vmatprep.subr.bf16.mxu1 %v4677_v11  ;;  %v1763_v10 = vld [vmem:[%s6329_s26 + $0x2ba0] sm:$0xff]  ;;  %v5465_v11 = vpack.c.bf16 %v1766_v4, %v1764_v3  ;;  %v4699_v17 = vpack.c.bf16 %v997_v9, %v995_v8  ;;  %v338_v3 = vld [vmem:[%s6459_s27 + $0xa8] sm:$0xff]  ;;  %v1017_v9 = vld [vmem:[%s6329_s26 + $0x1450] sm:$0xff] }
 0x2f7   : > { %5446 = vmatprep.subr.bf16.mxu0 %v5445_v15  ;;  %v1768_v15 = vld [vmem:[%s6329_s26 + $0x2bc8] sm:$0xff]  ;;  %v5467_v18 = vpack.c.bf16 %v1765_v12, %v1763_v10  ;;  %v1015_v8 = vld [vmem:[%s6329_s26 + $0x1440] sm:$0xff]  ;;  %v1785_v12 = vld [vmem:[%s6329_s26 + $0x2c50] sm:$0xff] }
 0x2f8   : > { %v1783_v10 = vld [vmem:[%s6329_s26 + $0x2c40] sm:$0xff] }
 0x2f9   : > { %4680 = vmatpush1.bf16.msra.mxu1 %v4679_v21  ;;  %v1001_v21 = vld [vmem:[%s6329_s26 + $0x13d0] sm:$0xff] }
 0x2fa   : > { %5448 = vmatpush1.bf16.msra.mxu0 %v5447_v22  ;;  %4682 = vmatprep.subr.bf16.mxu1 %v4681_v23  ;;  %v1767_v22 = vld [vmem:[%s6329_s26 + $0x2bc0] sm:$0xff]  ;;  %v5469_v23 = vpack.c.bf16 %v1770_v16, %v1768_v15  ;;  %v4703_v29 = vpack.c.bf16 %v1001_v21, %v999_v20  ;;  %v1788_v15 = vld [vmem:[%s6329_s26 + $0x2c68] sm:$0xff]  ;;  %v1790_v16 = vld [vmem:[%s6329_s26 + $0x2c78] sm:$0xff] }
 0x2fb   : > { %5450 = vmatprep.subr.bf16.mxu0 %v5449_v27  ;;  %v1772_v27 = vld [vmem:[%s6329_s26 + $0x2be8] sm:$0xff]  ;;  %v5471_v30 = vpack.c.bf16 %v1769_v24, %v1767_v22  ;;  %v1019_v20 = vld [vmem:[%s6329_s26 + $0x1460] sm:$0xff]  ;;  %v1021_v21 = vld [vmem:[%s6329_s26 + $0x1470] sm:$0xff] }
 0x2fc   : > { %v1787_v22 = vld [vmem:[%s6329_s26 + $0x2c60] sm:$0xff]  ;;  %v1789_v24 = vld [vmem:[%s6329_s26 + $0x2c70] sm:$0xff] }
 0x2fd   : > { %4684 = vmatpush1.bf16.msra.mxu1 %v4683_v33  ;;  %v1005_v33 = vld [vmem:[%s6329_s26 + $0x13f0] sm:$0xff] }
 0x2fe   : > { %5452 = vmatpush1.bf16.msra.mxu0 %v5451_v34  ;;  %4686 = vmatprep.subr.bf16.mxu1 %v4685_v35  ;;  %v1771_v34 = vld [vmem:[%s6329_s26 + $0x2be0] sm:$0xff]  ;;  %v5473_v35 = vpack.c.bf16 %v1774_v28, %v1772_v27  ;;  %v4707_v41 = vpack.c.bf16 %v1005_v33, %v1003_v32  ;;  %v1792_v27 = vld [vmem:[%s6329_s26 + $0x2c88] sm:$0xff]  ;;  %v1794_v28 = vld [vmem:[%s6329_s26 + $0x2c98] sm:$0xff] }
 0x2ff   : > { %5454 = vmatprep.subr.bf16.mxu0 %v5453_v39  ;;  %v1776_v39 = vld [vmem:[%s6329_s26 + $0x2c08] sm:$0xff]  ;;  %v5475_v42 = vpack.c.bf16 %v1773_v36, %v1771_v34  ;;  %v1023_v32 = vld [vmem:[%s6329_s26 + $0x1480] sm:$0xff]  ;;  %v1025_v33 = vld [vmem:[%s6329_s26 + $0x1490] sm:$0xff] }
 0x300   : > { %v1791_v34 = vld [vmem:[%s6329_s26 + $0x2c80] sm:$0xff]  ;;  %v1793_v36 = vld [vmem:[%s6329_s26 + $0x2c90] sm:$0xff] }
 0x301   : > { %4688 = vmatpush1.bf16.msra.mxu1 %v4687_v45  ;;  %v1009_v45 = vld [vmem:[%s6329_s26 + $0x1410] sm:$0xff] }
 0x302   : > { %5456 = vmatpush1.bf16.msra.mxu0 %v5455_v46  ;;  %4690 = vmatprep.subr.bf16.mxu1 %v4689_v47  ;;  %v1775_v46 = vld [vmem:[%s6329_s26 + $0x2c00] sm:$0xff]  ;;  %v5477_v47 = vpack.c.bf16 %v1778_v40, %v1776_v39  ;;  %v4711_v54 = vpack.c.bf16 %v1009_v45, %v1007_v44  ;;  %v1796_v39 = vld [vmem:[%s6329_s26 + $0x2ca8] sm:$0xff]  ;;  %v1798_v40 = vld [vmem:[%s6329_s26 + $0x2cb8] sm:$0xff] }
 0x303   : > { %5458 = vmatprep.subr.bf16.mxu0 %v5457_v51  ;;  %v1780_v51 = vld [vmem:[%s6329_s26 + $0x2c28] sm:$0xff]  ;;  %v5479_v56 = vpack.c.bf16 %v1777_v48, %v1775_v46  ;;  %v1027_v44 = vld [vmem:[%s6329_s26 + $0x14a0] sm:$0xff]  ;;  %v1029_v45 = vld [vmem:[%s6329_s26 + $0x14b0] sm:$0xff] }
 0x304   : > { %v5481_v61 = vpack.c.bf16 %v1782_v52, %v1780_v51  ;;  %v1795_v46 = vld [vmem:[%s6329_s26 + $0x2ca0] sm:$0xff]  ;;  %v1797_v48 = vld [vmem:[%s6329_s26 + $0x2cb0] sm:$0xff]  ;;  %v1800_v51 = vld [vmem:[%s6329_s26 + $0x2cc8] sm:$0xff] }
 0x305   : > { %4692 = vmatpush1.bf16.msra.mxu1 %v4691_v57  ;;  %v4713_v57 = vpack.c.bf16 %v1014_v50, %v1012_v49  ;;  %v1032_v49 = vld [vmem:[%s6329_s26 + $0x14c8] sm:$0xff]  ;;  %v1034_v50 = vld [vmem:[%s6329_s26 + $0x14d8] sm:$0xff] }
 0x306   : > { %5460 = vmatpush1.bf16.msra.mxu0 %v5459_v58  ;;  %4694 = vmatprep.subr.bf16.mxu1 %v4693_v59  ;;  %v1011_v58 = vld [vmem:[%s6329_s26 + $0x1420] sm:$0xff]  ;;  %v1013_v59 = vld [vmem:[%s6329_s26 + $0x1430] sm:$0xff]  ;;  %v1802_v52 = vld [vmem:[%s6329_s26 + $0x2cd8] sm:$0xff] }
 0x307   : > { %5462 = vmatprep.subr.bf16.mxu0 %v5461_v63  ;;  %v1016_v63 = vld [vmem:[%s6329_s26 + $0x1448] sm:$0xff]  ;;  %v4715_v4 = vpack.c.bf16 %v1013_v59, %v1011_v58  ;;  %v1799_v58 = vld [vmem:[%s6329_s26 + $0x2cc0] sm:$0xff]  ;;  %v5501_v59 = vpack.c.bf16 %v1802_v52, %v1800_v51 }
 0x308   : > { %v1051_v52 = vld [vmem:[%s6329_s26 + $0x1560] sm:$0xff] }
 0x309   : > { %4696 = vmatpush1.bf16.msra.mxu1 %v4695_v5  ;;  %v362_v5 = vld [vmem:[%s6459_s27 + $0x168] sm:$0xff] }
 0x30a   : > { %5464 = vmatpush1.bf16.msra.mxu0 %v5463_v6  ;;  %4698 = vmatprep.subr.bf16.mxu1 %v4697_v7  ;;  %v5483_v6 = vpack.c.bf16 %v1781_v62, %v1779_v60  ;;  %v4717_v7 = vpack.c.bf16 %v1018_v0, %v1016_v63  ;;  %v1801_v60 = vld [vmem:[%s6329_s26 + $0x2cd0] sm:$0xff]  ;;  %v1038_v62 = vld [vmem:[%s6329_s26 + $0x14f8] sm:$0xff]  ;;  %v1804_v63 = vld [vmem:[%s6329_s26 + $0x2ce8] sm:$0xff] }
 0x30b   : > { %5466 = vmatprep.subr.bf16.mxu0 %v5465_v11  ;;  %v5485_v11 = vpack.c.bf16 %v1786_v2, %v1784_v1  ;;  %v1806_v0 = vld [vmem:[%s6329_s26 + $0x2cf8] sm:$0xff]  ;;  %v5503_v2 = vpack.c.bf16 %v1801_v60, %v1799_v58 }
 0x30c   : > { %v1058_v58 = vld [vmem:[%s6329_s26 + $0x1598] sm:$0xff] }
 0x30d   : > { %4700 = vmatpush1.bf16.msra.mxu1 %v4699_v17  ;;  %v4719_v17 = vpack.c.bf16 %v1017_v9, %v1015_v8  ;;  %v1805_v8 = vld [vmem:[%s6329_s26 + $0x2cf0] sm:$0xff]  ;;  %v1040_v9 = vld [vmem:[%s6329_s26 + $0x1508] sm:$0xff]  ;;  %v1826_v60 = vld [vmem:[%s6329_s26 + $0x2d98] sm:$0xff] }
 0x30e   : > { %5468 = vmatpush1.bf16.msra.mxu0 %v5467_v18  ;;  %4702 = vmatprep.subr.bf16.mxu1 %v4701_v19  ;;  %v5487_v18 = vpack.c.bf16 %v1785_v12, %v1783_v10  ;;  %v4721_v19 = vpack.c.bf16 %v1022_v14, %v1020_v13  ;;  %v1042_v10 = vld [vmem:[%s6329_s26 + $0x1518] sm:$0xff] }
 0x30f   : > { %5470 = vmatprep.subr.bf16.mxu0 %v5469_v23  ;;  %v5489_v23 = vpack.c.bf16 %v1790_v16, %v1788_v15  ;;  %v1810_v12 = vld [vmem:[%s6329_s26 + $0x2d18] sm:$0xff]  ;;  %v4741_v15 = vpack.c.bf16 %v1042_v10, %v1040_v9  ;;  %v1039_v16 = vld [vmem:[%s6329_s26 + $0x1500] sm:$0xff] }
 0x311   : > { %4704 = vmatpush1.bf16.msra.mxu1 %v4703_v29  ;;  %v4723_v29 = vpack.c.bf16 %v1021_v21, %v1019_v20  ;;  %v1809_v20 = vld [vmem:[%s6329_s26 + $0x2d10] sm:$0xff]  ;;  %v1044_v21 = vld [vmem:[%s6329_s26 + $0x1528] sm:$0xff] }
 0x312   : > { %5472 = vmatpush1.bf16.msra.mxu0 %v5471_v30  ;;  %4706 = vmatprep.subr.bf16.mxu1 %v4705_v31  ;;  %v5491_v30 = vpack.c.bf16 %v1789_v24, %v1787_v22  ;;  %v4725_v31 = vpack.c.bf16 %v1026_v26, %v1024_v25  ;;  %v1046_v22 = vld [vmem:[%s6329_s26 + $0x1538] sm:$0xff] }
 0x313   : > { %5474 = vmatprep.subr.bf16.mxu0 %v5473_v35  ;;  %v5493_v35 = vpack.c.bf16 %v1794_v28, %v1792_v27  ;;  %v1814_v24 = vld [vmem:[%s6329_s26 + $0x2d38] sm:$0xff]  ;;  %v4745_v27 = vpack.c.bf16 %v1046_v22, %v1044_v21  ;;  %v1043_v28 = vld [vmem:[%s6329_s26 + $0x1520] sm:$0xff] }
 0x315   : > { %4708 = vmatpush1.bf16.msra.mxu1 %v4707_v41  ;;  %v4727_v41 = vpack.c.bf16 %v1025_v33, %v1023_v32  ;;  %v1813_v32 = vld [vmem:[%s6329_s26 + $0x2d30] sm:$0xff]  ;;  %v1048_v33 = vld [vmem:[%s6329_s26 + $0x1548] sm:$0xff] }
 0x316   : > { %5476 = vmatpush1.bf16.msra.mxu0 %v5475_v42  ;;  %4710 = vmatprep.subr.bf16.mxu1 %v4709_v43  ;;  %v5495_v42 = vpack.c.bf16 %v1793_v36, %v1791_v34  ;;  %v4729_v43 = vpack.c.bf16 %v1030_v38, %v1028_v37  ;;  %v1050_v34 = vld [vmem:[%s6329_s26 + $0x1558] sm:$0xff] }
 0x317   : > { %5478 = vmatprep.subr.bf16.mxu0 %v5477_v47  ;;  %v5497_v47 = vpack.c.bf16 %v1798_v40, %v1796_v39  ;;  %v1818_v36 = vld [vmem:[%s6329_s26 + $0x2d58] sm:$0xff]  ;;  %v4749_v39 = vpack.c.bf16 %v1050_v34, %v1048_v33  ;;  %v1047_v40 = vld [vmem:[%s6329_s26 + $0x1540] sm:$0xff] }
 0x318   : > { %2673 = vmatmul.mubr.f32.vlgmr.msra.gmra.mrb[0].mxu1 %v335_v53  ;;  %v4731_v53 = vpack.c.bf16 %v1029_v45, %v1027_v44  ;;  %v1817_v44 = vld [vmem:[%s6329_s26 + $0x2d50] sm:$0xff]  ;;  %v1052_v45 = vld [vmem:[%s6329_s26 + $0x1568] sm:$0xff] }
 0x319   : > { %4712 = vmatpush1.bf16.msra.mxu1 %v4711_v54  ;;  %3525 = vmatmul.mubr.f32.vlgmr.msra.gmra.mrb[0].mxu0 %v359_v55  ;;  %v5499_v54 = vpack.c.bf16 %v1797_v48, %v1795_v46  ;;  %v4733_v55 = vpack.c.bf16 %v1034_v50, %v1032_v49  ;;  %v1054_v46 = vld [vmem:[%s6329_s26 + $0x1578] sm:$0xff] }
 0x31a   : > { %5480 = vmatpush1.bf16.msra.mxu0 %v5479_v56  ;;  %4714 = vmatprep.subr.bf16.mxu1 %v4713_v57  ;;  %v1031_v56 = vld [vmem:[%s6329_s26 + $0x14c0] sm:$0xff]  ;;  %v1033_v57 = vld [vmem:[%s6329_s26 + $0x14d0] sm:$0xff]  ;;  %v1822_v48 = vld [vmem:[%s6329_s26 + $0x2d78] sm:$0xff]  ;;  %v4753_v51 = vpack.c.bf16 %v1054_v46, %v1052_v45 }
 0x31b   : > { %5482 = vmatprep.subr.bf16.mxu0 %v5481_v61  ;;  %2743 = vmatprep.mubr.f32.mxu1 %v338_v3  ;;  %v1036_v61 = vld [vmem:[%s6329_s26 + $0x14e8] sm:$0xff]  ;;  %v4735_v1 = vpack.c.bf16 %v1033_v57, %v1031_v56  ;;  %v1821_v56 = vld [vmem:[%s6329_s26 + $0x2d70] sm:$0xff] }
 0x31c   : > { %3595 = vmatprep.mubr.f32.mxu0 %v362_v5  ;;  %v4737_v3 = vpack.c.bf16 %v1038_v62, %v1036_v61  ;;  %v1037_v5 = vld [vmem:[%s6329_s26 + $0x14f0] sm:$0xff]  ;;  %v1056_v57 = vld [vmem:[%s6329_s26 + $0x1588] sm:$0xff] }
 0x31d   : > { %4716 = vmatpush1.bf16.msra.mxu1 %v4715_v4  ;;  %v1035_v4 = vld [vmem:[%s6329_s26 + $0x14e0] sm:$0xff] }
 0x31e   : > { %5484 = vmatpush1.bf16.msra.mxu0 %v5483_v6  ;;  %4718 = vmatprep.subr.bf16.mxu1 %v4717_v7  ;;  %v1803_v6 = vld [vmem:[%s6329_s26 + $0x2ce0] sm:$0xff]  ;;  %v5505_v7 = vpack.c.bf16 %v1806_v0, %v1804_v63  ;;  %v4739_v13 = vpack.c.bf16 %v1037_v5, %v1035_v4  ;;  %v4757_v63 = vpack.c.bf16 %v1058_v58, %v1056_v57  ;;  %v1825_v4 = vld [vmem:[%s6329_s26 + $0x2d90] sm:$0xff]  ;;  %v1060_v5 = vld [vmem:[%s6329_s26 + $0x15a8] sm:$0xff] }
 0x31f   : > { %5486 = vmatprep.subr.bf16.mxu0 %v5485_v11  ;;  %v1808_v11 = vld [vmem:[%s6329_s26 + $0x2d08] sm:$0xff]  ;;  %v5507_v14 = vpack.c.bf16 %v1805_v8, %v1803_v6  ;;  %v1055_v0 = vld [vmem:[%s6329_s26 + $0x1580] sm:$0xff]  ;;  %v1062_v6 = vld [vmem:[%s6329_s26 + $0x15b8] sm:$0xff] }
 0x320   : > { %v1830_v8 = vld [vmem:[%s6329_s26 + $0x2db8] sm:$0xff]  ;;  %v337_v57 = vld [vmem:[%s6459_s27 + $0xa0] sm:$0xff] }
 0x321   : > { %4720 = vmatpush1.bf16.msra.mxu1 %v4719_v17  ;;  %v1041_v17 = vld [vmem:[%s6329_s26 + $0x1510] sm:$0xff] }
 0x322   : > { %5488 = vmatpush1.bf16.msra.mxu0 %v5487_v18  ;;  %4722 = vmatprep.subr.bf16.mxu1 %v4721_v19  ;;  %v1807_v18 = vld [vmem:[%s6329_s26 + $0x2d00] sm:$0xff]  ;;  %v5509_v19 = vpack.c.bf16 %v1810_v12, %v1808_v11  ;;  %v4743_v25 = vpack.c.bf16 %v1041_v17, %v1039_v16  ;;  %v4761_v11 = vpack.c.bf16 %v1062_v6, %v1060_v5  ;;  %v1829_v16 = vld [vmem:[%s6329_s26 + $0x2db0] sm:$0xff]  ;;  %v1064_v17 = vld [vmem:[%s6329_s26 + $0x15c8] sm:$0xff] }
 0x323   : > { %5490 = vmatprep.subr.bf16.mxu0 %v5489_v23  ;;  %v1812_v23 = vld [vmem:[%s6329_s26 + $0x2d28] sm:$0xff]  ;;  %v5511_v26 = vpack.c.bf16 %v1809_v20, %v1807_v18  ;;  %v1059_v12 = vld [vmem:[%s6329_s26 + $0x15a0] sm:$0xff]  ;;  %v1066_v18 = vld [vmem:[%s6329_s26 + $0x15d8] sm:$0xff] }
 0x324   : > { %v1834_v20 = vld [vmem:[%s6329_s26 + $0x2dd8] sm:$0xff]  ;;  %v1848_v5 = vld [vmem:[%s6329_s26 + $0x2e48] sm:$0xff] }
 0x325   : > { %4724 = vmatpush1.bf16.msra.mxu1 %v4723_v29  ;;  %v1045_v29 = vld [vmem:[%s6329_s26 + $0x1530] sm:$0xff]  ;;  %v1850_v6 = vld [vmem:[%s6329_s26 + $0x2e58] sm:$0xff] }
 0x326   : > { %5492 = vmatpush1.bf16.msra.mxu0 %v5491_v30  ;;  %4726 = vmatprep.subr.bf16.mxu1 %v4725_v31  ;;  %v1811_v30 = vld [vmem:[%s6329_s26 + $0x2d20] sm:$0xff]  ;;  %v5513_v31 = vpack.c.bf16 %v1814_v24, %v1812_v23  ;;  %v4747_v37 = vpack.c.bf16 %v1045_v29, %v1043_v28  ;;  %v4765_v23 = vpack.c.bf16 %v1066_v18, %v1064_v17  ;;  %v1833_v28 = vld [vmem:[%s6329_s26 + $0x2dd0] sm:$0xff]  ;;  %v1068_v29 = vld [vmem:[%s6329_s26 + $0x15e8] sm:$0xff] }
 0x327   : > { %5494 = vmatprep.subr.bf16.mxu0 %v5493_v35  ;;  %v1816_v35 = vld [vmem:[%s6329_s26 + $0x2d48] sm:$0xff]  ;;  %v5515_v38 = vpack.c.bf16 %v1813_v32, %v1811_v30  ;;  %v1063_v24 = vld [vmem:[%s6329_s26 + $0x15c0] sm:$0xff]  ;;  %v1070_v30 = vld [vmem:[%s6329_s26 + $0x15f8] sm:$0xff] }
 0x328   : > { %v1838_v32 = vld [vmem:[%s6329_s26 + $0x2df8] sm:$0xff]  ;;  %v1084_v17 = vld [vmem:[%s6329_s26 + $0x1668] sm:$0xff] }
 0x329   : > { %4728 = vmatpush1.bf16.msra.mxu1 %v4727_v41  ;;  %v1049_v41 = vld [vmem:[%s6329_s26 + $0x1550] sm:$0xff]  ;;  %v1086_v18 = vld [vmem:[%s6329_s26 + $0x1678] sm:$0xff] }
 0x32a   : > { %5496 = vmatpush1.bf16.msra.mxu0 %v5495_v42  ;;  %4730 = vmatprep.subr.bf16.mxu1 %v4729_v43  ;;  %v1815_v42 = vld [vmem:[%s6329_s26 + $0x2d40] sm:$0xff]  ;;  %v5517_v43 = vpack.c.bf16 %v1818_v36, %v1816_v35  ;;  %v4751_v49 = vpack.c.bf16 %v1049_v41, %v1047_v40  ;;  %v4769_v35 = vpack.c.bf16 %v1070_v30, %v1068_v29  ;;  %v1837_v40 = vld [vmem:[%s6329_s26 + $0x2df0] sm:$0xff]  ;;  %v1072_v41 = vld [vmem:[%s6329_s26 + $0x1608] sm:$0xff] }
 0x32b   : > { %5498 = vmatprep.subr.bf16.mxu0 %v5497_v47  ;;  %v1820_v47 = vld [vmem:[%s6329_s26 + $0x2d68] sm:$0xff]  ;;  %v5519_v50 = vpack.c.bf16 %v1817_v44, %v1815_v42  ;;  %v1067_v36 = vld [vmem:[%s6329_s26 + $0x15e0] sm:$0xff]  ;;  %v1074_v42 = vld [vmem:[%s6329_s26 + $0x1618] sm:$0xff] }
 0x32c   : > { %v1842_v44 = vld [vmem:[%s6329_s26 + $0x2e18] sm:$0xff]  ;;  %v1088_v29 = vld [vmem:[%s6329_s26 + $0x1688] sm:$0xff] }
 0x32d   : > { %4732 = vmatpush1.bf16.msra.mxu1 %v4731_v53  ;;  %v1053_v53 = vld [vmem:[%s6329_s26 + $0x1570] sm:$0xff]  ;;  %v1090_v30 = vld [vmem:[%s6329_s26 + $0x1698] sm:$0xff] }
 0x32e   : > { %5500 = vmatpush1.bf16.msra.mxu0 %v5499_v54  ;;  %4734 = vmatprep.subr.bf16.mxu1 %v4733_v55  ;;  %v1819_v54 = vld [vmem:[%s6329_s26 + $0x2d60] sm:$0xff]  ;;  %v5521_v55 = vpack.c.bf16 %v1822_v48, %v1820_v47  ;;  %v4755_v61 = vpack.c.bf16 %v1053_v53, %v1051_v52  ;;  %v4773_v47 = vpack.c.bf16 %v1074_v42, %v1072_v41  ;;  %v1841_v52 = vld [vmem:[%s6329_s26 + $0x2e10] sm:$0xff]  ;;  %v1076_v53 = vld [vmem:[%s6329_s26 + $0x1628] sm:$0xff] }
 0x32f   : > { %5502 = vmatprep.subr.bf16.mxu0 %v5501_v59  ;;  %v1824_v59 = vld [vmem:[%s6329_s26 + $0x2d88] sm:$0xff]  ;;  %v5523_v62 = vpack.c.bf16 %v1821_v56, %v1819_v54  ;;  %v1071_v48 = vld [vmem:[%s6329_s26 + $0x1600] sm:$0xff]  ;;  %v1078_v54 = vld [vmem:[%s6329_s26 + $0x1638] sm:$0xff] }
 0x330   : > { %v1846_v56 = vld [vmem:[%s6329_s26 + $0x2e38] sm:$0xff]  ;;  %v1092_v41 = vld [vmem:[%s6329_s26 + $0x16a8] sm:$0xff] }
 0x331   : > { %4736 = vmatpush1.bf16.msra.mxu1 %v4735_v1  ;;  %v1057_v1 = vld [vmem:[%s6329_s26 + $0x1590] sm:$0xff]  ;;  %v1094_v42 = vld [vmem:[%s6329_s26 + $0x16b8] sm:$0xff] }
 0x332   : > { %5504 = vmatpush1.bf16.msra.mxu0 %v5503_v2  ;;  %4738 = vmatprep.subr.bf16.mxu1 %v4737_v3  ;;  %v1823_v2 = vld [vmem:[%s6329_s26 + $0x2d80] sm:$0xff]  ;;  %v5525_v3 = vpack.c.bf16 %v1826_v60, %v1824_v59  ;;  %v4759_v9 = vpack.c.bf16 %v1057_v1, %v1055_v0  ;;  %v361_v59 = vld [vmem:[%s6459_s27 + $0x160] sm:$0xff] }
 0x333   : > { %5506 = vmatprep.subr.bf16.mxu0 %v5505_v7  ;;  %v1828_v7 = vld [vmem:[%s6329_s26 + $0x2da8] sm:$0xff]  ;;  %v5527_v10 = vpack.c.bf16 %v1825_v4, %v1823_v2  ;;  %v1843_v0 = vld [vmem:[%s6329_s26 + $0x2e20] sm:$0xff]  ;;  %v1845_v2 = vld [vmem:[%s6329_s26 + $0x2e30] sm:$0xff] }
 0x334   : > { %v1082_v4 = vld [vmem:[%s6329_s26 + $0x1658] sm:$0xff] }
 0x335   : > { %4740 = vmatpush1.bf16.msra.mxu1 %v4739_v13  ;;  %v1061_v13 = vld [vmem:[%s6329_s26 + $0x15b0] sm:$0xff] }
 0x336   : > { %5508 = vmatpush1.bf16.msra.mxu0 %v5507_v14  ;;  %4742 = vmatprep.subr.bf16.mxu1 %v4741_v15  ;;  %v1827_v14 = vld [vmem:[%s6329_s26 + $0x2da0] sm:$0xff]  ;;  %v5529_v15 = vpack.c.bf16 %v1830_v8, %v1828_v7  ;;  %v4763_v21 = vpack.c.bf16 %v1061_v13, %v1059_v12  ;;  %v340_v7 = vld [vmem:[%s6459_s27 + $0xb8] sm:$0xff]  ;;  %v1081_v13 = vld [vmem:[%s6329_s26 + $0x1650] sm:$0xff] }
 0x337   : > { %5510 = vmatprep.subr.bf16.mxu0 %v5509_v19  ;;  %v1832_v19 = vld [vmem:[%s6329_s26 + $0x2dc8] sm:$0xff]  ;;  %v5531_v22 = vpack.c.bf16 %v1829_v16, %v1827_v14  ;;  %v1079_v12 = vld [vmem:[%s6329_s26 + $0x1640] sm:$0xff]  ;;  %v1849_v16 = vld [vmem:[%s6329_s26 + $0x2e50] sm:$0xff] }
 0x338   : > { %v1847_v14 = vld [vmem:[%s6329_s26 + $0x2e40] sm:$0xff] }
 0x339   : > { %4744 = vmatpush1.bf16.msra.mxu1 %v4743_v25  ;;  %v1065_v25 = vld [vmem:[%s6329_s26 + $0x15d0] sm:$0xff] }
 0x33a   : > { %5512 = vmatpush1.bf16.msra.mxu0 %v5511_v26  ;;  %4746 = vmatprep.subr.bf16.mxu1 %v4745_v27  ;;  %v1831_v26 = vld [vmem:[%s6329_s26 + $0x2dc0] sm:$0xff]  ;;  %v5533_v27 = vpack.c.bf16 %v1834_v20, %v1832_v19  ;;  %v4767_v33 = vpack.c.bf16 %v1065_v25, %v1063_v24  ;;  %v1852_v19 = vld [vmem:[%s6329_s26 + $0x2e68] sm:$0xff]  ;;  %v1854_v20 = vld [vmem:[%s6329_s26 + $0x2e78] sm:$0xff] }
 0x33b   : > { %5514 = vmatprep.subr.bf16.mxu0 %v5513_v31  ;;  %v1836_v31 = vld [vmem:[%s6329_s26 + $0x2de8] sm:$0xff]  ;;  %v5535_v34 = vpack.c.bf16 %v1833_v28, %v1831_v26  ;;  %v1083_v24 = vld [vmem:[%s6329_s26 + $0x1660] sm:$0xff]  ;;  %v1085_v25 = vld [vmem:[%s6329_s26 + $0x1670] sm:$0xff] }
 0x33c   : > { %v1851_v26 = vld [vmem:[%s6329_s26 + $0x2e60] sm:$0xff]  ;;  %v1853_v28 = vld [vmem:[%s6329_s26 + $0x2e70] sm:$0xff] }
 0x33d   : > { %4748 = vmatpush1.bf16.msra.mxu1 %v4747_v37  ;;  %v1069_v37 = vld [vmem:[%s6329_s26 + $0x15f0] sm:$0xff] }
 0x33e   : > { %5516 = vmatpush1.bf16.msra.mxu0 %v5515_v38  ;;  %4750 = vmatprep.subr.bf16.mxu1 %v4749_v39  ;;  %v1835_v38 = vld [vmem:[%s6329_s26 + $0x2de0] sm:$0xff]  ;;  %v5537_v39 = vpack.c.bf16 %v1838_v32, %v1836_v31  ;;  %v4771_v45 = vpack.c.bf16 %v1069_v37, %v1067_v36  ;;  %v1856_v31 = vld [vmem:[%s6329_s26 + $0x2e88] sm:$0xff]  ;;  %v1858_v32 = vld [vmem:[%s6329_s26 + $0x2e98] sm:$0xff] }
 0x33f   : > { %5518 = vmatprep.subr.bf16.mxu0 %v5517_v43  ;;  %v1840_v43 = vld [vmem:[%s6329_s26 + $0x2e08] sm:$0xff]  ;;  %v5539_v46 = vpack.c.bf16 %v1837_v40, %v1835_v38  ;;  %v1087_v36 = vld [vmem:[%s6329_s26 + $0x1680] sm:$0xff]  ;;  %v1089_v37 = vld [vmem:[%s6329_s26 + $0x1690] sm:$0xff] }
 0x340   : > { %v1855_v38 = vld [vmem:[%s6329_s26 + $0x2e80] sm:$0xff]  ;;  %v1857_v40 = vld [vmem:[%s6329_s26 + $0x2e90] sm:$0xff] }
 0x341   : > { %4752 = vmatpush1.bf16.msra.mxu1 %v4751_v49  ;;  %v1073_v49 = vld [vmem:[%s6329_s26 + $0x1610] sm:$0xff] }
 0x342   : > { %5520 = vmatpush1.bf16.msra.mxu0 %v5519_v50  ;;  %4754 = vmatprep.subr.bf16.mxu1 %v4753_v51  ;;  %v1839_v50 = vld [vmem:[%s6329_s26 + $0x2e00] sm:$0xff]  ;;  %v5541_v51 = vpack.c.bf16 %v1842_v44, %v1840_v43  ;;  %v4775_v58 = vpack.c.bf16 %v1073_v49, %v1071_v48  ;;  %v1860_v43 = vld [vmem:[%s6329_s26 + $0x2ea8] sm:$0xff]  ;;  %v1862_v44 = vld [vmem:[%s6329_s26 + $0x2eb8] sm:$0xff] }
 0x343   : > { %5522 = vmatprep.subr.bf16.mxu0 %v5521_v55  ;;  %v1844_v55 = vld [vmem:[%s6329_s26 + $0x2e28] sm:$0xff]  ;;  %v5543_v60 = vpack.c.bf16 %v1841_v52, %v1839_v50  ;;  %v1091_v48 = vld [vmem:[%s6329_s26 + $0x16a0] sm:$0xff]  ;;  %v1093_v49 = vld [vmem:[%s6329_s26 + $0x16b0] sm:$0xff] }
 0x344   : > { %v5545_v1 = vpack.c.bf16 %v1846_v56, %v1844_v55  ;;  %v1859_v50 = vld [vmem:[%s6329_s26 + $0x2ea0] sm:$0xff]  ;;  %v1861_v52 = vld [vmem:[%s6329_s26 + $0x2eb0] sm:$0xff]  ;;  %v1864_v55 = vld [vmem:[%s6329_s26 + $0x2ec8] sm:$0xff] }
 0x345   : > { %4756 = vmatpush1.bf16.msra.mxu1 %v4755_v61  ;;  %v4777_v61 = vpack.c.bf16 %v1078_v54, %v1076_v53  ;;  %v1096_v53 = vld [vmem:[%s6329_s26 + $0x16c8] sm:$0xff]  ;;  %v1098_v54 = vld [vmem:[%s6329_s26 + $0x16d8] sm:$0xff] }
 0x346   : > { %5524 = vmatpush1.bf16.msra.mxu0 %v5523_v62  ;;  %4758 = vmatprep.subr.bf16.mxu1 %v4757_v63  ;;  %v1075_v62 = vld [vmem:[%s6329_s26 + $0x1620] sm:$0xff]  ;;  %v1077_v63 = vld [vmem:[%s6329_s26 + $0x1630] sm:$0xff]  ;;  %v1866_v56 = vld [vmem:[%s6329_s26 + $0x2ed8] sm:$0xff] }
 0x347   : > { %5526 = vmatprep.subr.bf16.mxu0 %v5525_v3  ;;  %v1080_v3 = vld [vmem:[%s6329_s26 + $0x1648] sm:$0xff]  ;;  %v4779_v8 = vpack.c.bf16 %v1077_v63, %v1075_v62  ;;  %v1863_v62 = vld [vmem:[%s6329_s26 + $0x2ec0] sm:$0xff]  ;;  %v5565_v63 = vpack.c.bf16 %v1866_v56, %v1864_v55 }
 0x348   : > { %v1115_v56 = vld [vmem:[%s6329_s26 + $0x1760] sm:$0xff] }
 0x349   : > { %4760 = vmatpush1.bf16.msra.mxu1 %v4759_v9  ;;  %v364_v9 = vld [vmem:[%s6459_s27 + $0x178] sm:$0xff] }
 0x34a   : > { %5528 = vmatpush1.bf16.msra.mxu0 %v5527_v10  ;;  %4762 = vmatprep.subr.bf16.mxu1 %v4761_v11  ;;  %v5547_v10 = vpack.c.bf16 %v1845_v2, %v1843_v0  ;;  %v4781_v11 = vpack.c.bf16 %v1082_v4, %v1080_v3  ;;  %v1865_v0 = vld [vmem:[%s6329_s26 + $0x2ed0] sm:$0xff]  ;;  %v1102_v2 = vld [vmem:[%s6329_s26 + $0x16f8] sm:$0xff]  ;;  %v1868_v3 = vld [vmem:[%s6329_s26 + $0x2ee8] sm:$0xff] }
 0x34b   : > { %5530 = vmatprep.subr.bf16.mxu0 %v5529_v15  ;;  %v5549_v15 = vpack.c.bf16 %v1850_v6, %v1848_v5  ;;  %v1870_v4 = vld [vmem:[%s6329_s26 + $0x2ef8] sm:$0xff]  ;;  %v5567_v6 = vpack.c.bf16 %v1865_v0, %v1863_v62 }
 0x34c   : > { %v1122_v62 = vld [vmem:[%s6329_s26 + $0x1798] sm:$0xff] }
 0x34d   : > { %4764 = vmatpush1.bf16.msra.mxu1 %v4763_v21  ;;  %v4783_v21 = vpack.c.bf16 %v1081_v13, %v1079_v12  ;;  %v1869_v12 = vld [vmem:[%s6329_s26 + $0x2ef0] sm:$0xff]  ;;  %v1104_v13 = vld [vmem:[%s6329_s26 + $0x1708] sm:$0xff]  ;;  %v1890_v0 = vld [vmem:[%s6329_s26 + $0x2f98] sm:$0xff] }
 0x34e   : > { %5532 = vmatpush1.bf16.msra.mxu0 %v5531_v22  ;;  %4766 = vmatprep.subr.bf16.mxu1 %v4765_v23  ;;  %v5551_v22 = vpack.c.bf16 %v1849_v16, %v1847_v14  ;;  %v4785_v23 = vpack.c.bf16 %v1086_v18, %v1084_v17  ;;  %v1106_v14 = vld [vmem:[%s6329_s26 + $0x1718] sm:$0xff] }
 0x34f   : > { %5534 = vmatprep.subr.bf16.mxu0 %v5533_v27  ;;  %v5553_v27 = vpack.c.bf16 %v1854_v20, %v1852_v19  ;;  %v1874_v16 = vld [vmem:[%s6329_s26 + $0x2f18] sm:$0xff]  ;;  %v4805_v19 = vpack.c.bf16 %v1106_v14, %v1104_v13  ;;  %v1103_v20 = vld [vmem:[%s6329_s26 + $0x1700] sm:$0xff] }
 0x351   : > { %4768 = vmatpush1.bf16.msra.mxu1 %v4767_v33  ;;  %v4787_v33 = vpack.c.bf16 %v1085_v25, %v1083_v24  ;;  %v1873_v24 = vld [vmem:[%s6329_s26 + $0x2f10] sm:$0xff]  ;;  %v1108_v25 = vld [vmem:[%s6329_s26 + $0x1728] sm:$0xff] }
 0x352   : > { %5536 = vmatpush1.bf16.msra.mxu0 %v5535_v34  ;;  %4770 = vmatprep.subr.bf16.mxu1 %v4769_v35  ;;  %v5555_v34 = vpack.c.bf16 %v1853_v28, %v1851_v26  ;;  %v4789_v35 = vpack.c.bf16 %v1090_v30, %v1088_v29  ;;  %v1110_v26 = vld [vmem:[%s6329_s26 + $0x1738] sm:$0xff] }
 0x353   : > { %5538 = vmatprep.subr.bf16.mxu0 %v5537_v39  ;;  %v5557_v39 = vpack.c.bf16 %v1858_v32, %v1856_v31  ;;  %v1878_v28 = vld [vmem:[%s6329_s26 + $0x2f38] sm:$0xff]  ;;  %v4809_v31 = vpack.c.bf16 %v1110_v26, %v1108_v25  ;;  %v1107_v32 = vld [vmem:[%s6329_s26 + $0x1720] sm:$0xff] }
 0x355   : > { %4772 = vmatpush1.bf16.msra.mxu1 %v4771_v45  ;;  %v4791_v45 = vpack.c.bf16 %v1089_v37, %v1087_v36  ;;  %v1877_v36 = vld [vmem:[%s6329_s26 + $0x2f30] sm:$0xff]  ;;  %v1112_v37 = vld [vmem:[%s6329_s26 + $0x1748] sm:$0xff] }
 0x356   : > { %5540 = vmatpush1.bf16.msra.mxu0 %v5539_v46  ;;  %4774 = vmatprep.subr.bf16.mxu1 %v4773_v47  ;;  %v5559_v46 = vpack.c.bf16 %v1857_v40, %v1855_v38  ;;  %v4793_v47 = vpack.c.bf16 %v1094_v42, %v1092_v41  ;;  %v1114_v38 = vld [vmem:[%s6329_s26 + $0x1758] sm:$0xff] }
 0x357   : > { %5542 = vmatprep.subr.bf16.mxu0 %v5541_v51  ;;  %v5561_v51 = vpack.c.bf16 %v1862_v44, %v1860_v43  ;;  %v1882_v40 = vld [vmem:[%s6329_s26 + $0x2f58] sm:$0xff]  ;;  %v4813_v43 = vpack.c.bf16 %v1114_v38, %v1112_v37  ;;  %v1111_v44 = vld [vmem:[%s6329_s26 + $0x1740] sm:$0xff] }
 0x358   : > { %2744 = vmatmul.mubr.f32.vlgmr.msra.gmra.mrb[0].mxu1 %v337_v57  ;;  %v4795_v57 = vpack.c.bf16 %v1093_v49, %v1091_v48  ;;  %v1881_v48 = vld [vmem:[%s6329_s26 + $0x2f50] sm:$0xff]  ;;  %v1116_v49 = vld [vmem:[%s6329_s26 + $0x1768] sm:$0xff] }
 0x359   : > { %4776 = vmatpush1.bf16.msra.mxu1 %v4775_v58  ;;  %3596 = vmatmul.mubr.f32.vlgmr.msra.gmra.mrb[0].mxu0 %v361_v59  ;;  %v5563_v58 = vpack.c.bf16 %v1861_v52, %v1859_v50  ;;  %v4797_v59 = vpack.c.bf16 %v1098_v54, %v1096_v53  ;;  %v1118_v50 = vld [vmem:[%s6329_s26 + $0x1778] sm:$0xff] }
 0x35a   : > { %5544 = vmatpush1.bf16.msra.mxu0 %v5543_v60  ;;  %4778 = vmatprep.subr.bf16.mxu1 %v4777_v61  ;;  %v1095_v60 = vld [vmem:[%s6329_s26 + $0x16c0] sm:$0xff]  ;;  %v1097_v61 = vld [vmem:[%s6329_s26 + $0x16d0] sm:$0xff]  ;;  %v1886_v52 = vld [vmem:[%s6329_s26 + $0x2f78] sm:$0xff]  ;;  %v4817_v55 = vpack.c.bf16 %v1118_v50, %v1116_v49 }
 0x35b   : > { %5546 = vmatprep.subr.bf16.mxu0 %v5545_v1  ;;  %2814 = vmatprep.mubr.f32.mxu1 %v340_v7  ;;  %v1100_v1 = vld [vmem:[%s6329_s26 + $0x16e8] sm:$0xff]  ;;  %v4799_v5 = vpack.c.bf16 %v1097_v61, %v1095_v60  ;;  %v1885_v60 = vld [vmem:[%s6329_s26 + $0x2f70] sm:$0xff]  ;;  %v1903_v50 = vld [vmem:[%s6329_s26 + $0x3000] sm:$0xff] }
 0x35c   : > { %3666 = vmatprep.mubr.f32.mxu0 %v364_v9  ;;  %v4801_v7 = vpack.c.bf16 %v1102_v2, %v1100_v1  ;;  %v1101_v9 = vld [vmem:[%s6329_s26 + $0x16f0] sm:$0xff]  ;;  %v1120_v61 = vld [vmem:[%s6329_s26 + $0x1788] sm:$0xff] }
 0x35d   : > { %4780 = vmatpush1.bf16.msra.mxu1 %v4779_v8  ;;  %v1099_v8 = vld [vmem:[%s6329_s26 + $0x16e0] sm:$0xff] }
 0x35e   : > { %5548 = vmatpush1.bf16.msra.mxu0 %v5547_v10  ;;  %4782 = vmatprep.subr.bf16.mxu1 %v4781_v11  ;;  %v1867_v10 = vld [vmem:[%s6329_s26 + $0x2ee0] sm:$0xff]  ;;  %v5569_v11 = vpack.c.bf16 %v1870_v4, %v1868_v3  ;;  %v4803_v17 = vpack.c.bf16 %v1101_v9, %v1099_v8  ;;  %v4821_v3 = vpack.c.bf16 %v1122_v62, %v1120_v61  ;;  %v1889_v8 = vld [vmem:[%s6329_s26 + $0x2f90] sm:$0xff]  ;;  %v1124_v9 = vld [vmem:[%s6329_s26 + $0x17a8] sm:$0xff] }
 0x35f   : > { %5550 = vmatprep.subr.bf16.mxu0 %v5549_v15  ;;  %v1872_v15 = vld [vmem:[%s6329_s26 + $0x2f08] sm:$0xff]  ;;  %v5571_v18 = vpack.c.bf16 %v1869_v12, %v1867_v10  ;;  %v1119_v4 = vld [vmem:[%s6329_s26 + $0x1780] sm:$0xff]  ;;  %v1126_v10 = vld [vmem:[%s6329_s26 + $0x17b8] sm:$0xff] }
 0x360   : > { %v1894_v12 = vld [vmem:[%s6329_s26 + $0x2fb8] sm:$0xff]  ;;  %v1912_v61 = vld [vmem:[%s6329_s26 + $0x3048] sm:$0xff] }
 0x361   : > { %4784 = vmatpush1.bf16.msra.mxu1 %v4783_v21  ;;  %v1105_v21 = vld [vmem:[%s6329_s26 + $0x1710] sm:$0xff]  ;;  %v1914_v62 = vld [vmem:[%s6329_s26 + $0x3058] sm:$0xff] }
 0x362   : > { %5552 = vmatpush1.bf16.msra.mxu0 %v5551_v22  ;;  %4786 = vmatprep.subr.bf16.mxu1 %v4785_v23  ;;  %v1871_v22 = vld [vmem:[%s6329_s26 + $0x2f00] sm:$0xff]  ;;  %v5573_v23 = vpack.c.bf16 %v1874_v16, %v1872_v15  ;;  %v4807_v29 = vpack.c.bf16 %v1105_v21, %v1103_v20  ;;  %v4825_v15 = vpack.c.bf16 %v1126_v10, %v1124_v9  ;;  %v1893_v20 = vld [vmem:[%s6329_s26 + $0x2fb0] sm:$0xff]  ;;  %v1128_v21 = vld [vmem:[%s6329_s26 + $0x17c8] sm:$0xff] }
 0x363   : > { %5554 = vmatprep.subr.bf16.mxu0 %v5553_v27  ;;  %v1876_v27 = vld [vmem:[%s6329_s26 + $0x2f28] sm:$0xff]  ;;  %v5575_v30 = vpack.c.bf16 %v1873_v24, %v1871_v22  ;;  %v1123_v16 = vld [vmem:[%s6329_s26 + $0x17a0] sm:$0xff]  ;;  %v1130_v22 = vld [vmem:[%s6329_s26 + $0x17d8] sm:$0xff] }
 0x364   : > { %v1898_v24 = vld [vmem:[%s6329_s26 + $0x2fd8] sm:$0xff]  ;;  %v1920_v9 = vld [vmem:[%s6329_s26 + $0x3088] sm:$0xff] }
 0x365   : > { %4788 = vmatpush1.bf16.msra.mxu1 %v4787_v33  ;;  %v1109_v33 = vld [vmem:[%s6329_s26 + $0x1730] sm:$0xff]  ;;  %v1922_v10 = vld [vmem:[%s6329_s26 + $0x3098] sm:$0xff] }
 0x366   : > { %5556 = vmatpush1.bf16.msra.mxu0 %v5555_v34  ;;  %4790 = vmatprep.subr.bf16.mxu1 %v4789_v35  ;;  %v1875_v34 = vld [vmem:[%s6329_s26 + $0x2f20] sm:$0xff]  ;;  %v5577_v35 = vpack.c.bf16 %v1878_v28, %v1876_v27  ;;  %v4811_v41 = vpack.c.bf16 %v1109_v33, %v1107_v32  ;;  %v4829_v27 = vpack.c.bf16 %v1130_v22, %v1128_v21  ;;  %v1897_v32 = vld [vmem:[%s6329_s26 + $0x2fd0] sm:$0xff]  ;;  %v1132_v33 = vld [vmem:[%s6329_s26 + $0x17e8] sm:$0xff] }
 0x367   : > { %5558 = vmatprep.subr.bf16.mxu0 %v5557_v39  ;;  %v1880_v39 = vld [vmem:[%s6329_s26 + $0x2f48] sm:$0xff]  ;;  %v5579_v42 = vpack.c.bf16 %v1877_v36, %v1875_v34  ;;  %v1127_v28 = vld [vmem:[%s6329_s26 + $0x17c0] sm:$0xff]  ;;  %v1134_v34 = vld [vmem:[%s6329_s26 + $0x17f8] sm:$0xff] }
 0x368   : > { %v1902_v36 = vld [vmem:[%s6329_s26 + $0x2ff8] sm:$0xff]  ;;  %v1928_v21 = vld [vmem:[%s6329_s26 + $0x30c8] sm:$0xff] }
 0x369   : > { %4792 = vmatpush1.bf16.msra.mxu1 %v4791_v45  ;;  %v1113_v45 = vld [vmem:[%s6329_s26 + $0x1750] sm:$0xff]  ;;  %v1930_v22 = vld [vmem:[%s6329_s26 + $0x30d8] sm:$0xff] }
 0x36a   : > { %5560 = vmatpush1.bf16.msra.mxu0 %v5559_v46  ;;  %4794 = vmatprep.subr.bf16.mxu1 %v4793_v47  ;;  %v1879_v46 = vld [vmem:[%s6329_s26 + $0x2f40] sm:$0xff]  ;;  %v5581_v47 = vpack.c.bf16 %v1882_v40, %v1880_v39  ;;  %v4815_v53 = vpack.c.bf16 %v1113_v45, %v1111_v44  ;;  %v4833_v39 = vpack.c.bf16 %v1134_v34, %v1132_v33  ;;  %v1901_v44 = vld [vmem:[%s6329_s26 + $0x2ff0] sm:$0xff]  ;;  %v1904_v45 = vld [vmem:[%s6329_s26 + $0x3008] sm:$0xff] }
 0x36b   : > { %5562 = vmatprep.subr.bf16.mxu0 %v5561_v51  ;;  %v1884_v51 = vld [vmem:[%s6329_s26 + $0x2f68] sm:$0xff]  ;;  %v5583_v54 = vpack.c.bf16 %v1881_v48, %v1879_v46  ;;  %v1131_v40 = vld [vmem:[%s6329_s26 + $0x17e0] sm:$0xff]  ;;  %v1906_v46 = vld [vmem:[%s6329_s26 + $0x3018] sm:$0xff] }
 0x36c   : > { %v5605_v49 = vpack.c.bf16 %v1906_v46, %v1904_v45  ;;  %v1936_v33 = vld [vmem:[%s6329_s26 + $0x3108] sm:$0xff]  ;;  %v1938_v34 = vld [vmem:[%s6329_s26 + $0x3118] sm:$0xff] }
 0x36d   : > { %4796 = vmatpush1.bf16.msra.mxu1 %v4795_v57  ;;  %v1117_v57 = vld [vmem:[%s6329_s26 + $0x1770] sm:$0xff]  ;;  %v1944_v45 = vld [vmem:[%s6329_s26 + $0x3148] sm:$0xff]  ;;  %v1946_v46 = vld [vmem:[%s6329_s26 + $0x3158] sm:$0xff] }
 0x36e   : > { %5564 = vmatpush1.bf16.msra.mxu0 %v5563_v58  ;;  %4798 = vmatprep.subr.bf16.mxu1 %v4797_v59  ;;  %v1883_v58 = vld [vmem:[%s6329_s26 + $0x2f60] sm:$0xff]  ;;  %v5585_v59 = vpack.c.bf16 %v1886_v52, %v1884_v51  ;;  %v4819_v1 = vpack.c.bf16 %v1117_v57, %v1115_v56  ;;  %v1905_v51 = vld [vmem:[%s6329_s26 + $0x3010] sm:$0xff]  ;;  %v1908_v52 = vld [vmem:[%s6329_s26 + $0x3028] sm:$0xff] }
 0x36f   : > { %5566 = vmatprep.subr.bf16.mxu0 %v5565_v63  ;;  %v1888_v63 = vld [vmem:[%s6329_s26 + $0x2f88] sm:$0xff]  ;;  %v5587_v2 = vpack.c.bf16 %v1885_v60, %v1883_v58  ;;  %v5607_v56 = vpack.c.bf16 %v1905_v51, %v1903_v50  ;;  %v1907_v58 = vld [vmem:[%s6329_s26 + $0x3020] sm:$0xff]  ;;  %v366_v60 = vld [vmem:[%s6459_s27 + $0x188] sm:$0xff] }
 0x370   : > { %v1945_v50 = vld [vmem:[%s6329_s26 + $0x3150] sm:$0xff]  ;;  %v1948_v51 = vld [vmem:[%s6329_s26 + $0x3168] sm:$0xff] }
 0x371   : > { %4800 = vmatpush1.bf16.msra.mxu1 %v4799_v5  ;;  %v1121_v5 = vld [vmem:[%s6329_s26 + $0x1790] sm:$0xff] }
 0x372   : > { %5568 = vmatpush1.bf16.msra.mxu0 %v5567_v6  ;;  %4802 = vmatprep.subr.bf16.mxu1 %v4801_v7  ;;  %v1887_v6 = vld [vmem:[%s6329_s26 + $0x2f80] sm:$0xff]  ;;  %v5589_v7 = vpack.c.bf16 %v1890_v0, %v1888_v63  ;;  %v4823_v13 = vpack.c.bf16 %v1121_v5, %v1119_v4  ;;  %v5613_v0 = vpack.c.bf16 %v1914_v62, %v1912_v61  ;;  %v1918_v4 = vld [vmem:[%s6329_s26 + $0x3078] sm:$0xff]  ;;  %v1953_v62 = vld [vmem:[%s6329_s26 + $0x3190] sm:$0xff] }
 0x373   : > { %5570 = vmatprep.subr.bf16.mxu0 %v5569_v11  ;;  %v1892_v11 = vld [vmem:[%s6329_s26 + $0x2fa8] sm:$0xff]  ;;  %v5591_v14 = vpack.c.bf16 %v1889_v8, %v1887_v6  ;;  %v1917_v8 = vld [vmem:[%s6329_s26 + $0x3070] sm:$0xff]  ;;  %v1951_v61 = vld [vmem:[%s6329_s26 + $0x3180] sm:$0xff] }
 0x375   : > { %4804 = vmatpush1.bf16.msra.mxu1 %v4803_v17  ;;  %v1125_v17 = vld [vmem:[%s6329_s26 + $0x17b0] sm:$0xff] }
 0x376   : > { %5572 = vmatpush1.bf16.msra.mxu0 %v5571_v18  ;;  %4806 = vmatprep.subr.bf16.mxu1 %v4805_v19  ;;  %v1891_v18 = vld [vmem:[%s6329_s26 + $0x2fa0] sm:$0xff]  ;;  %v5593_v19 = vpack.c.bf16 %v1894_v12, %v1892_v11  ;;  %v4827_v25 = vpack.c.bf16 %v1125_v17, %v1123_v16  ;;  %v5621_v12 = vpack.c.bf16 %v1922_v10, %v1920_v9  ;;  %v1926_v16 = vld [vmem:[%s6329_s26 + $0x30b8] sm:$0xff]  ;;  %v1961_v10 = vld [vmem:[%s6329_s26 + $0x31d0] sm:$0xff] }
 0x377   : > { %5574 = vmatprep.subr.bf16.mxu0 %v5573_v23  ;;  %v1896_v23 = vld [vmem:[%s6329_s26 + $0x2fc8] sm:$0xff]  ;;  %v5595_v26 = vpack.c.bf16 %v1893_v20, %v1891_v18  ;;  %v1925_v20 = vld [vmem:[%s6329_s26 + $0x30b0] sm:$0xff]  ;;  %v1959_v9 = vld [vmem:[%s6329_s26 + $0x31c0] sm:$0xff] }
 0x379   : > { %4808 = vmatpush1.bf16.msra.mxu1 %v4807_v29  ;;  %v1129_v29 = vld [vmem:[%s6329_s26 + $0x17d0] sm:$0xff] }
 0x37a   : > { %5576 = vmatpush1.bf16.msra.mxu0 %v5575_v30  ;;  %4810 = vmatprep.subr.bf16.mxu1 %v4809_v31  ;;  %v1895_v30 = vld [vmem:[%s6329_s26 + $0x2fc0] sm:$0xff]  ;;  %v5597_v31 = vpack.c.bf16 %v1898_v24, %v1896_v23  ;;  %v4831_v37 = vpack.c.bf16 %v1129_v29, %v1127_v28  ;;  %v5629_v24 = vpack.c.bf16 %v1930_v22, %v1928_v21  ;;  %v1934_v28 = vld [vmem:[%s6329_s26 + $0x30f8] sm:$0xff]  ;;  %v1967_v21 = vld [vmem:[#allocation2] sm:$0xff] }
 0x37b   : > { %5578 = vmatprep.subr.bf16.mxu0 %v5577_v35  ;;  %v1900_v35 = vld [vmem:[%s6329_s26 + $0x2fe8] sm:$0xff]  ;;  %v5599_v38 = vpack.c.bf16 %v1897_v32, %v1895_v30  ;;  %v1933_v32 = vld [vmem:[%s6329_s26 + $0x30f0] sm:$0xff] }
 0x37d   : > { %4812 = vmatpush1.bf16.msra.mxu1 %v4811_v41  ;;  %v1133_v41 = vld [vmem:[%s6329_s26 + $0x17f0] sm:$0xff] }
 0x37e   : > { %5580 = vmatpush1.bf16.msra.mxu0 %v5579_v42  ;;  %4814 = vmatprep.subr.bf16.mxu1 %v4813_v43  ;;  %v5601_v42 = vpack.c.bf16 %v1902_v36, %v1900_v35  ;;  %v1899_v43 = vld [vmem:[%s6329_s26 + $0x2fe0] sm:$0xff]  ;;  %v5637_v36 = vpack.c.bf16 %v1938_v34, %v1936_v33  ;;  %v3781_v34 = vld [vmem:[%s6354_s18 + $0x8] sm:$0xff] (!%p4027_p5) }
 0x37f   : > { %5582 = vmatprep.subr.bf16.mxu0 %v5581_v47  ;;  %v4835_v47 = vpack.c.bf16 %v1133_v41, %v1131_v40  ;;  %v5603_v48 = vpack.c.bf16 %v1901_v44, %v1899_v43  ;;  %v1942_v40 = vld [vmem:[%s6329_s26 + $0x3138] sm:$0xff]  ;;  %v1939_v43 = vld [vmem:[%s6329_s26 + $0x3120] sm:$0xff]  ;;  %v1941_v44 = vld [vmem:[%s6329_s26 + $0x3130] sm:$0xff] }
 0x381   : > { %4816 = vmatpush1.bf16.msra.mxu1 %v4815_v53  ;;  %v1910_v53 = vld [vmem:[%s6329_s26 + $0x3038] sm:$0xff] }
 0x382   : > { %5584 = vmatpush1.bf16.msra.mxu0 %v5583_v54  ;;  %4818 = vmatprep.subr.bf16.mxu1 %v4817_v55  ;;  %v339_v54 = vld [vmem:[%s6459_s27 + $0xb0] sm:$0xff]  ;;  %v5609_v57 = vpack.c.bf16 %v1910_v53, %v1908_v52  ;;  %v1950_v52 = vld [vmem:[%s6329_s26 + $0x3178] sm:$0xff] }
 0x383   : > { %5586 = vmatprep.subr.bf16.mxu0 %v5585_v59  ;;  %v363_v55 = vld [vmem:[%s6459_s27 + $0x170] sm:$0xff]  ;;  %v1909_v59 = vld [vmem:[%s6329_s26 + $0x3030] sm:$0xff] }
 0x384   : > { %v5611_v63 = vpack.c.bf16 %v1909_v59, %v1907_v58  ;;  %v1954_v58 = vld [vmem:[%s6329_s26 + $0x3198] sm:$0xff] }
 0x385   : > { %4820 = vmatpush1.bf16.msra.mxu1 %v4819_v1  ;;  %v1911_v1 = vld [vmem:[%s6329_s26 + $0x3040] sm:$0xff] }
 0x386   : > { %5588 = vmatpush1.bf16.msra.mxu0 %v5587_v2  ;;  %4822 = vmatprep.subr.bf16.mxu1 %v4821_v3  ;;  %v1913_v2 = vld [vmem:[%s6329_s26 + $0x3050] sm:$0xff]  ;;  %v1916_v3 = vld [vmem:[%s6329_s26 + $0x3068] sm:$0xff] }
 0x387   : > { %5590 = vmatprep.subr.bf16.mxu0 %v5589_v7  ;;  %v5615_v5 = vpack.c.bf16 %v1913_v2, %v1911_v1  ;;  %v5617_v6 = vpack.c.bf16 %v1918_v4, %v1916_v3  ;;  %v1915_v7 = vld [vmem:[%s6329_s26 + $0x3060] sm:$0xff]  ;;  %v5655_v1 = vpack.c.bf16 %v1953_v62, %v1951_v61  ;;  %v1957_v4 = vld [vmem:[%s6329_s26 + $0x31b0] sm:$0xff] }
 0x388   : > { %v5619_v11 = vpack.c.bf16 %v1917_v8, %v1915_v7  ;;  %v1955_v3 = vld [vmem:[%s6329_s26 + $0x31a0] sm:$0xff] }
 0x389   : > { %4824 = vmatpush1.bf16.msra.mxu1 %v4823_v13  ;;  %v1919_v13 = vld [vmem:[%s6329_s26 + $0x3080] sm:$0xff]  ;;  %v5659_v7 = vpack.c.bf16 %v1957_v4, %v1955_v3  ;;  %v3807_v4 = vld [vmem:[%s6354_s18 + $0xd8] sm:$0xff] (!%p4027_p5) }
 0x38a   : > { %5592 = vmatpush1.bf16.msra.mxu0 %v5591_v14  ;;  %4826 = vmatprep.subr.bf16.mxu1 %v4825_v15  ;;  %v1921_v14 = vld [vmem:[%s6329_s26 + $0x3090] sm:$0xff]  ;;  %v1924_v15 = vld [vmem:[%s6329_s26 + $0x30a8] sm:$0xff]  ;;  %v3806_v3 = vld [vmem:[%s6354_s18 + $0xd0] sm:$0xff] (!%p4027_p5) }
 0x38b   : > { %5594 = vmatprep.subr.bf16.mxu0 %v5593_v19  ;;  %v5623_v17 = vpack.c.bf16 %v1921_v14, %v1919_v13  ;;  %v5625_v18 = vpack.c.bf16 %v1926_v16, %v1924_v15  ;;  %v1923_v19 = vld [vmem:[%s6329_s26 + $0x30a0] sm:$0xff]  ;;  %v5663_v13 = vpack.c.bf16 %v1961_v10, %v1959_v9  ;;  %v1965_v16 = vld [vmem:[%s6329_s26 + $0x31f0] sm:$0xff]  ;;  %v5689_v10 = vpack.c.bf16 (!%p4027_p5), %v3807_v4, %v3806_v3 }
 0x38c   : > { %v5627_v23 = vpack.c.bf16 %v1925_v20, %v1923_v19  ;;  %v1963_v15 = vld [vmem:[%s6329_s26 + $0x31e0] sm:$0xff] }
 0x38d   : > { %4828 = vmatpush1.bf16.msra.mxu1 %v4827_v25  ;;  %v1927_v25 = vld [vmem:[%s6329_s26 + $0x30c0] sm:$0xff] }
 0x38e   : > { %5596 = vmatpush1.bf16.msra.mxu0 %v5595_v26  ;;  %4830 = vmatprep.subr.bf16.mxu1 %v4829_v27  ;;  %v1929_v26 = vld [vmem:[%s6329_s26 + $0x30d0] sm:$0xff]  ;;  %v1932_v27 = vld [vmem:[%s6329_s26 + $0x30e8] sm:$0xff] }
 0x38f   : > { %5598 = vmatprep.subr.bf16.mxu0 %v5597_v31  ;;  %v5631_v29 = vpack.c.bf16 %v1929_v26, %v1927_v25  ;;  %v5633_v30 = vpack.c.bf16 %v1934_v28, %v1932_v27  ;;  %v1931_v31 = vld [vmem:[%s6329_s26 + $0x30e0] sm:$0xff] }
 0x390   : > { %v5635_v35 = vpack.c.bf16 %v1933_v32, %v1931_v31  ;;  %v3780_v31 = vld [vmem:[%s6354_s18] sm:$0xff] (!%p4027_p5)  ;;  %v3756_v32 = vlaneseq (!%p4027_p5) }
 0x391   : > { %4832 = vmatpush1.bf16.msra.mxu1 %v4831_v37  ;;  %v1935_v37 = vld [vmem:[%s6329_s26 + $0x3100] sm:$0xff] }
 0x392   : > { %5600 = vmatpush1.bf16.msra.mxu0 %v5599_v38  ;;  %4834 = vmatprep.subr.bf16.mxu1 %v4833_v39  ;;  %v1937_v38 = vld [vmem:[%s6329_s26 + $0x3110] sm:$0xff]  ;;  %v1940_v39 = vld [vmem:[%s6329_s26 + $0x3128] sm:$0xff] }
 0x393   : > { %5602 = vmatprep.subr.bf16.mxu0 %v5601_v42  ;;  %v5639_v41 = vpack.c.bf16 %v1937_v38, %v1935_v37  ;;  %v5641_v42 = vpack.c.bf16 %v1942_v40, %v1940_v39  ;;  %v5671_v37 = vpack.c.bf16 (!%p4027_p5), %v3781_v34, %v3780_v31  ;;  %v3782_v39 = vld [vmem:[%s6354_s18 + $0x10] sm:$0xff] (!%p4027_p5)  ;;  %v3783_v40 = vld [vmem:[%s6354_s18 + $0x18] sm:$0xff] (!%p4027_p5) }
 0x395   : > { %4836 = vmatpush1.bf16.msra.mxu1 %v4835_v47  ;;  %v5643_v47 = vpack.c.bf16 %v1941_v44, %v1939_v43  ;;  %v5675_v43 = vpack.c.bf16 (!%p4027_p5), %v3783_v40, %v3782_v39  ;;  %v3757_v44 = vshrl.u32 (!%p4027_p5), %v3756_v32, 7 }
 0x396   : > { %5604 = vmatpush1.bf16.msra.mxu0 %v5603_v48  ;;  %v5645_v48 = vpack.c.bf16 %v1946_v46, %v1944_v45  ;;  %v3784_v46 = vld [vmem:[%s6354_s18 + $0x20] sm:$0xff] (!%p4027_p5) }
 0x397   : > { %5606 = vmatprep.subr.bf16.mxu0 %v5605_v49  ;;  %v1943_v49 = vld [vmem:[%s6329_s26 + $0x3140] sm:$0xff] }
 0x398   : > { %2815 = vmatmul.mubr.f32.vlgmr.msra.gmra.mrb[0].mxu1 %v339_v54  ;;  %v5647_v53 = vpack.c.bf16 %v1945_v50, %v1943_v49  ;;  %v5649_v54 = vpack.c.bf16 %v1950_v52, %v1948_v51  ;;  %v3803_v49 = vld [vmem:[%s6354_s18 + $0xb8] sm:$0xff] (!%p4027_p5)  ;;  %v3762_v51 = vsub.s32 (!%p4027_p5), 1, %v3757_v44  ;;  %v3758_v52 = vsub.s32 (!%p4027_p5), 0, %v3757_v44 }
 0x399   : > { %3667 = vmatmul.mubr.f32.vlgmr.msra.gmra.mrb[0].mxu0 %v363_v55  ;;  %v1947_v55 = vld [vmem:[%s6329_s26 + $0x3160] sm:$0xff] }
 0x39a   : > { %5608 = vmatpush1.bf16.msra.mxu0 %v5607_v56  ;;  %3737 = vmatprep.mubr.f32.mxu0 %v366_v60  ;;  %v1949_v56 = vld [vmem:[%s6329_s26 + $0x3170] sm:$0xff] }
 0x39b   : > { %5610 = vmatprep.subr.bf16.mxu0 %v5609_v57  ;;  %v1952_v57 = vld [vmem:[%s6329_s26 + $0x3188] sm:$0xff]  ;;  %v5651_v59 = vpack.c.bf16 %v1949_v56, %v1947_v55  ;;  %v3804_v56 = vld [vmem:[%s6354_s18 + $0xc0] sm:$0xff] (!%p4027_p5) }
 0x39c   : > { %v5653_v60 = vpack.c.bf16 %v1954_v58, %v1952_v57  ;;  %v3787_v55 = vld [vmem:[%s6354_s18 + $0x38] sm:$0xff] (!%p4027_p5)  ;;  %v3805_v57 = vld [vmem:[%s6354_s18 + $0xc8] sm:$0xff] (!%p4027_p5) }
 0x39e   : > { %5612 = vmatpush1.bf16.msra.mxu0 %v5611_v63  ;;  %v1956_v63 = vld [vmem:[%s6329_s26 + $0x31a8] sm:$0xff] }
 0x39f   : > { %5614 = vmatprep.subr.bf16.mxu0 %v5613_v0  ;;  %v1958_v0 = vld [vmem:[%s6329_s26 + $0x31b8] sm:$0xff] }
 0x3a0   : > { %v5657_v2 = vpack.c.bf16 %v1958_v0, %v1956_v63  ;;  %v5685_v0 = vpack.c.bf16 (!%p4027_p5), %v3805_v57, %v3804_v56 }
 0x3a2   : > { %5616 = vmatpush1.bf16.msra.mxu0 %v5615_v5  ;;  %v1960_v5 = vld [vmem:[%s6329_s26 + $0x31c8] sm:$0xff] }
 0x3a3   : > { %5618 = vmatprep.subr.bf16.mxu0 %v5617_v6  ;;  %v1962_v6 = vld [vmem:[%s6329_s26 + $0x31d8] sm:$0xff] }
 0x3a4   : > { %v5661_v8 = vpack.c.bf16 %v1962_v6, %v1960_v5 }
 0x3a6   : > { %5620 = vmatpush1.bf16.msra.mxu0 %v5619_v11  ;;  %v1964_v11 = vld [vmem:[%s6329_s26 + $0x31e8] sm:$0xff] }
 0x3a7   : > { %5622 = vmatprep.subr.bf16.mxu0 %v5621_v12  ;;  %v1966_v12 = vld [vmem:[%s6329_s26 + $0x31f8] sm:$0xff] }
 0x3a8   : > { %v5665_v14 = vpack.c.bf16 %v1966_v12, %v1964_v11  ;;  %v3790_v11 = vld [vmem:[%s6354_s18 + $0x50] sm:$0xff] (!%p4027_p5)  ;;  %v3791_v12 = vld [vmem:[%s6354_s18 + $0x58] sm:$0xff] (!%p4027_p5) }
 0x3aa   : > { %5624 = vmatpush1.bf16.msra.mxu0 %v5623_v17  ;;  %v5667_v17 = vpack.c.bf16 %v1965_v16, %v1963_v15 }
 0x3ab   : > { %5626 = vmatprep.subr.bf16.mxu0 %v5625_v18  ;;  %v365_v18 = vld [vmem:[%s6459_s27 + $0x180] sm:$0xff] }
 0x3ae   : > { %5628 = vmatpush1.bf16.msra.mxu0 %v5627_v23 }
 0x3af   : > { %5630 = vmatprep.subr.bf16.mxu0 %v5629_v24  ;;  %v1968_v24 = vld [vmem:[#allocation2 + $0x8] sm:$0xff] }
 0x3b2   : > { %5632 = vmatpush1.bf16.msra.mxu0 %v5631_v29  ;;  %v3796_v29 = vld [vmem:[%s6354_s18 + $0x80] sm:$0xff] (!%p4027_p5) }
 0x3b3   : > { %5634 = vmatprep.subr.bf16.mxu0 %v5633_v30  ;;  %v3797_v30 = vld [vmem:[%s6354_s18 + $0x88] sm:$0xff] (!%p4027_p5) }
 0x3b4   : > { %v5669_v33 = vpack.c.bf16 (!%p4027_p5), %v3797_v30, %v3796_v29 }
 0x3b6   : > { %5636 = vmatpush1.bf16.msra.mxu0 %v5635_v35  ;;  %v3798_v35 = vld [vmem:[%s6354_s18 + $0x90] sm:$0xff] (!%p4027_p5) }
 0x3b7   : > { %5638 = vmatprep.subr.bf16.mxu0 %v5637_v36  ;;  %v3799_v36 = vld [vmem:[%s6354_s18 + $0x98] sm:$0xff] (!%p4027_p5) }
 0x3b8   : > { %v5673_v38 = vpack.c.bf16 (!%p4027_p5), %v3799_v36, %v3798_v35 }
 0x3ba   : > { %5640 = vmatpush1.bf16.msra.mxu0 %v5639_v41  ;;  %v3800_v41 = vld [vmem:[%s6354_s18 + $0xa0] sm:$0xff] (!%p4027_p5) }
 0x3bb   : > { %5642 = vmatprep.subr.bf16.mxu0 %v5641_v42  ;;  %v3801_v42 = vld [vmem:[%s6354_s18 + $0xa8] sm:$0xff] (!%p4027_p5) }
 0x3bc   : > { %v5677_v45 = vpack.c.bf16 (!%p4027_p5), %v3801_v42, %v3800_v41 }
 0x3be   : > { %5644 = vmatpush1.bf16.msra.mxu0 %v5643_v47  ;;  %v3785_v47 = vld [vmem:[%s6354_s18 + $0x28] sm:$0xff] (!%p4027_p5) }
 0x3bf   : > { %5646 = vmatprep.subr.bf16.mxu0 %v5645_v48  ;;  %v3802_v48 = vld [vmem:[%s6354_s18 + $0xb0] sm:$0xff] (!%p4027_p5)  ;;  %v5679_v50 = vpack.c.bf16 (!%p4027_p5), %v3785_v47, %v3784_v46 }
 0x3c2   : > { %5648 = vmatpush1.bf16.msra.mxu0 %v5647_v53  ;;  %v5681_v53 = vpack.c.bf16 (!%p4027_p5), %v3803_v49, %v3802_v48 }
 0x3c3   : > { %5650 = vmatprep.subr.bf16.mxu0 %v5649_v54  ;;  %v3786_v54 = vld [vmem:[%s6354_s18 + $0x30] sm:$0xff] (!%p4027_p5) }
 0x3c4   : > { %v5683_v61 = vpack.c.bf16 (!%p4027_p5), %v3787_v55, %v3786_v54 }
 0x3c6   : > { %5652 = vmatpush1.bf16.msra.mxu0 %v5651_v59  ;;  %v3754_v59 = vld [vmem:[%s259_s13] sm:$0x3] (!%p4027_p5) }
 0x3c7   : > { %5654 = vmatprep.subr.bf16.mxu0 %v5653_v60  ;;  %v3763_v62 = vrot.slane (!%p4027_p5), %v3754_v59, %v3762_v51  ;;  %v3759_v63 = vrot.slane (!%p4027_p5), %v3754_v59, %v3758_v52 }
 0x3ca   : > { %5656 = vmatpush1.bf16.msra.mxu0 %v5655_v1  ;;  %v3788_v1 = vld [vmem:[%s6354_s18 + $0x40] sm:$0xff] (!%p4027_p5) }
 0x3cb   : > { %5658 = vmatprep.subr.bf16.mxu0 %v5657_v2  ;;  %v3789_v2 = vld [vmem:[%s6354_s18 + $0x48] sm:$0xff] (!%p4027_p5) }
 0x3ce   : > { %5660 = vmatpush1.bf16.msra.mxu0 %v5659_v7  ;;  %v5687_v7 = vpack.c.bf16 (!%p4027_p5), %v3789_v2, %v3788_v1 }
 0x3cf   : > { %5662 = vmatprep.subr.bf16.mxu0 %v5661_v8 }
 0x3d2   : > { %5664 = vmatpush1.bf16.msra.mxu0 %v5663_v13  ;;  %v3808_v13 = vld [vmem:[%s6354_s18 + $0xe0] sm:$0xff] (!%p4027_p5) }
 0x3d3   : > { %5666 = vmatprep.subr.bf16.mxu0 %v5665_v14  ;;  %v3809_v14 = vld [vmem:[%s6354_s18 + $0xe8] sm:$0xff] (!%p4027_p5) }
 0x3d6   : > { %5668 = vmatpush1.bf16.msra.mxu0 %v5667_v17  ;;  %v5691_v17 = vpack.c.bf16 (!%p4027_p5), %v3791_v12, %v3790_v11 }
 0x3d7   : > { %5670 = vmatprep.subr.bf16.mxu0 (!%p4027_p5), %v5669_v33 }
 0x3d9   : > { %3738 = vmatmul.mubr.f32.vlgmr.msra.gmra.mrb[0].mxu0 %v365_v18  ;;  %v5693_v18 = vpack.c.bf16 (!%p4027_p5), %v3809_v14, %v3808_v13 }
 0x3da   : > { %5672 = vmatpush3.bf16.msra.mxu0 (!%p4027_p5), %v5671_v37 }
 0x3db   : > { %5674 = vmatprep.subr.bf16.mxu0 (!%p4027_p5), %v5673_v38 }
 0x3de   : > { %5676 = vmatpush3.bf16.msra.mxu0 (!%p4027_p5), %v5675_v43 }
 0x3df   : > { %5678 = vmatprep.subr.bf16.mxu0 (!%p4027_p5), %v5677_v45 }
 0x3e2   : > { %5680 = vmatpush3.bf16.msra.mxu0 (!%p4027_p5), %v5679_v50 }
 0x3e3   : > { %5682 = vmatprep.subr.bf16.mxu0 (!%p4027_p5), %v5681_v53 }
 0x3e6   : > { %5684 = vmatpush3.bf16.msra.mxu0 (!%p4027_p5), %v5683_v61 }
 0x3e7   : > { %5686 = vmatprep.subr.bf16.mxu0 (!%p4027_p5), %v5685_v0 }
 0x3ea   : > { %5688 = vmatpush3.bf16.msra.mxu0 (!%p4027_p5), %v5687_v7 }
 0x3eb   : > { %5690 = vmatprep.subr.bf16.mxu0 (!%p4027_p5), %v5689_v10 }
 0x3ee   : > { %5692 = vmatpush3.bf16.msra.mxu0 (!%p4027_p5), %v5691_v17 }
 0x3ef   : > { %5694 = vmatprep.subr.bf16.mxu0 (!%p4027_p5), %v5693_v18 }
 0x46b   : > { %v2816_v19 = vpop.f32.mrb[0].mxu1 }
 0x46c   : > { %v2818_v20 = vpop.f32.mrb[1].mxu1 }
 0x4ac   : > { %v3739_v22 = vpop.f32.mrb[0].mxu0  ;;  %3751 = sbr.rel (%p4027_p5) target bundleno = 1447 (0x5a7), region = 56 }
 0x4ad   : > { %v5701_v23 = vadd.f32 %v3739_v22, %v2816_v19  ;;  %v3741_v25 = vpop.f32.mrb[1].mxu0  ;;  %v3792_v19 = vld [vmem:[%s6354_s18 + $0x60] sm:$0xff] (!%p4027_p5)  ;;  %v3811_v22 = vld [vmem:[%s6354_s18 + $0xf8] sm:$0xff] (!%p4027_p5) }
 0x4ae   : > { %v5702_v26 = vadd.f32 %v3741_v25, %v2818_v20  ;;  %v3793_v20 = vld [vmem:[%s6354_s18 + $0x68] sm:$0xff] (!%p4027_p5)  ;;  %v3794_v25 = vld [vmem:[%s6354_s18 + $0x70] sm:$0xff] (!%p4027_p5) }
 0x4af   : > { %v3744_v27 = vadd.f32 %v5701_v23, %v1967_v21  ;;  %v3810_v21 = vld [vmem:[%s6354_s18 + $0xf0] sm:$0xff] (!%p4027_p5)  ;;  %v5695_v23 = vpack.c.bf16 (!%p4027_p5), %v3793_v20, %v3792_v19 }
 0x4b0   : > { %v3745_v28 = vadd.f32 %v5702_v26, %v1968_v24  ;;  %v5697_v24 = vpack.c.bf16 (!%p4027_p5), %v3811_v22, %v3810_v21  ;;  %v3795_v26 = vld [vmem:[%s6354_s18 + $0x78] sm:$0xff] (!%p4027_p5) }
 0x4b1   : > { %3746 = vst [vmem:[#allocation2] sm:$0xff] %v3744_v27  ;;  %5696 = vmatpush3.bf16.msra.mxu0 (!%p4027_p5), %v5695_v23  ;;  %v5699_v27 = vpack.c.bf16 (!%p4027_p5), %v3795_v26, %v3794_v25 }
 0x4b2   : > { %3747 = vst [vmem:[#allocation2 + $0x8] sm:$0xff] %v3745_v28  ;;  %5698 = vmatprep.subr.bf16.mxu0 (!%p4027_p5), %v5697_v24 }
 0x4b5   : > { %5700 = vmatpush3.bf16.msra.mxu0 %v5699_v27 }
 0x4b8   : > { %v3752_v60 = vld [vmem:[#allocation2] sm:$0xff] }
 0x4b9   : > { %v3753_v58 = vld [vmem:[#allocation2 + $0x8] sm:$0xff]  ;;  %v3766_v6 = vadd.f32 %v3759_v63, %v3752_v60 }
 0x4ba   : > { %v3767_v5 = vadd.f32 %v3763_v62, %v3753_v58 }
 0x4bb   : > { %v3770_v9 = vmin.f32 %v3766_v6, 0.0  ;;  %vm3768_vm1 = vcmp.gt.f32.partialorder %v3766_v6, 0.0 }
 0x4bc   : > { %v3771_v8 = vmin.f32 %v3767_v5, 0.0  ;;  %vm3769_vm0 = vcmp.gt.f32.partialorder %v3767_v5, 0.0 }
 0x4bd   : > { %v3772_v16 = vmul.f32 1.442695, %v3770_v9 }
 0x4be   : > { %v3774_v15 = vmul.f32 1.442695, %v3771_v8 }
 0x4c0   : > { %5866 = vpow2.f32 %v3774_v15 }
 0x4c1   : > { %5868 = vpow2.f32 %v3772_v16 }
 0x4ca   : > { %v5867_v28 = vpop.eup %5866 }
 0x4cb   : > { %v5869_v29 = vpop.eup %5868  ;;  %v4029_v30 = vadd.f32 -1.0, %v5867_v28 }
 0x4cc   : > { %v4028_v31 = vadd.f32 -1.0, %v5869_v29 }
 0x4cd   : > { %v3779_v32 = vsel %vm3769_vm0, %v3767_v5, %v4029_v30 }
 0x4ce   : > { %3876 = vmatprep.mubr.f32.mxu0 %v3779_v32  ;;  %v3778_v33 = vsel %vm3768_vm1, %v3766_v6, %v4028_v31 }
 0x4cf   : > { %3877 = vmatmul.mubr.f32.vlgmr.msra.gmra.mrb[0].mxu0 %v3778_v33 }
 0x5a2   : > { %v4066_v34 = vpop.f32.mrb[0].mxu0 }
 0x5a3   : > { %v4067_v35 = vpop.f32.mrb[1].mxu0 }
 0x5a4   : > { %v4068_v36 = vadd.f32 %v4067_v35, %v4066_v34 }
 0x5a6   : > { %3882 = vst [vmem:[%s6349_s30] sm:$0xff] %v4068_v36 }
 0x5a7 PF: > { %s18_s25 = sadd.s32 1, %s6056_s25   ;;  %s8119_s26 = sld [smem:[#allocation12_spill]] }
 0x5a8   : > { %p15_p13 = scmp.ge.s32.totalorder %s18_s25, 10   ;;  %s8120_s8 = sld [smem:[#allocation13_spill]] }
 0x5a9   : > { %s8121_s15 = smov %s6020_s16  ;;  %s8122_s16 = smov %s6024_s17 }
 0x5aa   : > { %s8123_s17 = smov %s6260_s5  ;;  %s8124_s18 = smov %s6032_s19 }
 0x5ab   : > { %s8125_s19 = smov %s6036_s20  ;;  %s8126_s20 = smov %s6175_s14 }
 0x5ac   : > { %s8127_s21 = smov %s6048_s23  ;;  %s8128_s22 = smov %s6052_s24 }
 0x5ad   : > { %s8129_s23 = smov %s8119_s26  ;;  %17 = sbr.rel (!%p15_p13) target bundleno = 10 (0xa), region = 104 }
 0x5ae   : > { %s8130_s24 = smov %s8120_s8 }
 0x5b4   :  { %3902 = vsyncpa [#allocation4], 1 }
 0x5b5   :  { %3904 = vsyncpa [#allocation4 + $0x1], 1 }
 0x5b6   :  { %3905 = vsyncpa [#allocation6], 1 }
 0x5b7   :  { %3907 = vsyncpa [#allocation6 + $0x1], 1 }

</bundles_post_ra>
